<compile_context>
chip_gen: v6e
topology: v6e:2x2x1
jax: 0.10.0
libtpu: 0.0.40
codegen_flags: <defaults>
</compile_context>

<pallas_src>
import jax
import jax.numpy as jnp
from jax.experimental import pallas as pl
from jax.experimental.pallas import tpu as pltpu

N_EMBED = 384          # matches the reference module's n_embed
HEAD_SIZE = 64         # n_embed // n_head for the standard minigpt config
HS_PAD = 128           # each projection padded to its own 128-lane group
BLOCK_SIZE = 256       # causal window upper bound (T <= BLOCK_SIZE)
B_TILE = 4             # batch elements per grid step (>= 4 steps at B=16)
NEG_INF = -1e30        # large finite negative (avoids exp(-inf - -inf) NaNs)


def head_kernel(x_ref, wqkv_ref, o_ref):
    bt, T, C = x_ref.shape
    hs = HEAD_SIZE

    # ---- fused QKV projection: one big MXU matmul over all rows in the tile ----
    x2 = x_ref[...].reshape(bt * T, C)
    if x2.dtype != jnp.bfloat16:          # compiles away when x is bf16
        x2 = x2.astype(jnp.bfloat16)
    qkv = jnp.dot(x2, wqkv_ref[...],
                  preferred_element_type=jnp.float32)        # (bt*T, 3*HS_PAD)
    qkv = qkv.reshape(bt, T, 3 * HS_PAD).astype(jnp.bfloat16)

    # Lane-aligned slices; q/k keep their zero padding (adds 0 to the dot).
    q = qkv[:, :, 0 * HS_PAD:1 * HS_PAD]                     # (bt, T, 128)
    k = qkv[:, :, 1 * HS_PAD:2 * HS_PAD]                     # (bt, T, 128)
    v = qkv[:, :, 2 * HS_PAD:2 * HS_PAD + hs]                # (bt, T, 64)

    # ---- batched attention scores (bt, T, T); scale pre-folded into Wq ----
    s = jnp.einsum('btd,bsd->bts', q, k,
                   preferred_element_type=jnp.float32)

    row = jax.lax.broadcasted_iota(jnp.int32, (T, T), 0)
    col = jax.lax.broadcasted_iota(jnp.int32, (T, T), 1)
    causal = (row >= col)[None, :, :]
    s = jnp.where(causal, s, NEG_INF)

    # ---- softmax in f32 ----
    s = s - jnp.max(s, axis=-1, keepdims=True)
    e = jnp.exp(s)
    p = e * pl.reciprocal(jnp.sum(e, axis=-1, keepdims=True), approx=True)
    # TODO(synk): attention-weight dropout omitted (eval-mode identity)

    # ---- weighted values ----
    out = jnp.einsum('bts,bsd->btd', p.astype(jnp.bfloat16), v,
                     preferred_element_type=jnp.float32)     # (bt, T, hs)
    o_ref[...] = out.astype(o_ref.dtype)


def prepare_head_params(wq, wk, wv):
    """One-time parameter prep: fuse Wq/Wk/Wv into a lane-group-padded bf16
    weight of shape (C, 3*HS_PAD), with the reference's C**-0.5 folded into Wq."""
    C, hs = wq.shape
    assert C == N_EMBED and hs == HEAD_SIZE
    scale = C ** (-0.5)                    # reference uses n_embed**-0.5
    wqkv = jnp.zeros((C, 3 * HS_PAD), jnp.float32)
    wqkv = wqkv.at[:, 0 * HS_PAD:0 * HS_PAD + hs].set(wq * scale)
    wqkv = wqkv.at[:, 1 * HS_PAD:1 * HS_PAD + hs].set(wk)
    wqkv = wqkv.at[:, 2 * HS_PAD:2 * HS_PAD + hs].set(wv)
    return wqkv.astype(jnp.bfloat16)


def head_forward(x, wqkv):
    """x: (B, T, N_EMBED), preferably bf16 (the kernel is HBM-bound on x).
    wqkv: pre-fused bf16 weight from prepare_head_params."""
    B, T, C = x.shape
    assert C == N_EMBED and T <= BLOCK_SIZE
    assert wqkv.shape == (C, 3 * HS_PAD)
    b_tile = min(B_TILE, B)
    assert B % b_tile == 0

    return pl.pallas_call(
        head_kernel,
        out_shape=jax.ShapeDtypeStruct((B, T, HEAD_SIZE), x.dtype),
        grid_spec=pltpu.PrefetchScalarGridSpec(
            num_scalar_prefetch=0,
            grid=(B // b_tile,),
            in_specs=[
                pl.BlockSpec((b_tile, T, C), lambda b: (b, 0, 0)),       # x tile
                pl.BlockSpec((C, 3 * HS_PAD), lambda b: (0, 0)),         # fused W
            ],
            out_specs=pl.BlockSpec((b_tile, T, HEAD_SIZE),
                                   lambda b: (b, 0, 0)),
        ),
        compiler_params=pltpu.CompilerParams(
            dimension_semantics=("parallel",),
            vmem_limit_bytes=32 * 1024 * 1024,   # same scoped budget on v5e/v6e/v7x
        ),
    )(x, wqkv)


if __name__ == "__main__":
    key = jax.random.PRNGKey(0)
    kx, k1, k2, k3 = jax.random.split(key, 4)
    B, T = 16, 128                      # grid = 4 parallel steps with B_TILE=4
    # Activations produced directly in bf16 (interface-level change, not a
    # standalone wrapper cast).
    x = jax.random.normal(kx, (B, T, N_EMBED), jnp.bfloat16)
    std = 0.02
    wq = std * jax.random.normal(k1, (N_EMBED, HEAD_SIZE), jnp.float32)
    wk = std * jax.random.normal(k2, (N_EMBED, HEAD_SIZE), jnp.float32)
    wv = std * jax.random.normal(k3, (N_EMBED, HEAD_SIZE), jnp.float32)

    wqkv = prepare_head_params(wq, wk, wv)   # hoisted one-time param prep
    out = head_forward(x, wqkv)
    jax.block_until_ready(out)
    assert out.shape == (B, T, HEAD_SIZE)
    print("KERNEL_OK")
</pallas_src>

<mosaic_0001>
module attributes {stable_mosaic.version = 11 : i64} {
  func.func @head_kernel(%arg0: i32, %arg1: memref<4x128x384xbf16, #tpu.memory_space<vmem>>, %arg2: memref<384x384xbf16, #tpu.memory_space<vmem>>, %arg3: memref<4x128x64xbf16, #tpu.memory_space<vmem>>) attributes {dimension_semantics = [#tpu.dimension_semantics<parallel>], iteration_bounds = array<i64: 4>, scalar_prefetch = 0 : i64, scratch_operands = 0 : i64, tpu.core_type = #tpu.core_type<tc>, window_params = [{transform_indices = @transform_0, window_bounds = array<i64: 4, 128, 384>}, {pipeline_mode = #tpu.pipeline_mode<synchronous>, transform_indices = @transform_1, window_bounds = array<i64: 384, 384>}, {transform_indices = @transform_2, window_bounds = array<i64: 4, 128, 64>}]} {
    %c0 = arith.constant 0 : index
    %c0_0 = arith.constant 0 : index
    %c0_1 = arith.constant 0 : index
    %0 = vector.load %arg1[%c0, %c0_0, %c0_1] : memref<4x128x384xbf16, #tpu.memory_space<vmem>>, vector<4x128x384xbf16>
    %1 = vector.shape_cast %0 : vector<4x128x384xbf16> to vector<512x384xbf16>
    %c0_2 = arith.constant 0 : index
    %c0_3 = arith.constant 0 : index
    %2 = vector.load %arg2[%c0_2, %c0_3] : memref<384x384xbf16, #tpu.memory_space<vmem>>, vector<384x384xbf16>
    %cst = arith.constant dense<0.000000e+00> : vector<512x384xf32>
    %3 = tpu.matmul %1, %2, %cst {dimension_numbers = #tpu.dot_dimension_numbers<[1], [0], [0], [1], [0, 0, 1, 1], [], []>} : vector<512x384xbf16>, vector<384x384xbf16>, vector<512x384xf32> -> vector<512x384xf32>
    %4 = vector.shape_cast %3 : vector<512x384xf32> to vector<4x128x384xf32>
    %5 = arith.truncf %4 : vector<4x128x384xf32> to vector<4x128x384xbf16>
    %6 = vector.extract_strided_slice %5 {offsets = [0, 0, 0], sizes = [4, 128, 128], strides = [1, 1, 1]} : vector<4x128x384xbf16> to vector<4x128x128xbf16>
    %7 = vector.extract_strided_slice %5 {offsets = [0, 0, 128], sizes = [4, 128, 128], strides = [1, 1, 1]} : vector<4x128x384xbf16> to vector<4x128x128xbf16>
    %8 = vector.extract_strided_slice %5 {offsets = [0, 0, 256], sizes = [4, 128, 64], strides = [1, 1, 1]} : vector<4x128x384xbf16> to vector<4x128x64xbf16>
    "tpu.trace_start"() <{level = 10 : i32, message = "btd,bsd->bts"}> : () -> ()
    %cst_4 = arith.constant dense<0.000000e+00> : vector<4x128x128xf32>
    %9 = tpu.matmul %6, %7, %cst_4 {dimension_numbers = #tpu.dot_dimension_numbers<[2], [2], [1], [1], [0, 0, 0, 1, 1, 1], [0], [0]>} : vector<4x128x128xbf16>, vector<4x128x128xbf16>, vector<4x128x128xf32> -> vector<4x128x128xf32>
    "tpu.trace_stop"() : () -> ()
    %10 = tpu.iota {dimensions = array<i32: 0>} : vector<128x128xi32>
    %11 = tpu.iota {dimensions = array<i32: 1>} : vector<128x128xi32>
    %12 = arith.cmpi sge, %10, %11 : vector<128x128xi32>
    %13 = vector.shape_cast %12 : vector<128x128xi1> to vector<1x128x128xi1>
    %cst_5 = arith.constant -1.000000e+30 : f32
    %14 = vector.shape_cast %13 : vector<1x128x128xi1> to vector<1x128x128xi1>
    %15 = vector.broadcast %14 : vector<1x128x128xi1> to vector<4x128x128xi1>
    %16 = vector.broadcast %cst_5 : f32 to vector<4x128x128xf32>
    %17 = arith.select %15, %9, %16 : vector<4x128x128xi1>, vector<4x128x128xf32>
    %cst_6 = arith.constant dense<0xFF800000> : vector<4x128xf32>
    %18 = vector.multi_reduction <maximumf>, %17, %cst_6 [2] : vector<4x128x128xf32> to vector<4x128xf32>
    %19 = vector.shape_cast %18 : vector<4x128xf32> to vector<4x128x1xf32>
    %20 = vector.broadcast %19 : vector<4x128x1xf32> to vector<4x128x128xf32>
    %21 = arith.subf %17, %20 : vector<4x128x128xf32>
    %22 = math.exp %21 : vector<4x128x128xf32>
    %cst_7 = arith.constant dense<0.000000e+00> : vector<4x128xf32>
    %23 = vector.multi_reduction <add>, %22, %cst_7 [2] : vector<4x128x128xf32> to vector<4x128xf32>
    %24 = vector.shape_cast %23 : vector<4x128xf32> to vector<4x128x1xf32>
    %25 = tpu.reciprocal %24 {approx = true} : vector<4x128x1xf32> -> vector<4x128x1xf32>
    %26 = vector.broadcast %25 : vector<4x128x1xf32> to vector<4x128x128xf32>
    %27 = arith.mulf %22, %26 : vector<4x128x128xf32>
    %28 = arith.truncf %27 : vector<4x128x128xf32> to vector<4x128x128xbf16>
    "tpu.trace_start"() <{level = 10 : i32, message = "bts,bsd->btd"}> : () -> ()
    %cst_8 = arith.constant dense<0.000000e+00> : vector<4x128x64xf32>
    %29 = tpu.matmul %28, %8, %cst_8 {dimension_numbers = #tpu.dot_dimension_numbers<[2], [1], [1], [2], [0, 0, 0, 1, 1, 2], [0], [0]>} : vector<4x128x128xbf16>, vector<4x128x64xbf16>, vector<4x128x64xf32> -> vector<4x128x64xf32>
    "tpu.trace_stop"() : () -> ()
    %30 = arith.truncf %29 : vector<4x128x64xf32> to vector<4x128x64xbf16>
    %c0_9 = arith.constant 0 : index
    %c0_10 = arith.constant 0 : index
    %c0_11 = arith.constant 0 : index
    %31 = vector.load %arg3[%c0_9, %c0_10, %c0_11] : memref<4x128x64xbf16, #tpu.memory_space<vmem>>, vector<4x128x64xbf16>
    tpu.vector_store %arg3[%c0_9, %c0_10, %c0_11], %30 {strides = array<i32>} : memref<4x128x64xbf16, #tpu.memory_space<vmem>>, vector<4x128x64xbf16>,
    return
  }
  func.func @transform_0(%arg0: i32) -> (i32, i32, i32) {
    %c0_i32 = arith.constant 0 : i32
    %c0_i32_0 = arith.constant 0 : i32
    %c0_i32_1 = arith.constant 0 : i32
    return %arg0, %c0_i32, %c0_i32_0 : i32, i32, i32
  }
  func.func @transform_1(%arg0: i32) -> (i32, i32) {
    %c0_i32 = arith.constant 0 : i32
    %c0_i32_0 = arith.constant 0 : i32
    %c0_i32_1 = arith.constant 0 : i32
    return %c0_i32, %c0_i32_0 : i32, i32
  }
  func.func @transform_2(%arg0: i32) -> (i32, i32, i32) {
    %c0_i32 = arith.constant 0 : i32
    %c0_i32_0 = arith.constant 0 : i32
    %c0_i32_1 = arith.constant 0 : i32
    return %arg0, %c0_i32, %c0_i32_0 : i32, i32, i32
  }
}

</mosaic_0001>

<bundles_post_ra>
// kernel: tpu_custom_call.1
= control target key start
LH: loop header
LB: loop body
LE: loop exit
PB: predicated region body
PF: predicated region fallthrough
CT: control target
= control target key end

     0   :  { %7 = vsyncpa [#allocation3], 0  ;;  %s8625_s0 = inlined_call_operand.hbm [shape: bf16[16,128,384], index: 0, kind: input, shape index: {}]   ;;  %s8626_s1 = inlined_call_operand.hbm [shape: bf16[384,384], index: 1, kind: input, shape index: {}]   ;;  %s8627_s2 = inlined_call_operand.vmem [shape: bf16[16,128,64], index: 2, kind: output, shape index: {}]  }
   0x1   :  { %9 = vsyncpa [#allocation3 + $0x1], 0 }
   0x2   :  { %10 = vsyncpa [#allocation5], 0  ;;  %s6113_s9 = smov 0   ;;  %s6115_s10 = smov 0  }
   0x3   :  { %s6117_s11 = smov 0   ;;  %s6119_s12 = smov 0  }
   0x4 LB: > { %s4600_s13 = sadd.s32 4294967295, %s6091_s12   ;;  %p36_p0 = scmp.ne.s32.totalorder %s6083_s10, %s6079_s9  ;;  %s6091_s12 = sphi %s6119_s12, %s9026_s12   ;;  %s6087_s11 = sphi %s6117_s11, %s9025_s11   ;;  %s6083_s10 = sphi %s6115_s10, %s9024_s10   ;;  %s6079_s9 = sphi %s6113_s9, %s9023_s9  }
   0x5   : > { %p6135_p1 = scmp.eq.s32.totalorder %s4600_s13, 0  ;;  %p4602_p2 = scmp.ge.s32.totalorder %s6091_s12, 1 }
   0x6   : > { %p94_p3 = scmp.lt.s32.totalorder %s6091_s12, 5  ;;  %s6093_s17 = smov [#allocation4]  }
   0x7   : > { %s8751_s14 = scalar_select %p6135_p1, 1, 0 }
   0x8   : > { %p6143_p4 = por %p6135_p1, %p36_p0  ;;  %p6147_p5 = pnand %p4602_p2, %p94_p3 }
   0x9   : > { %s106_s18 = sshll.u32 %s6093_s17, 4  ;;  %s6160_s20 = sadd.s32 1, %s6091_s12   ;;  %s107_s18 = int_to_ptr.vmem [resolvable:$true] %s106_s18 }
   0xa   : > { %s8752_s15 = scalar_select %p6143_p4, 1, 0 }
   0xb   : > { %s8753_s16 = scalar_select %p6147_p5, 1, 0 }
   0xc   : > { %p5441_p6 = pneg %p6147_p5  ;;  %s23_s21 = sadd.s32 1, %s6087_s11 }
   0xd   : > { %s20_s22 = ssub.s32 %s6091_s12, %s6160_s20  ;;  %s6010_s23 = scalar_lea.vmem %s107_s18, 9216 }
   0xe   : > { %p6155_p7 = pnand %p5441_p6, %p6135_p1  ;;  %p6011_p9 = scmp.ne.s32.totalorder %s107_s18, %s6010_s23 }
   0xf   : > { %p6018_p12 = scmp.lt.s32.totalorder %s107_s18, %s107_s18  ;;  %p6019_p13 = scmp.lt.s32.totalorder %s6010_s23, %s6010_s23 }
  0x10   : > { %p6001_p8 = pneg %p6155_p7 }
  0x11   : > { %p6020_p0 = por %p6019_p13, %p6018_p12 }
  0x12   : > { %p6013_p10 = pnand %p6011_p9, %p6001_p8 }
  0x14   : > { %p6014_p11 = pneg %p6013_p10 }
  0x16   : > { %p6021_p2 = pnand %p6020_p0, %p6014_p11 }
  0x18   : > { %6024 = shalt.err (!%p6021_p2)
}
  0x19   : > { %s6094_s24 = smov 192   ;;  %s6095_s25 = smov 12  }
  0x1a   : > { %5444 = dma.hbm_to_vmem [thread:$0]  (!%p6155_p7), %s8626_s1, 9216, %s107_s18, [#allocation5], %s6094_s24, %s6094_s24, %s6095_s25  }
  0x1b   : > { %p21_p3 = scmp.eq.s32.totalorder %s20_s22, 0  ;;  %p30_p6 = scmp.ne.s32.totalorder %s6087_s11, %s6083_s10 }
  0x1c   : > { %p31_p8 = scmp.eq.s32.totalorder %s6091_s12, 0  ;;  %p5450_p9 = scmp.lt.s32.totalorder %s6091_s12, 4 }
  0x1d   : > { %s6180_s28 = scalar_select %p21_p3, %s6087_s11, %s23_s21  }
  0x1e   : > { %p32_p10 = por %p31_p8, %p30_p6  ;;  %s120_s29 = sand.u32 1, %s6087_s11  }
  0x1f   : > { %s5432_s30 = smul.u32 768, %s120_s29  ;;  %s6195_s17 = scalar_lea.sflag [#allocation3], %s120_s29 }
  0x20   : > { %s5433_s3 = smul.u32 12288, %s6091_s12  ;;  %p6184_p11 = pnand %p5450_p9, %p32_p10 }
  0x21   : > { %s124_s8 = scalar_lea.vmem [#allocation2], %s5432_s30  ;;  %s6030_s22 = scalar_lea.hbm %s8625_s0, 49152 }
  0x22   : > { %s6191_s7 = scalar_lea.hbm %s8625_s0, %s5433_s3  ;;  %s132_s9 = sshll.u32 %s124_s8, 4  ;;  %s6193_s9 = int_to_ptr.vmem [resolvable:$true] %s132_s9 }
  0x23   : > { %s6025_s18 = scalar_lea.hbm %s6191_s7, 12288  ;;  %p6027_p12 = pneg %p6184_p11 }
  0x24   : > { %p6026_p7 = scmp.ne.s32.totalorder %s6191_s7, %s6025_s18  ;;  %p6031_p2 = scmp.lt.s32.totalorder %s6191_s7, %s8625_s0 }
  0x25   : > { %p6032_p3 = scmp.lt.s32.totalorder %s6030_s22, %s6025_s18 }
  0x26   : > { %p6028_p13 = pnand %p6027_p12, %p6026_p7 }
  0x27   : > { %p6033_p6 = por %p6032_p3, %p6031_p2 }
  0x28   : > { %p6029_p0 = pneg %p6028_p13 }
  0x2a   : > { %p6034_p8 = pnand %p6033_p6, %p6029_p0 }
  0x2c   : > { %6037 = shalt.err (!%p6034_p8)
}
  0x2d   : > { %s6038_s27 = scalar_lea.vmem %s6193_s9, 12288  ;;  %s6096_s29 = smov [#allocation2]  }
  0x2e   : > { %p6039_p9 = scmp.ne.s32.totalorder %s6193_s9, %s6038_s27  ;;  %s6043_s30 = sshll.u32 %s6096_s29, 4  ;;  %s6044_s30 = int_to_ptr.vmem [resolvable:$false] %s6043_s30 }
  0x2f   : > { %s6045_s3 = scalar_lea.vmem %s6044_s30, 24576  ;;  %p6046_p13 = scmp.lt.s32.totalorder %s6193_s9, %s6044_s30 }
  0x30   : > { %p6041_p10 = pnand %p6039_p9, %p6027_p12  ;;  %p6047_p1 = scmp.lt.s32.totalorder %s6045_s3, %s6038_s27 }
  0x32   : > { %p6042_p7 = pneg %p6041_p10  ;;  %p6048_p4 = por %p6047_p1, %p6046_p13 }
  0x34   : > { %p6049_p5 = pnand %p6048_p4, %p6042_p7 }
  0x36   : > { %6052 = shalt.err (!%p6049_p5)
}
  0x37   : > { %5448 = dma.hbm_to_vmem [thread:$0]  (!%p6184_p11), %s6191_s7, 12288, %s6193_s9, %s6195_s17, %s6094_s24, %s6094_s24, %s6095_s25  }
  0x38   : > { %p8756_p12 = scmp.ne.s32.totalorder %s8753_s16, 0 }
  0x3a   : > { %144 = sbr.rel (%p8756_p12) target bundleno = 1400 (0x578), region = 28 }
  0x3f   : > { %s146_s5 = sand.u32 1, %s6083_s10   ;;  %p8757_p1 = scmp.ne.s32.totalorder %s8752_s15, 0 }
  0x40   : > { %s5434_s6 = smul.u32 768, %s146_s5  ;;  %s147_s8 = scalar_lea.sflag [#allocation3], %s146_s5 }
  0x42   : > { %s6222_s18 = scalar_lea.vmem [#allocation2], %s5434_s6 }
  0x43   : > { %6070 = dma.done.wait (%p8757_p1), %s147_s8, 12288  }
  0x44   : > { %6072 = vsyncadd (%p8757_p1), %s147_s8, 4294955008  ;;  %p8758_p4 = scmp.ne.s32.totalorder %s8751_s14, 0 }
  0x46   : > { %6074 = dma.done.wait (%p8758_p4), [#allocation5], 9216  }
  0x47   : > { %6076 = vsyncadd (%p8758_p4), [#allocation5], 4294958080  ;;  %v6097_v0 = vmov 0   ;;  %v5488_v1 = vld [vmem:[#allocation4 + $0xac] ss:$12 sps:$4 sm:$0xff]   ;;  %s4610_s14 = sshll.u32 %s4600_s13, 2 }
  0x48   : > { %1690 = vmatprep.mubr.bf16.mxu1 %v6097_v0  ;;  %v5490_v2 = vld [vmem:[#allocation4 + $0x22c] ss:$12 sps:$4 sm:$0xff]   ;;  %1305 = vmatprep.subr.bf16.mxu0 %v5488_v1  ;;  %v5492_v3 = vld [vmem:[#allocation4 + $0xa8] ss:$12 sps:$4 sm:$0xff]   ;;  %v5498_v7 = vld [vmem:[#allocation4 + $0x90] ss:$12 sps:$4 sm:$0xff]  }
  0x49   : > { %v5493_v4 = vld [vmem:[#allocation4 + $0x228] ss:$12 sps:$4 sm:$0xff]   ;;  %1658 = vmatprep.subr.bf16.mxu1 %v5490_v2  ;;  %1306 = vmatpush1.bf16.msra.mxu0 %v5492_v3  ;;  %v5499_v8 = vld [vmem:[#allocation4 + $0x210] ss:$12 sps:$4 sm:$0xff]   ;;  %v5504_v11 = vld [vmem:[#allocation4 + $0x78] ss:$12 sps:$4 sm:$0xff]  }
  0x4a   : > { %v5494_v5 = vld [vmem:[#allocation4 + $0x94] ss:$12 sps:$4 sm:$0xff]   ;;  %1659 = vmatpush1.bf16.msra.mxu1 %v5493_v4  ;;  %v5500_v9 = vld [vmem:[#allocation4 + $0x7c] ss:$12 sps:$4 sm:$0xff]   ;;  %v5505_v12 = vld [vmem:[#allocation4 + $0x1f8] ss:$12 sps:$4 sm:$0xff]  }
  0x4b   : > { %v5496_v6 = vld [vmem:[#allocation4 + $0x214] ss:$12 sps:$4 sm:$0xff]   ;;  %1307 = vmatprep.subr.bf16.mxu0 %v5494_v5  ;;  %v5502_v10 = vld [vmem:[#allocation4 + $0x1fc] ss:$12 sps:$4 sm:$0xff]   ;;  %v5506_v13 = vld [vmem:[#allocation4 + $0x64] ss:$12 sps:$4 sm:$0xff]  }
  0x4c   : > { %1660 = vmatprep.subr.bf16.mxu1 %v5496_v6  ;;  %v5508_v14 = vld [vmem:[#allocation4 + $0x1e4] ss:$12 sps:$4 sm:$0xff]   ;;  %v5510_v15 = vld [vmem:[#allocation4 + $0x60] ss:$12 sps:$4 sm:$0xff]   ;;  %v5516_v19 = vld [vmem:[#allocation4 + $0x48] ss:$12 sps:$4 sm:$0xff]  }
  0x4d   : > { %1308 = vmatpush1.bf16.msra.mxu0 %v5498_v7  ;;  %v5511_v16 = vld [vmem:[#allocation4 + $0x1e0] ss:$12 sps:$4 sm:$0xff]   ;;  %v5517_v20 = vld [vmem:[#allocation4 + $0x1c8] ss:$12 sps:$4 sm:$0xff]   ;;  %v5522_v23 = vld [vmem:[#allocation4 + $0x30] ss:$12 sps:$4 sm:$0xff]  }
  0x4e   : > { %1661 = vmatpush1.bf16.msra.mxu1 %v5499_v8  ;;  %1309 = vmatprep.subr.bf16.mxu0 %v5500_v9  ;;  %v5512_v17 = vld [vmem:[#allocation4 + $0x4c] ss:$12 sps:$4 sm:$0xff]   ;;  %v5518_v21 = vld [vmem:[#allocation4 + $0x34] ss:$12 sps:$4 sm:$0xff]   ;;  %v5523_v24 = vld [vmem:[#allocation4 + $0x1b0] ss:$12 sps:$4 sm:$0xff]  }
  0x4f   : > { %1662 = vmatprep.subr.bf16.mxu1 %v5502_v10  ;;  %v5514_v18 = vld [vmem:[#allocation4 + $0x1cc] ss:$12 sps:$4 sm:$0xff]   ;;  %v5520_v22 = vld [vmem:[#allocation4 + $0x1b4] ss:$12 sps:$4 sm:$0xff]   ;;  %v5524_v25 = vld [vmem:[#allocation4 + $0x1c] ss:$12 sps:$4 sm:$0xff]  }
  0x50   : > { %v5526_v26 = vld [vmem:[#allocation4 + $0x19c] ss:$12 sps:$4 sm:$0xff]   ;;  %v5528_v27 = vld [vmem:[#allocation4 + $0x18] ss:$12 sps:$4 sm:$0xff]   ;;  %v5534_v31 = vld [vmem:[#allocation4] ss:$12 sps:$4 sm:$0xff]  }
  0x51   : > { %1310 = vmatpush1.bf16.msra.mxu0 %v5504_v11  ;;  %v5529_v28 = vld [vmem:[#allocation4 + $0x198] ss:$12 sps:$4 sm:$0xff]   ;;  %v5535_v32 = vld [vmem:[#allocation4 + $0x180] ss:$12 sps:$4 sm:$0xff]   ;;  %v5538_v34 = vld [vmem:[%s6222_s18 + $0x8] ss:$12 sps:$4 sm:$0xff]  }
  0x52   : > { %1663 = vmatpush1.bf16.msra.mxu1 %v5505_v12  ;;  %1311 = vmatprep.subr.bf16.mxu0 %v5506_v13  ;;  %v5530_v29 = vld [vmem:[#allocation4 + $0x4] ss:$12 sps:$4 sm:$0xff]   ;;  %v5536_v33 = vld [vmem:[#allocation4 + $0x16c] ss:$12 sps:$4 sm:$0xff]   ;;  %v5539_v35 = vld [vmem:[#allocation4 + $0x168] ss:$12 sps:$4 sm:$0xff]  }
  0x53   : > { %1664 = vmatprep.subr.bf16.mxu1 %v5508_v14  ;;  %v5532_v30 = vld [vmem:[#allocation4 + $0x184] ss:$12 sps:$4 sm:$0xff]   ;;  %v5540_v36 = vld [vmem:[#allocation4 + $0x154] ss:$12 sps:$4 sm:$0xff]   ;;  %v5543_v38 = vld [vmem:[#allocation4 + $0x13c] ss:$12 sps:$4 sm:$0xff]  }
  0x54   : > { %v5542_v37 = vld [vmem:[#allocation4 + $0x150] ss:$12 sps:$4 sm:$0xff]   ;;  %v5545_v40 = vld [vmem:[%s6222_s18 + $0x20] ss:$12 sps:$4 sm:$0xff]   ;;  %v5546_v41 = vld [vmem:[#allocation4 + $0x138] ss:$12 sps:$4 sm:$0xff]  }
  0x55   : > { %1312 = vmatpush1.bf16.msra.mxu0 %v5510_v15  ;;  %v5566_v39 = vld [vmem:[%s6222_s18 + $0x4] ss:$12 sps:$4 sm:$0xff]   ;;  %v5549_v43 = vld [vmem:[#allocation4 + $0x120] ss:$12 sps:$4 sm:$0xff]   ;;  %v5553_v46 = vld [vmem:[#allocation4 + $0x108] ss:$12 sps:$4 sm:$0xff]  }
  0x56   : > { %1665 = vmatpush1.bf16.msra.mxu1 %v5511_v16  ;;  %1313 = vmatprep.subr.bf16.mxu0 %v5512_v17  ;;  %v5547_v42 = vld [vmem:[#allocation4 + $0x124] ss:$12 sps:$4 sm:$0xff]   ;;  %v5550_v44 = vld [vmem:[#allocation4 + $0x10c] ss:$12 sps:$4 sm:$0xff]   ;;  %v5554_v47 = vld [vmem:[#allocation4 + $0xf4] ss:$12 sps:$4 sm:$0xff]  }
  0x57   : > { %1666 = vmatprep.subr.bf16.mxu1 %v5514_v18  ;;  %1337 = vmatprep.mubr.bf16.mxu0 %v5566_v39  ;;  %v5552_v45 = vld [vmem:[%s6222_s18 + $0x38] ss:$12 sps:$4 sm:$0xff]   ;;  %v5556_v48 = vld [vmem:[#allocation4 + $0xf0] ss:$12 sps:$4 sm:$0xff]   ;;  %v5563_v53 = vld [vmem:[#allocation4 + $0xc0] ss:$12 sps:$4 sm:$0xff]  }
  0x58   : > { %v5557_v49 = vld [vmem:[#allocation4 + $0xdc] ss:$12 sps:$4 sm:$0xff]   ;;  %v5560_v51 = vld [vmem:[#allocation4 + $0xd8] ss:$12 sps:$4 sm:$0xff]   ;;  %v6244_v54 = vld [vmem:[%s6222_s18] ss:$12 sps:$4 sm:$0xff]  }
  0x59   : > { %1314 = vmatpush1.bf16.msra.mxu0 %v5516_v19  ;;  %v5559_v50 = vld [vmem:[%s6222_s18 + $0x50] ss:$12 sps:$4 sm:$0xff]   ;;  %v5567_v55 = vld [vmem:[%s6222_s18 + $0x68] ss:$12 sps:$4 sm:$0xff]   ;;  %v6254_v57 = vld [vmem:[%s6222_s18 + $0x18] ss:$12 sps:$4 sm:$0xff]  }
  0x5a   : > { %1667 = vmatpush1.bf16.msra.mxu1 %v5517_v20  ;;  %1315 = vmatprep.subr.bf16.mxu0 %v5518_v21  ;;  %v5561_v52 = vld [vmem:[#allocation4 + $0xc4] ss:$12 sps:$4 sm:$0xff]   ;;  %v6248_v56 = vld [vmem:[%s6222_s18 + $0x1c] ss:$12 sps:$4 sm:$0xff]   ;;  %v5571_v58 = vld [vmem:[%s6222_s18 + $0x80] ss:$12 sps:$4 sm:$0xff]  }
  0x5b   : > { %1668 = vmatprep.subr.bf16.mxu1 %v5520_v22  ;;  %v6258_v59 = vld [vmem:[%s6222_s18 + $0x34] ss:$12 sps:$4 sm:$0xff]   ;;  %v5632_v60 = vld [vmem:[#allocation4 + $0xb0] ss:$12 sps:$4 sm:$0xff]   ;;  %v5575_v62 = vld [vmem:[%s6222_s18 + $0x98] ss:$12 sps:$4 sm:$0xff]  }
  0x5c   : > { %v6264_v61 = vld [vmem:[%s6222_s18 + $0x30] ss:$12 sps:$4 sm:$0xff]   ;;  %v6269_v63 = vld [vmem:[%s6222_s18 + $0x4c] ss:$12 sps:$4 sm:$0xff]   ;;  %v6275_v2 = vld [vmem:[%s6222_s18 + $0x48] ss:$12 sps:$4 sm:$0xff]  }
  0x5d   : > { %1316 = vmatpush1.bf16.msra.mxu0 %v5522_v23  ;;  %v5641_v1 = vld [vmem:[#allocation4 + $0x98] ss:$12 sps:$4 sm:$0xff]   ;;  %v5579_v3 = vld [vmem:[%s6222_s18 + $0xb0] ss:$12 sps:$4 sm:$0xff]   ;;  %v6286_v5 = vld [vmem:[%s6222_s18 + $0x60] ss:$12 sps:$4 sm:$0xff]  }
  0x5e   : > { %1669 = vmatpush1.bf16.msra.mxu1 %v5523_v24  ;;  %1317 = vmatprep.subr.bf16.mxu0 %v5524_v25  ;;  %v6279_v4 = vld [vmem:[%s6222_s18 + $0x64] ss:$12 sps:$4 sm:$0xff]   ;;  %v6289_v6 = vld [vmem:[%s6222_s18 + $0xc8] ss:$12 sps:$4 sm:$0xff]   ;;  %v6302_v9 = vld [vmem:[%s6222_s18 + $0xe0] ss:$12 sps:$4 sm:$0xff]  }
  0x5f   : > { %1670 = vmatprep.subr.bf16.mxu1 %v5526_v26  ;;  %v6292_v7 = vld [vmem:[%s6222_s18 + $0x7c] ss:$12 sps:$4 sm:$0xff]   ;;  %v6299_v8 = vld [vmem:[%s6222_s18 + $0x78] ss:$12 sps:$4 sm:$0xff]   ;;  %v5651_v11 = vld [vmem:[#allocation4 + $0x80] ss:$12 sps:$4 sm:$0xff]  }
  0x60   : > { %v5650_v10 = vld [vmem:[#allocation4 + $0x230] ss:$12 sps:$4 sm:$0xff]   ;;  %v6305_v12 = vld [vmem:[%s6222_s18 + $0x94] ss:$12 sps:$4 sm:$0xff]   ;;  %v6316_v14 = vld [vmem:[%s6222_s18 + $0xf8] ss:$12 sps:$4 sm:$0xff]  }
  0x61   : > { %1318 = vmatpush1.bf16.msra.mxu0 %v5528_v27  ;;  %v6313_v13 = vld [vmem:[%s6222_s18 + $0x90] ss:$12 sps:$4 sm:$0xff]   ;;  %v5656_v15 = vld [vmem:[#allocation4 + $0x68] ss:$12 sps:$4 sm:$0xff]   ;;  %v6319_v16 = vld [vmem:[%s6222_s18 + $0xac] ss:$12 sps:$4 sm:$0xff]  }
  0x62   : > { %1671 = vmatpush1.bf16.msra.mxu1 %v5529_v28  ;;  %1319 = vmatprep.subr.bf16.mxu0 %v5530_v29  ;;  %v5661_v17 = vld [vmem:[#allocation4 + $0x50] ss:$12 sps:$4 sm:$0xff]   ;;  %v5662_v18 = vld [vmem:[#allocation4 + $0x38] ss:$12 sps:$4 sm:$0xff]   ;;  %v6328_v19 = vld [vmem:[%s6222_s18 + $0xa8] ss:$12 sps:$4 sm:$0xff]  }
  0x63   : > { %1672 = vmatprep.subr.bf16.mxu1 %v5532_v30  ;;  %v6331_v20 = vld [vmem:[%s6222_s18 + $0x110] ss:$12 sps:$4 sm:$0xff]   ;;  %v5667_v22 = vld [vmem:[#allocation4 + $0x20] ss:$12 sps:$4 sm:$0xff]   ;;  %v5668_v23 = vld [vmem:[#allocation4 + $0x8] ss:$12 sps:$4 sm:$0xff]  }
  0x64   : > { %v6334_v21 = vld [vmem:[%s6222_s18 + $0xc4] ss:$12 sps:$4 sm:$0xff]   ;;  %v6343_v24 = vld [vmem:[%s6222_s18 + $0xc0] ss:$12 sps:$4 sm:$0xff]   ;;  %v6346_v25 = vld [vmem:[%s6222_s18 + $0x128] ss:$12 sps:$4 sm:$0xff]  }
  0x65   : > { %1320 = vmatpush1.bf16.msra.mxu0 %v5534_v31  ;;  %v6349_v26 = vld [vmem:[%s6222_s18 + $0xdc] ss:$12 sps:$4 sm:$0xff]   ;;  %v5674_v28 = vld [vmem:[#allocation4 + $0x218] ss:$12 sps:$4 sm:$0xff]   ;;  %v6361_v31 = vld [vmem:[%s6222_s18 + $0x140] ss:$12 sps:$4 sm:$0xff]  }
  0x66   : > { %1673 = vmatpush1.bf16.msra.mxu1 %v5535_v32  ;;  %1321 = vmatprep.subr.bf16.mxu0 %v5536_v33  ;;  %v5673_v27 = vld [vmem:[#allocation4 + $0x170] ss:$12 sps:$4 sm:$0xff]   ;;  %v5675_v29 = vld [vmem:[#allocation4 + $0x158] ss:$12 sps:$4 sm:$0xff]   ;;  %v6364_v32 = vld [vmem:[%s6222_s18 + $0xf4] ss:$12 sps:$4 sm:$0xff]  }
  0x67   : > { %2011 = vmatprep.subr.bf16.mxu1 %v6097_v0  ;;  %v6358_v30 = vld [vmem:[%s6222_s18 + $0xd8] ss:$12 sps:$4 sm:$0xff]   ;;  %v5680_v33 = vld [vmem:[#allocation4 + $0x140] ss:$12 sps:$4 sm:$0xff]   ;;  %p178_p5 = scmp.lt.s32.totalorder %s4610_s14, 15 }
  0x68   : > { %v5687_v39 = vld [vmem:[#allocation4 + $0xf8] ss:$12 sps:$4 sm:$0xff]  }
  0x69   : > { %1691 = vmatmul.mubr.bf16.vlgmr.msra.gmra.mxu1 %v5538_v34  ;;  %1322 = vmatpush2.bf16.msra.mxu0 %v5539_v35  ;;  %v5681_v34 = vld [vmem:[#allocation4 + $0x128] ss:$12 sps:$4 sm:$0xff]   ;;  %v6373_v35 = vld [vmem:[%s6222_s18 + $0xf0] ss:$12 sps:$4 sm:$0xff]   ;;  %s9028_s14 = smov (!%p178_p5, %s4610_s14), 15 }
  0x6a   : > { %1700 = vmatprep.mubr.bf16.mxu1 %v6097_v0  ;;  %1323 = vmatprep.subr.bf16.mxu0 %v5540_v36  ;;  %v6376_v36 = vld [vmem:[%s6222_s18 + $0x158] ss:$12 sps:$4 sm:$0xff]   ;;  %s4847_s15 = sshll.u32 %s9028_s14, 6 }
  0x6b   : > { %2012 = vmatpush1.bf16.msra.mxu1 %v5632_v60  ;;  %8759 = vst [vmem:[#allocation8_spill] sm:$0xff] %v6376_v36  ;;  %v5705_v60 = vld [vmem:[#allocation4 + $0x1d0] ss:$12 sps:$4 sm:$0xff]   ;;  %s8482_s25 = scalar_lea.vmem %s8627_s2, %s4847_s15 }
  0x6c   : > { %2013 = vmatprep.subr.bf16.mxu1 %v6097_v0 }
  0x6d   : > { %1324 = vmatpush2.bf16.msra.mxu0 %v5542_v37  ;;  %v6379_v37 = vld [vmem:[%s6222_s18 + $0x10c] ss:$12 sps:$4 sm:$0xff]  }
  0x6e   : > { %1325 = vmatprep.subr.bf16.mxu0 %v5543_v38  ;;  %v5686_v38 = vld [vmem:[#allocation4 + $0x110] ss:$12 sps:$4 sm:$0xff]  }
  0x6f   : > { %2014 = vmatpush1.bf16.msra.mxu1 %v5641_v1  ;;  %v6442_v1 = vld [vmem:[%s6222_s18 + $0x168] ss:$12 sps:$4 sm:$0xff]  }
  0x70   : > { %2015 = vmatprep.subr.bf16.mxu1 %v6097_v0  ;;  %8772 = vst [vmem:[#allocation21_spill] sm:$0xff] %v6442_v1 }
  0x71   : > { %1701 = vmatmul.mubr.bf16.gmra.mxu1 %v5545_v40  ;;  %1326 = vmatpush2.bf16.msra.mxu0 %v5546_v41  ;;  %v6388_v40 = vld [vmem:[%s6222_s18 + $0x108] ss:$12 sps:$4 sm:$0xff]   ;;  %v6391_v41 = vld [vmem:[%s6222_s18 + $0x170] ss:$12 sps:$4 sm:$0xff]  }
  0x72   : > { %1710 = vmatprep.mubr.bf16.mxu1 %v6097_v0  ;;  %1327 = vmatprep.subr.bf16.mxu0 %v5547_v42  ;;  %8760 = vst [vmem:[#allocation9_spill] sm:$0xff] %v6388_v40  ;;  %8761 = vst [vmem:[#allocation10_spill] sm:$0xff] %v6391_v41  ;;  %v6394_v42 = vld [vmem:[%s6222_s18 + $0x124] ss:$12 sps:$4 sm:$0xff]  }
  0x73   : > { %2016 = vmatpush1.bf16.msra.mxu1 %v5651_v11  ;;  %8762 = vst [vmem:[#allocation11_spill] sm:$0xff] %v6394_v42  ;;  %v5710_v11 = vld [vmem:[#allocation4 + $0x1a0] ss:$12 sps:$4 sm:$0xff]  }
  0x74   : > { %2017 = vmatprep.subr.bf16.mxu1 %v6097_v0 }
  0x75   : > { %1328 = vmatpush2.bf16.msra.mxu0 %v5549_v43  ;;  %v5692_v43 = vld [vmem:[#allocation4 + $0xe0] ss:$12 sps:$4 sm:$0xff]  }
  0x76   : > { %1329 = vmatprep.subr.bf16.mxu0 %v5550_v44  ;;  %v5693_v44 = vld [vmem:[#allocation4 + $0xc8] ss:$12 sps:$4 sm:$0xff]  }
  0x77   : > { %2018 = vmatpush1.bf16.msra.mxu1 %v5656_v15  ;;  %v5711_v15 = vld [vmem:[#allocation4 + $0x188] ss:$12 sps:$4 sm:$0xff]  }
  0x78   : > { %2019 = vmatprep.subr.bf16.mxu1 %v6097_v0 }
  0x79   : > { %1711 = vmatmul.mubr.bf16.gmra.mxu1 %v5552_v45  ;;  %1330 = vmatpush2.bf16.msra.mxu0 %v5553_v46  ;;  %v6403_v45 = vld [vmem:[%s6222_s18 + $0x120] ss:$12 sps:$4 sm:$0xff]   ;;  %v6406_v46 = vld [vmem:[%s6222_s18 + $0x188] ss:$12 sps:$4 sm:$0xff]  }
  0x7a   : > { %1720 = vmatprep.mubr.bf16.mxu1 %v6097_v0  ;;  %1331 = vmatprep.subr.bf16.mxu0 %v5554_v47  ;;  %8763 = vst [vmem:[#allocation12_spill] sm:$0xff] %v6403_v45  ;;  %8764 = vst [vmem:[#allocation13_spill] sm:$0xff] %v6406_v46  ;;  %v6409_v47 = vld [vmem:[%s6222_s18 + $0x13c] ss:$12 sps:$4 sm:$0xff]  }
  0x7b   : > { %2020 = vmatpush1.bf16.msra.mxu1 %v5661_v17  ;;  %8765 = vst [vmem:[#allocation14_spill] sm:$0xff] %v6409_v47  ;;  %v6455_v17 = vld [vmem:[%s6222_s18 + $0x180] ss:$12 sps:$4 sm:$0xff]  }
  0x7c   : > { %2021 = vmatprep.subr.bf16.mxu1 %v6097_v0  ;;  %8775 = vst [vmem:[#allocation24_spill] sm:$0xff] %v6455_v17 }
  0x7d   : > { %1332 = vmatpush2.bf16.msra.mxu0 %v5556_v48  ;;  %v5697_v48 = vld [vmem:[#allocation4 + $0x200] ss:$12 sps:$4 sm:$0xff]  }
  0x7e   : > { %1333 = vmatprep.subr.bf16.mxu0 %v5557_v49  ;;  %v6416_v49 = vld [vmem:[%s6222_s18 + $0x138] ss:$12 sps:$4 sm:$0xff]  }
  0x7f   : > { %2022 = vmatpush1.bf16.msra.mxu1 %v5662_v18  ;;  %8766 = vst [vmem:[#allocation15_spill] sm:$0xff] %v6416_v49  ;;  %v6458_v18 = vld [vmem:[%s6222_s18 + $0x1e8] ss:$12 sps:$4 sm:$0xff]  }
  0x80   : > { %2023 = vmatprep.subr.bf16.mxu1 %v6097_v0  ;;  %8776 = vst [vmem:[#allocation25_spill] sm:$0xff] %v6458_v18 }
  0x81   : > { %1721 = vmatmul.mubr.bf16.gmra.mxu1 %v5559_v50  ;;  %1334 = vmatpush2.bf16.msra.mxu0 %v5560_v51  ;;  %v6419_v50 = vld [vmem:[%s6222_s18 + $0x1a0] ss:$12 sps:$4 sm:$0xff]  }
  0x82   : > { %1730 = vmatprep.mubr.bf16.mxu1 %v6097_v0  ;;  %1335 = vmatprep.subr.bf16.mxu0 %v5561_v52  ;;  %8767 = vst [vmem:[#allocation16_spill] sm:$0xff] %v6419_v50  ;;  %v6422_v51 = vld [vmem:[%s6222_s18 + $0x154] ss:$12 sps:$4 sm:$0xff]  }
  0x83   : > { %2024 = vmatpush1.bf16.msra.mxu1 %v5667_v22  ;;  %8768 = vst [vmem:[#allocation17_spill] sm:$0xff] %v6422_v51  ;;  %v5701_v52 = vld [vmem:[#allocation4 + $0x1e8] ss:$12 sps:$4 sm:$0xff]  }
  0x84   : > { %2025 = vmatprep.subr.bf16.mxu1 %v6097_v0  ;;  %v6461_v22 = vld [vmem:[%s6222_s18 + $0x19c] ss:$12 sps:$4 sm:$0xff]  }
  0x85   : > { %1336 = vmatpush2.bf16.msra.mxu0 %v5563_v53  ;;  %v6429_v53 = vld [vmem:[%s6222_s18 + $0x150] ss:$12 sps:$4 sm:$0xff]   ;;  %8777 = vst [vmem:[#allocation26_spill] sm:$0xff] %v6461_v22 }
  0x86   : > { %5080 = vmatprep.subr.bf16.mxu0 %v5650_v10  ;;  %8769 = vst [vmem:[#allocation18_spill] sm:$0xff] %v6429_v53 }
  0x87   : > { %2026 = vmatpush1.bf16.msra.mxu1 %v5668_v23  ;;  %v6468_v23 = vld [vmem:[%s6222_s18 + $0x198] ss:$12 sps:$4 sm:$0xff]  }
  0x88   : > { %1338 = vmatmul.mubr.bf16.vlgmr.msra.gmra.mxu0 %v6244_v54  ;;  %2027 = vmatprep.subr.bf16.mxu1 %v6097_v0  ;;  %8778 = vst [vmem:[#allocation27_spill] sm:$0xff] %v6468_v23 }
  0x89   : > { %1731 = vmatmul.mubr.bf16.gmra.mxu1 %v5567_v55  ;;  %1347 = vmatprep.mubr.bf16.mxu0 %v6248_v56  ;;  %v6432_v55 = vld [vmem:[%s6222_s18 + $0x1b8] ss:$12 sps:$4 sm:$0xff]  }
  0x8a   : > { %1740 = vmatprep.mubr.bf16.mxu1 %v6097_v0  ;;  %5081 = vmatpush3.bf16.msra.mxu0 %v5650_v10  ;;  %8770 = vst [vmem:[#allocation19_spill] sm:$0xff] %v6432_v55  ;;  %v6448_v10 = vld [vmem:[%s6222_s18 + $0x184] ss:$12 sps:$4 sm:$0xff]  }
  0x8b   : > { %2028 = vmatpush2.bf16.msra.mxu1 %v5673_v27  ;;  %5082 = vmatprep.subr.bf16.mxu0 %v5674_v28  ;;  %8774 = vst [vmem:[#allocation23_spill] sm:$0xff] %v6448_v10  ;;  %v6471_v27 = vld [vmem:[%s6222_s18 + $0x200] ss:$12 sps:$4 sm:$0xff]  }
  0x8c   : > { %2029 = vmatprep.subr.bf16.mxu1 %v6097_v0  ;;  %8779 = vst [vmem:[#allocation28_spill] sm:$0xff] %v6471_v27 }
  0x8e   : > { %5083 = vmatpush3.bf16.msra.mxu0 %v5674_v28  ;;  %v6474_v28 = vld [vmem:[%s6222_s18 + $0x1b4] ss:$12 sps:$4 sm:$0xff]  }
  0x8f   : > { %2030 = vmatpush2.bf16.msra.mxu1 %v5675_v29  ;;  %5084 = vmatprep.subr.bf16.mxu0 %v5697_v48  ;;  %8780 = vst [vmem:[#allocation29_spill] sm:$0xff] %v6474_v28  ;;  %v6481_v29 = vld [vmem:[%s6222_s18 + $0x1b0] ss:$12 sps:$4 sm:$0xff]  }
  0x90   : > { %1348 = vmatmul.mubr.bf16.gmra.mxu0 %v6254_v57  ;;  %2031 = vmatprep.subr.bf16.mxu1 %v6097_v0  ;;  %8781 = vst [vmem:[#allocation30_spill] sm:$0xff] %v6481_v29 }
  0x91   : > { %1741 = vmatmul.mubr.bf16.gmra.mxu1 %v5571_v58  ;;  %1357 = vmatprep.mubr.bf16.mxu0 %v6258_v59  ;;  %v6435_v58 = vld [vmem:[%s6222_s18 + $0x16c] ss:$12 sps:$4 sm:$0xff]  }
  0x92   : > { %1750 = vmatprep.mubr.bf16.mxu1 %v6097_v0  ;;  %5085 = vmatpush3.bf16.msra.mxu0 %v5697_v48  ;;  %8771 = vst [vmem:[#allocation20_spill] sm:$0xff] %v6435_v58  ;;  %v6510_v48 = vld [vmem:[%s6222_s18 + $0x248] ss:$12 sps:$4 sm:$0xff]  }
  0x93   : > { %2032 = vmatpush2.bf16.msra.mxu1 %v5680_v33  ;;  %5086 = vmatprep.subr.bf16.mxu0 %v5701_v52  ;;  %v6484_v33 = vld [vmem:[%s6222_s18 + $0x218] ss:$12 sps:$4 sm:$0xff]   ;;  %8788 = vst [vmem:[#allocation37_spill] sm:$0xff] %v6510_v48 }
  0x94   : > { %2033 = vmatprep.subr.bf16.mxu1 %v6097_v0  ;;  %8782 = vst [vmem:[#allocation31_spill] sm:$0xff] %v6484_v33 }
  0x96   : > { %5087 = vmatpush3.bf16.msra.mxu0 %v5701_v52  ;;  %v5652_v52 = vld [vmem:[%s6222_s18 + $0x1fc] ss:$12 sps:$4 sm:$0xff]  }
  0x97   : > { %2034 = vmatpush2.bf16.msra.mxu1 %v5681_v34  ;;  %5088 = vmatprep.subr.bf16.mxu0 %v5705_v60  ;;  %v6487_v34 = vld [vmem:[%s6222_s18 + $0x1cc] ss:$12 sps:$4 sm:$0xff]  }
  0x98   : > { %1358 = vmatmul.mubr.bf16.gmra.mxu0 %v6264_v61  ;;  %2035 = vmatprep.subr.bf16.mxu1 %v6097_v0  ;;  %8783 = vst [vmem:[#allocation32_spill] sm:$0xff] %v6487_v34 }
  0x99   : > { %1751 = vmatmul.mubr.bf16.gmra.mxu1 %v5575_v62  ;;  %1367 = vmatprep.mubr.bf16.mxu0 %v6269_v63  ;;  %v5706_v62 = vld [vmem:[#allocation4 + $0x1b8] ss:$12 sps:$4 sm:$0xff]  }
  0x9a   : > { %1760 = vmatprep.mubr.bf16.mxu1 %v6097_v0  ;;  %5089 = vmatpush3.bf16.msra.mxu0 %v5705_v60 }
  0x9b   : > { %2036 = vmatpush2.bf16.msra.mxu1 %v5686_v38  ;;  %5090 = vmatprep.subr.bf16.mxu0 %v5706_v62  ;;  %v6494_v38 = vld [vmem:[%s6222_s18 + $0x1c8] ss:$12 sps:$4 sm:$0xff]  }
  0x9c   : > { %2037 = vmatprep.subr.bf16.mxu1 %v6097_v0  ;;  %8784 = vst [vmem:[#allocation33_spill] sm:$0xff] %v6494_v38 }
  0x9e   : > { %5091 = vmatpush3.bf16.msra.mxu0 %v5706_v62 }
  0x9f   : > { %2038 = vmatpush2.bf16.msra.mxu1 %v5687_v39  ;;  %5092 = vmatprep.subr.bf16.mxu0 %v5710_v11  ;;  %v6497_v39 = vld [vmem:[%s6222_s18 + $0x230] ss:$12 sps:$4 sm:$0xff]  }
  0xa0   : > { %1368 = vmatmul.mubr.bf16.gmra.mxu0 %v6275_v2  ;;  %2039 = vmatprep.subr.bf16.mxu1 %v6097_v0  ;;  %8785 = vst [vmem:[#allocation34_spill] sm:$0xff] %v6497_v39 }
  0xa1   : > { %1761 = vmatmul.mubr.bf16.gmra.mxu1 %v5579_v3  ;;  %1377 = vmatprep.mubr.bf16.mxu0 %v6279_v4  ;;  %v6445_v3 = vld [vmem:[%s6222_s18 + $0x1d0] ss:$12 sps:$4 sm:$0xff]  }
  0xa2   : > { %1770 = vmatprep.mubr.bf16.mxu1 %v6097_v0  ;;  %8773 = vst [vmem:[#allocation22_spill] sm:$0xff] %v6445_v3  ;;  %5093 = vmatpush3.bf16.msra.mxu0 %v5710_v11 }
  0xa3   : > { %2040 = vmatpush2.bf16.msra.mxu1 %v5692_v43  ;;  %5094 = vmatprep.subr.bf16.mxu0 %v5711_v15  ;;  %v6500_v43 = vld [vmem:[%s6222_s18 + $0x1e4] ss:$12 sps:$4 sm:$0xff]  }
  0xa4   : > { %2041 = vmatprep.subr.bf16.mxu1 %v6097_v0  ;;  %8786 = vst [vmem:[#allocation35_spill] sm:$0xff] %v6500_v43 }
  0xa6   : > { %5095 = vmatpush3.bf16.msra.mxu0 %v5711_v15  ;;  %v5654_v15 = vld [vmem:[%s6222_s18 + $0x1f8] ss:$12 sps:$4 sm:$0xff]  }
  0xa7   : > { %2042 = vmatpush2.bf16.msra.mxu1 %v5693_v44  ;;  %v6507_v44 = vld [vmem:[%s6222_s18 + $0x1e0] ss:$12 sps:$4 sm:$0xff]  }
  0xa8   : > { %1378 = vmatmul.mubr.bf16.gmra.mxu0 %v6286_v5  ;;  %8787 = vst [vmem:[#allocation36_spill] sm:$0xff] %v6507_v44 }
  0xa9   : > { %1771 = vmatmul.mubr.bf16.gmra.mxu1 %v6289_v6  ;;  %1387 = vmatprep.mubr.bf16.mxu0 %v6292_v7 }
  0xaa   : > { %1780 = vmatprep.mubr.bf16.mxu1 %v6097_v0 }
  0xb0   : > { %1388 = vmatmul.mubr.bf16.gmra.mxu0 %v6299_v8 }
  0xb1   : > { %1781 = vmatmul.mubr.bf16.gmra.mxu1 %v6302_v9  ;;  %1397 = vmatprep.mubr.bf16.mxu0 %v6305_v12 }
  0xb2   : > { %1790 = vmatprep.mubr.bf16.mxu1 %v6097_v0 }
  0xb8   : > { %1398 = vmatmul.mubr.bf16.gmra.mxu0 %v6313_v13 }
  0xb9   : > { %1791 = vmatmul.mubr.bf16.gmra.mxu1 %v6316_v14  ;;  %1407 = vmatprep.mubr.bf16.mxu0 %v6319_v16 }
  0xba   : > { %1800 = vmatprep.mubr.bf16.mxu1 %v6097_v0 }
  0xc0   : > { %1408 = vmatmul.mubr.bf16.gmra.mxu0 %v6328_v19 }
  0xc1   : > { %1801 = vmatmul.mubr.bf16.gmra.mxu1 %v6331_v20  ;;  %1417 = vmatprep.mubr.bf16.mxu0 %v6334_v21 }
  0xc2   : > { %1810 = vmatprep.mubr.bf16.mxu1 %v6097_v0 }
  0xc8   : > { %1418 = vmatmul.mubr.bf16.gmra.mxu0 %v6343_v24 }
  0xc9   : > { %1811 = vmatmul.mubr.bf16.gmra.mxu1 %v6346_v25  ;;  %1427 = vmatprep.mubr.bf16.mxu0 %v6349_v26 }
  0xca   : > { %1820 = vmatprep.mubr.bf16.mxu1 %v6097_v0 }
  0xd0   : > { %1428 = vmatmul.mubr.bf16.gmra.mxu0 %v6358_v30 }
  0xd1   : > { %1821 = vmatmul.mubr.bf16.gmra.mxu1 %v6361_v31  ;;  %1437 = vmatprep.mubr.bf16.mxu0 %v6364_v32 }
  0xd2   : > { %1830 = vmatprep.mubr.bf16.mxu1 %v6097_v0 }
  0xd8   : > { %1438 = vmatmul.mubr.bf16.gmra.mxu0 %v6373_v35 }
  0xd9   : > { %1831 = vmatmul.mubr.bf16.gmra.mxu1 %v6376_v36  ;;  %1447 = vmatprep.mubr.bf16.mxu0 %v6379_v37 }
  0xda   : > { %1840 = vmatprep.mubr.bf16.mxu1 %v6097_v0 }
  0xe0   : > { %1448 = vmatmul.mubr.bf16.gmra.mxu0 %v6388_v40 }
  0xe1   : > { %1841 = vmatmul.mubr.bf16.gmra.mxu1 %v6391_v41  ;;  %1457 = vmatprep.mubr.bf16.mxu0 %v6394_v42 }
  0xe2   : > { %1850 = vmatprep.mubr.bf16.mxu1 %v6097_v0 }
  0xe8   : > { %1458 = vmatmul.mubr.bf16.gmra.mxu0 %v6403_v45  ;;  %v5682_v45 = vld [vmem:[%s6222_s18 + $0x274] ss:$12 sps:$4 sm:$0xff]  }
  0xe9   : > { %1851 = vmatmul.mubr.bf16.gmra.mxu1 %v6406_v46  ;;  %1467 = vmatprep.mubr.bf16.mxu0 %v6409_v47  ;;  %v5678_v47 = vld [vmem:[%s6222_s18 + $0x258] ss:$12 sps:$4 sm:$0xff]  }
  0xea   : > { %1860 = vmatprep.mubr.bf16.mxu1 %v6097_v0 }
  0xf0   : > { %1468 = vmatmul.mubr.bf16.gmra.mxu0 %v6416_v49 }
  0xf1   : > { %1861 = vmatmul.mubr.bf16.gmra.mxu1 %v6419_v50  ;;  %1477 = vmatprep.mubr.bf16.mxu0 %v6422_v51  ;;  %v6572_v50 = vld [vmem:[%s6222_s18 + $0x2c0] ss:$12 sps:$4 sm:$0xff]  }
  0xf2   : > { %1870 = vmatprep.mubr.bf16.mxu1 %v6097_v0  ;;  %8794 = vst [vmem:[#allocation43_spill] sm:$0xff] %v6572_v50 }
  0xf8   : > { %1478 = vmatmul.mubr.bf16.gmra.mxu0 %v6429_v53 }
  0xf9   : > { %1871 = vmatmul.mubr.bf16.gmra.mxu1 %v6432_v55  ;;  %1487 = vmatprep.mubr.bf16.mxu0 %v6435_v58  ;;  %v6555_v58 = vld [vmem:[%s6222_s18 + $0x2a8] ss:$12 sps:$4 sm:$0xff]  }
  0xfa   : > { %1880 = vmatprep.mubr.bf16.mxu1 %v6097_v0  ;;  %8792 = vst [vmem:[#allocation41_spill] sm:$0xff] %v6555_v58 }
 0x100   : > { %1488 = vmatmul.mubr.bf16.gmra.mxu0 %v6442_v1 }
 0x101   : > { %1881 = vmatmul.mubr.bf16.gmra.mxu1 %v6445_v3  ;;  %1497 = vmatprep.mubr.bf16.mxu0 %v6448_v10  ;;  %v6540_v10 = vld [vmem:[%s6222_s18 + $0x290] ss:$12 sps:$4 sm:$0xff]  }
 0x102   : > { %1890 = vmatprep.mubr.bf16.mxu1 %v6097_v0  ;;  %8791 = vst [vmem:[#allocation40_spill] sm:$0xff] %v6540_v10 }
 0x108   : > { %1498 = vmatmul.mubr.bf16.gmra.mxu0 %v6455_v17 }
 0x109   : > { %1891 = vmatmul.mubr.bf16.gmra.mxu1 %v6458_v18  ;;  %1507 = vmatprep.mubr.bf16.mxu0 %v6461_v22  ;;  %v5663_v22 = vld [vmem:[%s6222_s18 + $0x22c] ss:$12 sps:$4 sm:$0xff]  }
 0x10a   : > { %1900 = vmatprep.mubr.bf16.mxu1 %v6097_v0 }
 0x110   : > { %1508 = vmatmul.mubr.bf16.gmra.mxu0 %v6468_v23  ;;  %v6525_v23 = vld [vmem:[%s6222_s18 + $0x278] ss:$12 sps:$4 sm:$0xff]  }
 0x111   : > { %1901 = vmatmul.mubr.bf16.gmra.mxu1 %v6471_v27  ;;  %1517 = vmatprep.mubr.bf16.mxu0 %v6474_v28  ;;  %v5659_v28 = vld [vmem:[%s6222_s18 + $0x210] ss:$12 sps:$4 sm:$0xff]   ;;  %8790 = vst [vmem:[#allocation39_spill] sm:$0xff] %v6525_v23 }
 0x112   : > { %1910 = vmatprep.mubr.bf16.mxu1 %v6097_v0  ;;  %v5676_v27 = vld [vmem:[%s6222_s18 + $0x25c] ss:$12 sps:$4 sm:$0xff]  }
 0x118   : > { %1518 = vmatmul.mubr.bf16.gmra.mxu0 %v6481_v29 }
 0x119   : > { %1911 = vmatmul.mubr.bf16.gmra.mxu1 %v6484_v33  ;;  %1527 = vmatprep.mubr.bf16.mxu0 %v6487_v34  ;;  %v5671_v33 = vld [vmem:[%s6222_s18 + $0x240] ss:$12 sps:$4 sm:$0xff]  }
 0x11a   : > { %1920 = vmatprep.mubr.bf16.mxu1 %v6097_v0 }
 0x120   : > { %1528 = vmatmul.mubr.bf16.gmra.mxu0 %v6494_v38  ;;  %v5657_v38 = vld [vmem:[%s6222_s18 + $0x214] ss:$12 sps:$4 sm:$0xff]  }
 0x121   : > { %1921 = vmatmul.mubr.bf16.gmra.mxu1 %v6497_v39  ;;  %1537 = vmatprep.mubr.bf16.mxu0 %v6500_v43  ;;  %v6518_v43 = vld [vmem:[%s6222_s18 + $0x260] ss:$12 sps:$4 sm:$0xff]   ;;  %v5669_v39 = vld [vmem:[%s6222_s18 + $0x244] ss:$12 sps:$4 sm:$0xff]  }
 0x122   : > { %1930 = vmatprep.mubr.bf16.mxu1 %v6097_v0  ;;  %8789 = vst [vmem:[#allocation38_spill] sm:$0xff] %v6518_v43 }
 0x128   : > { %1538 = vmatmul.mubr.bf16.gmra.mxu0 %v6507_v44 }
 0x129   : > { %v1692_v60 = vpop.f32.mrf.mxu1  ;;  %1931 = vmatmul.mubr.bf16.gmra.mxu1 %v6510_v48  ;;  %1547 = vmatprep.mubr.bf16.mxu0 %v5652_v52 }
 0x12a   : > { %1940 = vmatprep.mubr.bf16.mxu1 %v6097_v0 }
 0x12b   : > { %v1694_v62 = vpop.f32.mrf.mxu1 }
 0x12d   : > { %v1696_v11 = vpop.f32.mrf.mxu1 }
 0x12f   : > { %v1698_v34 = vpop.f32.mrf.mxu1 }
 0x130   : > { %1548 = vmatmul.mubr.bf16.gmra.mxu0 %v5654_v15 }
 0x131   : > { %v1702_v29 = vpop.f32.mrf.mxu1  ;;  %1941 = vmatmul.mubr.bf16.gmra.mxu1 %v6518_v43  ;;  %1557 = vmatprep.mubr.bf16.mxu0 %v5657_v38  ;;  %v5665_v43 = vld [vmem:[%s6222_s18 + $0x228] ss:$12 sps:$4 sm:$0xff]  }
 0x132   : > { %1950 = vmatprep.mubr.bf16.mxu1 %v6097_v0 }
 0x133   : > { %v1704_v52 = vpop.f32.mrf.mxu1 }
 0x135   : > { %v1706_v44 = vpop.f32.mrf.mxu1 }
 0x137   : > { %v6528_v17 = vpop.f32.mrf.mxu1 }
 0x138   : > { %1558 = vmatmul.mubr.bf16.gmra.mxu0 %v5659_v28 }
 0x139   : > { %v6530_v48 = vpop.f32.mrf.mxu1  ;;  %1951 = vmatmul.mubr.bf16.gmra.mxu1 %v6525_v23  ;;  %1567 = vmatprep.mubr.bf16.mxu0 %v5663_v22 }
 0x13a   : > { %1960 = vmatprep.mubr.bf16.mxu1 %v6097_v0 }
 0x13b   : > { %v6534_v38 = vpop.f32.mrf.mxu1 }
 0x13d   : > { %v6536_v15 = vpop.f32.mrf.mxu1 }
 0x13f   : > { %v6543_v1 = vpop.f32.mrf.mxu1 }
 0x140   : > { %1568 = vmatmul.mubr.bf16.gmra.mxu0 %v5665_v43 }
 0x141   : > { %v6545_v28 = vpop.f32.mrf.mxu1  ;;  %1961 = vmatmul.mubr.bf16.gmra.mxu1 %v6540_v10  ;;  %1577 = vmatprep.mubr.bf16.mxu0 %v5669_v39 }
 0x142   : > { %1970 = vmatprep.mubr.bf16.mxu1 %v6097_v0 }
 0x143   : > { %v6549_v22 = vpop.f32.mrf.mxu1 }
 0x145   : > { %v6551_v23 = vpop.f32.mrf.mxu1 }
 0x147   : > { %v6558_v53 = vpop.f32.mrf.mxu1 }
 0x148   : > { %v1339_v43 = vpop.f32.mrf.mxu0  ;;  %1578 = vmatmul.mubr.bf16.gmra.mxu0 %v5671_v33 }
 0x149   : > { %v6560_v18 = vpop.f32.mrf.mxu1  ;;  %1971 = vmatmul.mubr.bf16.gmra.mxu1 %v6555_v58  ;;  %v6563_v39 = vadd.f32 %v1692_v60, %v1339_v43  ;;  %1587 = vmatprep.mubr.bf16.mxu0 %v5676_v27 }
 0x14a   : > { %1980 = vmatprep.mubr.bf16.mxu1 %v6097_v0  ;;  %v1341_v10 = vpop.f32.mrf.mxu0 }
 0x14b   : > { %8793 = vst [vmem:[#allocation42_spill] sm:$0xff] %v6563_v39  ;;  %v6566_v51 = vpop.f32.mrf.mxu1  ;;  %v1695_v3 = vadd.f32 %v1694_v62, %v1341_v10 }
 0x14c   : > { %v1343_v49 = vpop.f32.mrf.mxu0 }
 0x14d   : > { %v6568_v55 = vpop.f32.mrf.mxu1  ;;  %v6574_v33 = vadd.f32 %v1696_v11, %v1343_v49 }
 0x14e   : > { %v1345_v46 = vpop.f32.mrf.mxu0 }
 0x14f   : > { %8795 = vst [vmem:[#allocation44_spill] sm:$0xff] %v6574_v33  ;;  %v6577_v58 = vpop.f32.mrf.mxu1  ;;  %v1699_v60 = vadd.f32 %v1698_v34, %v1345_v46  ;;  %v5684_v34 = vld [vmem:[%s6222_s18 + $0x270] ss:$12 sps:$4 sm:$0xff]  }
 0x150   : > { %v1349_v43 = vpop.f32.mrf.mxu0  ;;  %1588 = vmatmul.mubr.bf16.gmra.mxu0 %v5678_v47  ;;  %v6595_v47 = vld [vmem:[%s6222_s18 + $0x2d8] ss:$12 sps:$4 sm:$0xff]  }
 0x151   : > { %v6581_v10 = vpop.f32.mrf.mxu1  ;;  %1981 = vmatmul.mubr.bf16.gmra.mxu1 %v6572_v50  ;;  %v6584_v62 = vpack.c.bf16 %v1699_v60, %v1695_v3  ;;  %v6586_v49 = vadd.f32 %v1702_v29, %v1349_v43  ;;  %1597 = vmatprep.mubr.bf16.mxu0 %v5682_v45  ;;  %8798 = vst [vmem:[#allocation47_spill] sm:$0xff] %v6595_v47  ;;  %v5688_v50 = vld [vmem:[%s6222_s18 + $0x28c] ss:$12 sps:$4 sm:$0xff]  }
 0x152   : > { %1990 = vmatprep.mubr.bf16.mxu1 %v6097_v0  ;;  %v1351_v11 = vpop.f32.mrf.mxu0 }
 0x153   : > { %8796 = vst [vmem:[#allocation45_spill] sm:$0xff] %v6584_v62  ;;  %8797 = vst [vmem:[#allocation46_spill] sm:$0xff] %v6586_v49  ;;  %v6589_v42 = vpop.f32.mrf.mxu1  ;;  %v1705_v27 = vadd.f32 %v1704_v52, %v1351_v11 }
 0x154   : > { %v1353_v39 = vpop.f32.mrf.mxu0 }
 0x155   : > { %v6591_v46 = vpop.f32.mrf.mxu1  ;;  %v6597_v33 = vadd.f32 %v1706_v44, %v1353_v39 }
 0x156   : > { %v1355_v3 = vpop.f32.mrf.mxu0 }
 0x157   : > { %8799 = vst [vmem:[#allocation48_spill] sm:$0xff] %v6597_v33  ;;  %v6600_v60 = vpop.f32.mrf.mxu1  ;;  %v1709_v29 = vadd.f32 %v6528_v17, %v1355_v3  ;;  %v6621_v33 = vld [vmem:[%s6222_s18 + $0x2f0] ss:$12 sps:$4 sm:$0xff]  }
 0x158   : > { %v1359_v52 = vpop.f32.mrf.mxu0  ;;  %1598 = vmatmul.mubr.bf16.gmra.mxu0 %v5684_v34  ;;  %v5690_v34 = vld [vmem:[%s6222_s18 + $0x288] ss:$12 sps:$4 sm:$0xff]   ;;  %8801 = vst [vmem:[#allocation50_spill] sm:$0xff] %v6621_v33 }
 0x159   : > { %v6605_v43 = vpop.f32.mrf.mxu1  ;;  %1991 = vmatmul.mubr.bf16.gmra.mxu1 %v6595_v47  ;;  %v6608_v44 = vpack.c.bf16 %v1709_v29, %v1705_v27  ;;  %v6611_v39 = vadd.f32 %v6530_v48, %v1359_v52  ;;  %1607 = vmatprep.mubr.bf16.mxu0 %v5688_v50  ;;  %v5696_v48 = vld [vmem:[%s6222_s18 + $0x2a4] ss:$12 sps:$4 sm:$0xff]  }
 0x15a   : > { %2000 = vmatprep.mubr.bf16.mxu1 %v6097_v0  ;;  %v1361_v11 = vpop.f32.mrf.mxu0 }
 0x15b   : > { %8800 = vst [vmem:[#allocation49_spill] sm:$0xff] %v6611_v39  ;;  %v6614_v45 = vpop.f32.mrf.mxu1  ;;  %v1715_v17 = vadd.f32 %v6534_v38, %v1361_v11  ;;  %v5700_v39 = vld [vmem:[%s6222_s18 + $0x2bc] ss:$12 sps:$4 sm:$0xff]  }
 0x15c   : > { %v1363_v3 = vpop.f32.mrf.mxu0 }
 0x15d   : > { %v6617_v49 = vpop.f32.mrf.mxu1  ;;  %v6624_v27 = vadd.f32 %v6536_v15, %v1363_v3  ;;  %v5968_v3 = vld [vmem:[%s6222_s18 + $0x4] ss:$12 sps:$4 sm:$0xff]  }
 0x15e   : > { %v1365_v29 = vpop.f32.mrf.mxu0 }
 0x15f   : > { %8802 = vst [vmem:[#allocation51_spill] sm:$0xff] %v6624_v27  ;;  %v6627_v50 = vpop.f32.mrf.mxu1  ;;  %v1719_v38 = vadd.f32 %v6543_v1, %v1365_v29  ;;  %v5694_v29 = vld [vmem:[%s6222_s18 + $0x2a0] ss:$12 sps:$4 sm:$0xff]  }
 0x160   : > { %v1369_v52 = vpop.f32.mrf.mxu0  ;;  %1608 = vmatmul.mubr.bf16.gmra.mxu0 %v5690_v34 }
 0x161   : > { %v6632_v11 = vpop.f32.mrf.mxu1  ;;  %2001 = vmatmul.mubr.bf16.gmra.mxu1 %v6621_v33  ;;  %v6635_v47 = vpack.c.bf16 %v1719_v38, %v1715_v17  ;;  %v6638_v15 = vadd.f32 %v6545_v28, %v1369_v52  ;;  %1617 = vmatprep.mubr.bf16.mxu0 %v5696_v48 }
 0x162   : > { %2043 = vmatprep.mubr.bf16.mxu1 %v5968_v3  ;;  %v1371_v41 = vpop.f32.mrf.mxu0 }
 0x163   : > { %8803 = vst [vmem:[#allocation52_spill] sm:$0xff] %v6638_v15  ;;  %v6641_v40 = vpop.f32.mrf.mxu1  ;;  %v1725_v28 = vadd.f32 %v6549_v22, %v1371_v41 }
 0x164   : > { %v1373_v0 = vpop.f32.mrf.mxu0 }
 0x165   : > { %v6643_v1 = vpop.f32.mrf.mxu1  ;;  %v6647_v34 = vadd.f32 %v6551_v23, %v1373_v0 }
 0x166   : > { %v1375_v27 = vpop.f32.mrf.mxu0 }
 0x167   : > { %8804 = vst [vmem:[#allocation53_spill] sm:$0xff] %v6647_v34  ;;  %v6650_v17 = vpop.f32.mrf.mxu1  ;;  %v1729_v38 = vadd.f32 %v6558_v53, %v1375_v27  ;;  %v5698_v53 = vld [vmem:[%s6222_s18 + $0x2b8] ss:$12 sps:$4 sm:$0xff]  }
 0x168   : > { %v1379_v52 = vpop.f32.mrf.mxu0  ;;  %1618 = vmatmul.mubr.bf16.gmra.mxu0 %v5694_v29  ;;  %v5704_v29 = vld [vmem:[%s6222_s18 + $0x2d4] ss:$12 sps:$4 sm:$0xff]  }
 0x169   : > { %v6656_v3 = vpop.f32.mrf.mxu1  ;;  %2044 = vmatmul.mubr.bf16.vlgmr.msra.gmra.mxu1 %v6244_v54  ;;  %v6659_v23 = vpack.c.bf16 %v1729_v38, %v1725_v28  ;;  %v6662_v0 = vadd.f32 %v6560_v18, %v1379_v52  ;;  %1627 = vmatprep.mubr.bf16.mxu0 %v5700_v39 }
 0x16a   : > { %2051 = vmatprep.mubr.bf16.mxu1 %v6248_v56  ;;  %v1381_v41 = vpop.f32.mrf.mxu0 }
 0x16b   : > { %8805 = vst [vmem:[#allocation54_spill] sm:$0xff] %v6662_v0  ;;  %v6665_v22 = vpop.f32.mrf.mxu1  ;;  %v1735_v18 = vadd.f32 %v6566_v51, %v1381_v41 }
 0x16c   : > { %v1383_v48 = vpop.f32.mrf.mxu0 }
 0x16d   : > { %v6667_v15 = vpop.f32.mrf.mxu1  ;;  %v6671_v27 = vadd.f32 %v6568_v55, %v1383_v48 }
 0x16e   : > { %v1385_v54 = vpop.f32.mrf.mxu0 }
 0x16f   : > { %8806 = vst [vmem:[#allocation55_spill] sm:$0xff] %v6671_v27  ;;  %v6674_v28 = vpop.f32.mrf.mxu1  ;;  %v1739_v39 = vadd.f32 %v6577_v58, %v1385_v54 }
 0x170   : > { %v1389_v38 = vpop.f32.mrf.mxu0  ;;  %1628 = vmatmul.mubr.bf16.gmra.mxu0 %v5698_v53  ;;  %v5702_v53 = vld [vmem:[%s6222_s18 + $0x2d0] ss:$12 sps:$4 sm:$0xff]  }
 0x171   : > { %v6680_v52 = vpop.f32.mrf.mxu1  ;;  %2052 = vmatmul.mubr.bf16.gmra.mxu1 %v6254_v57  ;;  %v6683_v55 = vpack.c.bf16 %v1739_v39, %v1735_v18  ;;  %v6686_v48 = vadd.f32 %v6581_v10, %v1389_v38  ;;  %1637 = vmatprep.mubr.bf16.mxu0 %v5704_v29  ;;  %v5709_v57 = vld [vmem:[%s6222_s18 + $0x2ec] ss:$12 sps:$4 sm:$0xff]   ;;  %v5707_v10 = vld [vmem:[%s6222_s18 + $0x2e8] ss:$12 sps:$4 sm:$0xff]  }
 0x172   : > { %2059 = vmatprep.mubr.bf16.mxu1 %v6258_v59  ;;  %v6689_v51 = vpop.f32.mrf.mxu0 }
 0x173   : > { %8807 = vst [vmem:[#allocation56_spill] sm:$0xff] %v6686_v48  ;;  %v6691_v41 = vpop.f32.mrf.mxu1 }
 0x174   : > { %v1393_v56 = vpop.f32.mrf.mxu0 }
 0x175   : > { %v6693_v58 = vpop.f32.mrf.mxu1  ;;  %v6697_v54 = vadd.f32 %v6591_v46, %v1393_v56 }
 0x176   : > { %v1395_v18 = vpop.f32.mrf.mxu0 }
 0x177   : > { %8808 = vst [vmem:[#allocation57_spill] sm:$0xff] %v6697_v54  ;;  %v6700_v39 = vpop.f32.mrf.mxu1 }
 0x178   : > { %v1399_v59 = vpop.f32.mrf.mxu0  ;;  %1638 = vmatmul.mubr.bf16.gmra.mxu0 %v5702_v53 }
 0x179   : > { %v6704_v29 = vpop.f32.mrf.mxu1  ;;  %2060 = vmatmul.mubr.bf16.gmra.mxu1 %v6264_v61  ;;  %v6708_v38 = vadd.f32 %v6605_v43, %v1399_v59  ;;  %1647 = vmatprep.mubr.bf16.mxu0 %v5709_v57  ;;  %v5969_v59 = vld [vmem:[%s6222_s18 + $0x8] ss:$12 sps:$4 sm:$0xff]  }
 0x17a   : > { %2067 = vmatprep.mubr.bf16.mxu1 %v6269_v63  ;;  %v1401_v46 = vpop.f32.mrf.mxu0 }
 0x17b   : > { %8809 = vst [vmem:[#allocation58_spill] sm:$0xff] %v6708_v38  ;;  %v6711_v56 = vpop.f32.mrf.mxu1 }
 0x17c   : > { %v1403_v0 = vpop.f32.mrf.mxu0 }
 0x17d   : > { %v6713_v27 = vpop.f32.mrf.mxu1  ;;  %v6717_v53 = vadd.f32 %v6617_v49, %v1403_v0 }
 0x17e   : > { %v1405_v48 = vpop.f32.mrf.mxu0 }
 0x17f   : > { %8810 = vst [vmem:[#allocation59_spill] sm:$0xff] %v6717_v53  ;;  %v6719_v54 = vpop.f32.mrf.mxu1 }
 0x180   : > { %v1409_v43 = vpop.f32.mrf.mxu0  ;;  %1648 = vmatmul.mubr.bf16.gmra.mxu0 %v5707_v10 }
 0x181   : > { %v6723_v63 = vpop.f32.mrf.mxu1  ;;  %2068 = vmatmul.mubr.bf16.gmra.mxu1 %v6275_v2  ;;  %v6727_v57 = vadd.f32 %v6632_v11, %v1409_v43  ;;  %5096 = vmatprep.mubr.bf16.mxu0 %v5969_v59  ;;  %v1759_v11 = vadd.f32 %v6627_v50, %v1405_v48 }
 0x182   : > { %2075 = vmatprep.mubr.bf16.mxu1 %v6279_v4  ;;  %v1411_v49 = vpop.f32.mrf.mxu0 }
 0x183   : > { %v6731_v0 = vpop.f32.mrf.mxu1  ;;  %v1765_v4 = vadd.f32 %v6641_v40, %v1411_v49  ;;  %v5971_v40 = vld [vmem:[%s6222_s18 + $0x38] ss:$12 sps:$4 sm:$0xff]  }
 0x184   : > { %v1413_v34 = vpop.f32.mrf.mxu0 }
 0x185   : > { %v6733_v33 = vpop.f32.mrf.mxu1  ;;  %v6736_v10 = vadd.f32 %v6643_v1, %v1413_v34  ;;  %v5970_v1 = vld [vmem:[%s6222_s18 + $0x20] ss:$12 sps:$4 sm:$0xff]   ;;  %v1755_v34 = vadd.f32 %v6614_v45, %v1401_v46 }
 0x186   : > { %v1415_v61 = vpop.f32.mrf.mxu0  ;;  %v8847_v46 = vld [vmem:[#allocation37_spill] sm:$0xff] }
 0x187   : > { %v6738_v2 = vpop.f32.mrf.mxu1  ;;  %v1769_v59 = vadd.f32 %v6650_v17, %v1415_v61  ;;  %v2608_v17 = vpack.c.bf16 %v1759_v11, %v1755_v34 }
 0x188   : > { %v1419_v38 = vpop.f32.mrf.mxu0  ;;  %5097 = vmatmul.mubr.bf16.vlgmr.msra.gmra.mxu0 %v5970_v1 }
 0x189   : > { %v6745_v53 = vpop.f32.mrf.mxu1  ;;  %2076 = vmatmul.mubr.bf16.gmra.mxu1 %v6286_v5  ;;  %v2611_v62 = vpack.c.bf16 %v1769_v59, %v1765_v4  ;;  %v6751_v36 = vadd.f32 %v6656_v3, %v1419_v38  ;;  %5100 = vmatprep.mubr.bf16.mxu0 %v5971_v40  ;;  %v1749_v38 = vadd.f32 %v6600_v60, %v1395_v18  ;;  %v5973_v60 = vld [vmem:[%s6222_s18 + $0x68] ss:$12 sps:$4 sm:$0xff]  }
 0x18a   : > { %2083 = vmatprep.mubr.bf16.mxu1 %v6292_v7  ;;  %v1421_v50 = vpop.f32.mrf.mxu0 }
 0x18b   : > { %v6755_v48 = vpop.f32.mrf.mxu1  ;;  %v1775_v61 = vadd.f32 %v6665_v22, %v1421_v50  ;;  %5160 = vmatprep.subr.bf16.mxu0 %v2611_v62 }
 0x18c   : > { %v1423_v5 = vpop.f32.mrf.mxu0  ;;  %5161 = vmatpush3.bf16.xpose.msra.mxu0 %v2611_v62  ;;  %v5972_v62 = vld [vmem:[%s6222_s18 + $0x50] ss:$12 sps:$4 sm:$0xff]  }
 0x18d   : > { %v6758_v49 = vpop.f32.mrf.mxu1  ;;  %v6761_v45 = vadd.f32 %v6667_v15, %v1423_v5  ;;  %5162 = vmatprep.subr.bf16.mxu0 %v2608_v17  ;;  %v1745_v15 = vadd.f32 %v6589_v42, %v6689_v51 }
 0x18e   : > { %v1425_v7 = vpop.f32.mrf.mxu0 }
 0x18f   : > { %v6763_v3 = vpop.f32.mrf.mxu1  ;;  %v1779_v22 = vadd.f32 %v6674_v28, %v1425_v7  ;;  %v2605_v34 = vpack.c.bf16 %v1749_v38, %v1745_v15  ;;  %v5975_v38 = vld [vmem:[%s6222_s18 + $0x98] ss:$12 sps:$4 sm:$0xff]  }
 0x190   : > { %v1429_v11 = vpop.f32.mrf.mxu0  ;;  %5101 = vmatmul.mubr.bf16.gmra.mxu0 %v5972_v62 }
 0x191   : > { %v6769_v4 = vpop.f32.mrf.mxu1  ;;  %2084 = vmatmul.mubr.bf16.gmra.mxu1 %v6299_v8  ;;  %v6775_v59 = vpack.c.bf16 %v1779_v22, %v1775_v61  ;;  %v6778_v1 = vadd.f32 %v6680_v52, %v1429_v11  ;;  %5104 = vmatprep.mubr.bf16.mxu0 %v5973_v60 }
 0x192   : > { %2091 = vmatprep.mubr.bf16.mxu1 %v6305_v12  ;;  %v1431_v28 = vpop.f32.mrf.mxu0 }
 0x193   : > { %v6782_v18 = vpop.f32.mrf.mxu1  ;;  %v1785_v8 = vadd.f32 %v6691_v41, %v1431_v28  ;;  %v5974_v41 = vld [vmem:[%s6222_s18 + $0x80] ss:$12 sps:$4 sm:$0xff]  }
 0x194   : > { %v1433_v40 = vpop.f32.mrf.mxu0  ;;  %5163 = vmatpush3.bf16.xpose.msra.mxu0 %v2608_v17 }
 0x195   : > { %v6785_v50 = vpop.f32.mrf.mxu1  ;;  %v6788_v42 = vadd.f32 %v6693_v58, %v1433_v40  ;;  %5164 = vmatprep.subr.bf16.mxu0 %v2605_v34 }
 0x196   : > { %v1435_v52 = vpop.f32.mrf.mxu0 }
 0x197   : > { %v6790_v12 = vpop.f32.mrf.mxu1  ;;  %v1789_v61 = vadd.f32 %v6700_v39, %v1435_v52 }
 0x198   : > { %v1439_v5 = vpop.f32.mrf.mxu0  ;;  %5105 = vmatmul.mubr.bf16.gmra.mxu0 %v5974_v41 }
 0x199   : > { %v6795_v7 = vpop.f32.mrf.mxu1  ;;  %2092 = vmatmul.mubr.bf16.gmra.mxu1 %v6313_v13  ;;  %v6799_v17 = vpack.c.bf16 %v1789_v61, %v1785_v8  ;;  %v6802_v58 = vadd.f32 %v6704_v29, %v1439_v5  ;;  %5108 = vmatprep.mubr.bf16.mxu0 %v5975_v38 }
 0x19a   : > { %2099 = vmatprep.mubr.bf16.mxu1 %v6319_v16  ;;  %v1441_v22 = vpop.f32.mrf.mxu0 }
 0x19b   : > { %v6806_v11 = vpop.f32.mrf.mxu1  ;;  %v1795_v39 = vadd.f32 %v6711_v56, %v1441_v22  ;;  %v5976_v56 = vld [vmem:[%s6222_s18 + $0xb0] ss:$12 sps:$4 sm:$0xff]  }
 0x19c   : > { %v1443_v62 = vpop.f32.mrf.mxu0  ;;  %5165 = vmatpush3.bf16.xpose.msra.mxu0 %v2605_v34 }
 0x19d   : > { %v6809_v15 = vpop.f32.mrf.mxu1  ;;  %v6812_v13 = vadd.f32 %v6713_v27, %v1443_v62  ;;  %5166 = vmatprep.subr.bf16.mxu0 %v6683_v55 }
 0x19e   : > { %v1445_v29 = vpop.f32.mrf.mxu0 }
 0x19f   : > { %v6815_v60 = vpop.f32.mrf.mxu1  ;;  %v1799_v28 = vadd.f32 %v6719_v54, %v1445_v29 }
 0x1a0   : > { %v1449_v8 = vpop.f32.mrf.mxu0  ;;  %5109 = vmatmul.mubr.bf16.gmra.mxu0 %v5976_v56 }
 0x1a1   : > { %v6820_v40 = vpop.f32.mrf.mxu1  ;;  %2100 = vmatmul.mubr.bf16.gmra.mxu1 %v6328_v19  ;;  %v6824_v34 = vpack.c.bf16 %v1799_v28, %v1795_v39  ;;  %v6827_v27 = vadd.f32 %v6723_v63, %v1449_v8  ;;  %5112 = vmatprep.mubr.bf16.mxu0 %v6289_v6  ;;  %v8841_v6 = vld [vmem:[#allocation31_spill] sm:$0xff] }
 0x1a2   : > { %2107 = vmatprep.mubr.bf16.mxu1 %v6334_v21  ;;  %v1451_v52 = vpop.f32.mrf.mxu0 }
 0x1a3   : > { %v6831_v61 = vpop.f32.mrf.mxu1  ;;  %v1805_v54 = vadd.f32 %v6731_v0, %v1451_v52 }
 0x1a4   : > { %v1453_v5 = vpop.f32.mrf.mxu0  ;;  %5167 = vmatpush3.bf16.xpose.msra.mxu0 %v6683_v55 }
 0x1a5   : > { %v6834_v41 = vpop.f32.mrf.mxu1  ;;  %v6838_v19 = vadd.f32 %v6733_v33, %v1453_v5  ;;  %5168 = vmatprep.subr.bf16.mxu0 %v6659_v23 }
 0x1a6   : > { %v1455_v63 = vpop.f32.mrf.mxu0 }
 0x1a7   : > { %v6841_v38 = vpop.f32.mrf.mxu1  ;;  %v1809_v21 = vadd.f32 %v6738_v2, %v1455_v63 }
 0x1a8   : > { %v1459_v22 = vpop.f32.mrf.mxu0  ;;  %5113 = vmatmul.mubr.bf16.gmra.mxu0 %v6302_v9 }
 0x1a9   : > { %v6846_v0 = vpop.f32.mrf.mxu1  ;;  %2108 = vmatmul.mubr.bf16.gmra.mxu1 %v6343_v24  ;;  %v6850_v55 = vpack.c.bf16 %v1809_v21, %v1805_v54  ;;  %v6853_v33 = vadd.f32 %v6745_v53, %v1459_v22  ;;  %5116 = vmatprep.mubr.bf16.mxu0 %v6316_v14  ;;  %v8816_v21 = vld [vmem:[#allocation8_spill] sm:$0xff] }
 0x1aa   : > { %2115 = vmatprep.mubr.bf16.mxu1 %v6349_v26  ;;  %v1461_v39 = vpop.f32.mrf.mxu0 }
 0x1ab   : > { %8811 = vst [vmem:[#allocation60_spill] sm:$0xff] %v6853_v33  ;;  %v6857_v62 = vpop.f32.mrf.mxu1  ;;  %v1815_v2 = vadd.f32 %v6755_v48, %v1461_v39 }
 0x1ac   : > { %v1463_v29 = vpop.f32.mrf.mxu0  ;;  %5169 = vmatpush3.bf16.xpose.msra.mxu0 %v6659_v23 }
 0x1ad   : > { %v6860_v28 = vpop.f32.mrf.mxu1  ;;  %v6864_v9 = vadd.f32 %v6758_v49, %v1463_v29  ;;  %5170 = vmatprep.subr.bf16.mxu0 %v6635_v47 }
 0x1ae   : > { %v1465_v24 = vpop.f32.mrf.mxu0 }
 0x1af   : > { %8812 = vst [vmem:[#allocation61_spill] sm:$0xff] %v6864_v9  ;;  %v6867_v53 = vpop.f32.mrf.mxu1  ;;  %v1819_v26 = vadd.f32 %v6763_v3, %v1465_v24 }
 0x1b0   : > { %v1469_v8 = vpop.f32.mrf.mxu0  ;;  %5117 = vmatmul.mubr.bf16.gmra.mxu0 %v6331_v20 }
 0x1b1   : > { %v6872_v48 = vpop.f32.mrf.mxu1  ;;  %2116 = vmatmul.mubr.bf16.gmra.mxu1 %v6358_v30  ;;  %v6876_v23 = vpack.c.bf16 %v1819_v26, %v1815_v2  ;;  %v6879_v49 = vadd.f32 %v6769_v4, %v1469_v8  ;;  %5120 = vmatprep.mubr.bf16.mxu0 %v6346_v25 }
 0x1b2   : > { %2123 = vmatprep.mubr.bf16.mxu1 %v6364_v32  ;;  %v1471_v56 = vpop.f32.mrf.mxu0 }
 0x1b3   : > { %8813 = vst [vmem:[#allocation62_spill] sm:$0xff] %v6879_v49  ;;  %v6883_v52 = vpop.f32.mrf.mxu1  ;;  %v1825_v3 = vadd.f32 %v6782_v18, %v1471_v56  ;;  %v8819_v56 = vld [vmem:[#allocation9_spill] sm:$0xff] }
 0x1b4   : > { %v1473_v54 = vpop.f32.mrf.mxu0  ;;  %5171 = vmatpush3.bf16.xpose.msra.mxu0 %v6635_v47 }
 0x1b5   : > { %v6886_v5 = vpop.f32.mrf.mxu1  ;;  %v6890_v20 = vadd.f32 %v6785_v50, %v1473_v54  ;;  %5172 = vmatprep.subr.bf16.mxu0 %v6608_v44  ;;  %v8822_v54 = vld [vmem:[#allocation11_spill] sm:$0xff] }
 0x1b6   : > { %v1475_v30 = vpop.f32.mrf.mxu0 }
 0x1b7   : > { %8814 = vst [vmem:[#allocation63_spill] sm:$0xff] %v6890_v20  ;;  %v6893_v4 = vpop.f32.mrf.mxu1  ;;  %v1829_v32 = vadd.f32 %v6790_v12, %v1475_v30  ;;  %v8823_v30 = vld [vmem:[#allocation13_spill] sm:$0xff]  ;;  %v8873_v20 = vld [vmem:[#allocation36_spill] sm:$0xff] }
 0x1b8   : > { %v1479_v63 = vpop.f32.mrf.mxu0  ;;  %5121 = vmatmul.mubr.bf16.gmra.mxu0 %v6361_v31 }
 0x1b9   : > { %v6898_v18 = vpop.f32.mrf.mxu1  ;;  %2124 = vmatmul.mubr.bf16.gmra.mxu1 %v6373_v35  ;;  %v6902_v47 = vpack.c.bf16 %v1829_v32, %v1825_v3  ;;  %v6905_v50 = vadd.f32 %v6795_v7, %v1479_v63  ;;  %5124 = vmatprep.mubr.bf16.mxu0 %v8816_v21  ;;  %v8818_v35 = vld [vmem:[#allocation45_spill] sm:$0xff]  ;;  %v8820_v3 = vld [vmem:[#allocation10_spill] sm:$0xff] }
 0x1ba   : > { %2131 = vmatprep.mubr.bf16.mxu1 %v6379_v37  ;;  %v1481_v22 = vpop.f32.mrf.mxu0  ;;  %v8835_v37 = vld [vmem:[#allocation25_spill] sm:$0xff] }
 0x1bb   : > { %8815 = vst [vmem:[#allocation64_spill] sm:$0xff] %v6905_v50  ;;  %v6909_v39 = vpop.f32.mrf.mxu1  ;;  %v1835_v12 = vadd.f32 %v6806_v11, %v1481_v22  ;;  %v8870_v50 = vld [vmem:[#allocation42_spill] sm:$0xff] }
 0x1bc   : > { %v1483_v2 = vpop.f32.mrf.mxu0  ;;  %5173 = vmatpush3.bf16.xpose.msra.mxu0 %v6608_v44 }
 0x1bd   : > { %v6912_v29 = vpop.f32.mrf.mxu1  ;;  %v6916_v31 = vadd.f32 %v6809_v15, %v1483_v2  ;;  %5174 = vmatprep.subr.bf16.mxu0 %v8818_v35 }
 0x1be   : > { %v1485_v7 = vpop.f32.mrf.mxu0 }
 0x1bf   : > { %8817 = vst [vmem:[#allocation8_spill] sm:$0xff] %v6916_v31  ;;  %v6919_v24 = vpop.f32.mrf.mxu1  ;;  %v1839_v26 = vadd.f32 %v6815_v60, %v1485_v7 }
 0x1c0   : > { %v1489_v8 = vpop.f32.mrf.mxu0  ;;  %5125 = vmatmul.mubr.bf16.gmra.mxu0 %v8820_v3  ;;  %v8825_v3 = vld [vmem:[#allocation12_spill] sm:$0xff] }
 0x1c1   : > { %v6924_v11 = vpop.f32.mrf.mxu1  ;;  %2132 = vmatmul.mubr.bf16.gmra.mxu1 %v8819_v56  ;;  %v6928_v44 = vpack.c.bf16 %v1839_v26, %v1835_v12  ;;  %v6931_v15 = vadd.f32 %v6820_v40, %v1489_v8  ;;  %5128 = vmatprep.mubr.bf16.mxu0 %v8823_v30  ;;  %v8828_v30 = vld [vmem:[#allocation14_spill] sm:$0xff] }
 0x1c2   : > { %2139 = vmatprep.mubr.bf16.mxu1 %v8822_v54  ;;  %v1491_v32 = vpop.f32.mrf.mxu0  ;;  %v8826_v54 = vld [vmem:[#allocation16_spill] sm:$0xff] }
 0x1c3   : > { %8821 = vst [vmem:[#allocation45_spill] sm:$0xff] %v6931_v15  ;;  %v6935_v63 = vpop.f32.mrf.mxu1  ;;  %v1845_v40 = vadd.f32 %v6831_v61, %v1491_v32  ;;  %v8829_v61 = vld [vmem:[#allocation19_spill] sm:$0xff] }
 0x1c4   : > { %v1493_v60 = vpop.f32.mrf.mxu0  ;;  %5175 = vmatpush3.bf16.xpose.msra.mxu0 %v8818_v35 }
 0x1c5   : > { %v6937_v21 = vpop.f32.mrf.mxu1  ;;  %v6941_v22 = vadd.f32 %v6834_v41, %v1493_v60 }
 0x1c6   : > { %v1495_v12 = vpop.f32.mrf.mxu0 }
 0x1c7   : > { %8824 = vst [vmem:[#allocation9_spill] sm:$0xff] %v6941_v22  ;;  %v6943_v2 = vpop.f32.mrf.mxu1  ;;  %v1849_v26 = vadd.f32 %v6841_v38, %v1495_v12  ;;  %v8869_v22 = vld [vmem:[#allocation44_spill] sm:$0xff] }
 0x1c8   : > { %v1499_v8 = vpop.f32.mrf.mxu0  ;;  %5129 = vmatmul.mubr.bf16.gmra.mxu0 %v8826_v54 }
 0x1c9   : > { %v6949_v56 = vpop.f32.mrf.mxu1  ;;  %2140 = vmatmul.mubr.bf16.gmra.mxu1 %v8825_v3  ;;  %v6953_v35 = vpack.c.bf16 %v1849_v26, %v1845_v40  ;;  %v6956_v41 = vadd.f32 %v6846_v0, %v1499_v8  ;;  %5132 = vmatprep.mubr.bf16.mxu0 %v8829_v61 }
 0x1ca   : > { %2147 = vmatprep.mubr.bf16.mxu1 %v8828_v30  ;;  %v1501_v32 = vpop.f32.mrf.mxu0 }
 0x1cb   : > { %8827 = vst [vmem:[#allocation10_spill] sm:$0xff] %v6956_v41  ;;  %v6960_v60 = vpop.f32.mrf.mxu1  ;;  %v1855_v38 = vadd.f32 %v6857_v62, %v1501_v32  ;;  %5192 = vmatprep.subr.bf16.mxu0 %v6953_v35  ;;  %v8831_v62 = vld [vmem:[#allocation15_spill] sm:$0xff]  ;;  %v8832_v32 = vld [vmem:[#allocation22_spill] sm:$0xff] }
 0x1cc   : > { %v1503_v12 = vpop.f32.mrf.mxu0 }
 0x1cd   : > { %v6964_v3 = vpop.f32.mrf.mxu1  ;;  %v6967_v40 = vadd.f32 %v6860_v28, %v1503_v12  ;;  %v8834_v12 = vld [vmem:[#allocation17_spill] sm:$0xff] }
 0x1ce   : > { %v1505_v26 = vpop.f32.mrf.mxu0 }
 0x1cf   : > { %8830 = vst [vmem:[#allocation11_spill] sm:$0xff] %v6967_v40  ;;  %v6969_v0 = vpop.f32.mrf.mxu1  ;;  %v1859_v54 = vadd.f32 %v6867_v53, %v1505_v26 }
 0x1d0   : > { %v1509_v30 = vpop.f32.mrf.mxu0  ;;  %5133 = vmatmul.mubr.bf16.gmra.mxu0 %v8832_v32 }
 0x1d1   : > { %v6974_v61 = vpop.f32.mrf.mxu1  ;;  %2148 = vmatmul.mubr.bf16.gmra.mxu1 %v8831_v62  ;;  %v6978_v7 = vpack.c.bf16 %v1859_v54, %v1855_v38  ;;  %v6981_v28 = vadd.f32 %v6872_v48, %v1509_v30  ;;  %5136 = vmatprep.mubr.bf16.mxu0 %v8835_v37 }
 0x1d2   : > { %2155 = vmatprep.mubr.bf16.mxu1 %v8834_v12  ;;  %v1511_v25 = vpop.f32.mrf.mxu0  ;;  %v8837_v12 = vld [vmem:[#allocation18_spill] sm:$0xff] }
 0x1d3   : > { %8833 = vst [vmem:[#allocation13_spill] sm:$0xff] %v6981_v28  ;;  %v6985_v8 = vpop.f32.mrf.mxu1  ;;  %v1865_v53 = vadd.f32 %v6883_v52, %v1511_v25  ;;  %v8838_v52 = vld [vmem:[#allocation28_spill] sm:$0xff] }
 0x1d4   : > { %v1513_v26 = vpop.f32.mrf.mxu0 }
 0x1d5   : > { %v6988_v14 = vpop.f32.mrf.mxu1  ;;  %v6991_v62 = vadd.f32 %v6886_v5, %v1513_v26  ;;  %v8840_v26 = vld [vmem:[#allocation20_spill] sm:$0xff] }
 0x1d6   : > { %v1515_v38 = vpop.f32.mrf.mxu0 }
 0x1d7   : > { %8836 = vst [vmem:[#allocation12_spill] sm:$0xff] %v6991_v62  ;;  %v6993_v54 = vpop.f32.mrf.mxu1  ;;  %v1869_v30 = vadd.f32 %v6893_v4, %v1515_v38 }
 0x1d8   : > { %v1519_v37 = vpop.f32.mrf.mxu0  ;;  %5137 = vmatmul.mubr.bf16.gmra.mxu0 %v8838_v52 }
 0x1d9   : > { %v6998_v32 = vpop.f32.mrf.mxu1  ;;  %2156 = vmatmul.mubr.bf16.gmra.mxu1 %v8837_v12  ;;  %v7002_v25 = vpack.c.bf16 %v1869_v30, %v1865_v53  ;;  %v7005_v5 = vadd.f32 %v6898_v18, %v1519_v37  ;;  %5140 = vmatprep.mubr.bf16.mxu0 %v8841_v6 }
 0x1da   : > { %2163 = vmatprep.mubr.bf16.mxu1 %v8840_v26  ;;  %v1521_v16 = vpop.f32.mrf.mxu0  ;;  %v8843_v26 = vld [vmem:[#allocation21_spill] sm:$0xff] }
 0x1db   : > { %8839 = vst [vmem:[#allocation16_spill] sm:$0xff] %v7005_v5  ;;  %v7009_v48 = vpop.f32.mrf.mxu1  ;;  %v1875_v4 = vadd.f32 %v6909_v39, %v1521_v16  ;;  %v8844_v16 = vld [vmem:[#allocation34_spill] sm:$0xff] }
 0x1dc   : > { %v1523_v38 = vpop.f32.mrf.mxu0 }
 0x1dd   : > { %v7012_v51 = vpop.f32.mrf.mxu1  ;;  %v7015_v12 = vadd.f32 %v6912_v29, %v1523_v38  ;;  %v8846_v38 = vld [vmem:[#allocation23_spill] sm:$0xff] }
 0x1de   : > { %v1525_v53 = vpop.f32.mrf.mxu0 }
 0x1df   : > { %8842 = vst [vmem:[#allocation14_spill] sm:$0xff] %v7015_v12  ;;  %v7017_v30 = vpop.f32.mrf.mxu1  ;;  %v1879_v37 = vadd.f32 %v6919_v24, %v1525_v53  ;;  %v8850_v12 = vld [vmem:[#allocation38_spill] sm:$0xff] }
 0x1e0   : > { %v1529_v6 = vpop.f32.mrf.mxu0  ;;  %5141 = vmatmul.mubr.bf16.gmra.mxu0 %v8844_v16 }
 0x1e1   : > { %v7022_v52 = vpop.f32.mrf.mxu1  ;;  %2164 = vmatmul.mubr.bf16.gmra.mxu1 %v8843_v26  ;;  %v7026_v39 = vpack.c.bf16 %v1879_v37, %v1875_v4  ;;  %v7029_v29 = vadd.f32 %v6924_v11, %v1529_v6  ;;  %5144 = vmatprep.mubr.bf16.mxu0 %v8847_v46 }
 0x1e2   : > { %2171 = vmatprep.mubr.bf16.mxu1 %v8846_v38  ;;  %v1531_v43 = vpop.f32.mrf.mxu0  ;;  %v8849_v38 = vld [vmem:[#allocation24_spill] sm:$0xff] }
 0x1e3   : > { %8845 = vst [vmem:[#allocation19_spill] sm:$0xff] %v7029_v29  ;;  %v7033_v18 = vpop.f32.mrf.mxu1  ;;  %v1885_v4 = vadd.f32 %v6935_v63, %v1531_v43  ;;  %v8853_v43 = vld [vmem:[#allocation39_spill] sm:$0xff] }
 0x1e4   : > { %v1533_v24 = vpop.f32.mrf.mxu0 }
 0x1e5   : > { %v7035_v53 = vpop.f32.mrf.mxu1  ;;  %v7038_v5 = vadd.f32 %v6937_v21, %v1533_v24  ;;  %v8852_v24 = vld [vmem:[#allocation26_spill] sm:$0xff] }
 0x1e6   : > { %v1535_v26 = vpop.f32.mrf.mxu0 }
 0x1e7   : > { %8848 = vst [vmem:[#allocation15_spill] sm:$0xff] %v7038_v5  ;;  %v7040_v16 = vpop.f32.mrf.mxu1  ;;  %v1889_v37 = vadd.f32 %v6943_v2, %v1535_v26  ;;  %v8856_v5 = vld [vmem:[#allocation40_spill] sm:$0xff] }
 0x1e8   : > { %v1539_v46 = vpop.f32.mrf.mxu0  ;;  %5145 = vmatmul.mubr.bf16.gmra.mxu0 %v8850_v12 }
 0x1e9   : > { %v7046_v6 = vpop.f32.mrf.mxu1  ;;  %2172 = vmatmul.mubr.bf16.gmra.mxu1 %v8849_v38  ;;  %v7050_v28 = vpack.c.bf16 %v1889_v37, %v1885_v4  ;;  %v7053_v21 = vadd.f32 %v6949_v56, %v1539_v46  ;;  %5148 = vmatprep.mubr.bf16.mxu0 %v8853_v43  ;;  %v8855_v43 = vld [vmem:[#allocation27_spill] sm:$0xff] }
 0x1ea   : > { %2179 = vmatprep.mubr.bf16.mxu1 %v8852_v24  ;;  %v1541_v63 = vpop.f32.mrf.mxu0 }
 0x1eb   : > { %8851 = vst [vmem:[#allocation22_spill] sm:$0xff] %v7053_v21  ;;  %v7057_v11 = vpop.f32.mrf.mxu1  ;;  %v1895_v4 = vadd.f32 %v6960_v60, %v1541_v63  ;;  %v8859_v60 = vld [vmem:[#allocation41_spill] sm:$0xff] }
 0x1ec   : > { %v1543_v2 = vpop.f32.mrf.mxu0 }
 0x1ed   : > { %v7059_v26 = vpop.f32.mrf.mxu1  ;;  %v7062_v29 = vadd.f32 %v6964_v3, %v1543_v2  ;;  %v8858_v2 = vld [vmem:[#allocation29_spill] sm:$0xff] }
 0x1ee   : > { %v1545_v38 = vpop.f32.mrf.mxu0 }
 0x1ef   : > { %8854 = vst [vmem:[#allocation17_spill] sm:$0xff] %v7062_v29  ;;  %v7064_v12 = vpop.f32.mrf.mxu1  ;;  %v1899_v37 = vadd.f32 %v6969_v0, %v1545_v38  ;;  %v8864_v29 = vld [vmem:[#allocation32_spill] sm:$0xff] }
 0x1f0   : > { %v1549_v46 = vpop.f32.mrf.mxu0  ;;  %5149 = vmatmul.mubr.bf16.gmra.mxu0 %v8856_v5 }
 0x1f1   : > { %v7070_v24 = vpop.f32.mrf.mxu1  ;;  %2180 = vmatmul.mubr.bf16.gmra.mxu1 %v8855_v43  ;;  %v7074_v62 = vpack.c.bf16 %v1899_v37, %v1895_v4  ;;  %v7077_v3 = vadd.f32 %v6974_v61, %v1549_v46  ;;  %5152 = vmatprep.mubr.bf16.mxu0 %v8859_v60  ;;  %v8862_v60 = vld [vmem:[#allocation43_spill] sm:$0xff] }
 0x1f2   : > { %2187 = vmatprep.mubr.bf16.mxu1 %v8858_v2  ;;  %v7081_v63 = vpop.f32.mrf.mxu0  ;;  %v8861_v2 = vld [vmem:[#allocation30_spill] sm:$0xff] }
 0x1f3   : > { %8857 = vst [vmem:[#allocation25_spill] sm:$0xff] %v7077_v3  ;;  %v7083_v56 = vpop.f32.mrf.mxu1 }
 0x1f4   : > { %v1553_v0 = vpop.f32.mrf.mxu0 }
 0x1f5   : > { %v7085_v38 = vpop.f32.mrf.mxu1  ;;  %v7088_v43 = vadd.f32 %v6988_v14, %v1553_v0  ;;  %v8865_v14 = vld [vmem:[#allocation47_spill] sm:$0xff] }
 0x1f6   : > { %v1555_v5 = vpop.f32.mrf.mxu0 }
 0x1f7   : > { %8860 = vst [vmem:[#allocation18_spill] sm:$0xff] %v7088_v43  ;;  %v7090_v4 = vpop.f32.mrf.mxu1 }
 0x1f8   : > { %v1559_v37 = vpop.f32.mrf.mxu0  ;;  %5153 = vmatmul.mubr.bf16.gmra.mxu0 %v8862_v60 }
 0x1f9   : > { %v7094_v46 = vpop.f32.mrf.mxu1  ;;  %2188 = vmatmul.mubr.bf16.gmra.mxu1 %v8861_v2  ;;  %v7099_v21 = vadd.f32 %v6998_v32, %v1559_v37  ;;  %5156 = vmatprep.mubr.bf16.mxu0 %v8865_v14  ;;  %v8868_v14 = vld [vmem:[#allocation50_spill] sm:$0xff] }
 0x1fa   : > { %2195 = vmatprep.mubr.bf16.mxu1 %v8864_v29  ;;  %v1561_v0 = vpop.f32.mrf.mxu0  ;;  %v8867_v29 = vld [vmem:[#allocation33_spill] sm:$0xff] }
 0x1fb   : > { %8863 = vst [vmem:[#allocation28_spill] sm:$0xff] %v7099_v21  ;;  %v7103_v41 = vpop.f32.mrf.mxu1  ;;  %v1915_v9 = vadd.f32 %v7009_v48, %v1561_v0 }
 0x1fc   : > { %v1563_v40 = vpop.f32.mrf.mxu0 }
 0x1fd   : > { %v7105_v15 = vpop.f32.mrf.mxu1  ;;  %v7108_v61 = vadd.f32 %v7012_v51, %v1563_v40  ;;  %v8871_v51 = vpack.c.bf16 %v8869_v22, %v8870_v50  ;;  %v8872_v40 = vld [vmem:[#allocation35_spill] sm:$0xff] }
 0x1fe   : > { %v1565_v3 = vpop.f32.mrf.mxu0  ;;  %v5977_v22 = vld [vmem:[%s6222_s18 + $0x1fc] ss:$12 sps:$4 sm:$0xff]  }
 0x1ff   : > { %8866 = vst [vmem:[#allocation20_spill] sm:$0xff] %v7108_v61  ;;  %v7110_v2 = vpop.f32.mrf.mxu1 }
 0x200   : > { %v1569_v37 = vpop.f32.mrf.mxu0  ;;  %5157 = vmatmul.mubr.bf16.gmra.mxu0 %v8868_v14 }
 0x201   : > { %v7114_v60 = vpop.f32.mrf.mxu1  ;;  %2196 = vmatmul.mubr.bf16.gmra.mxu1 %v8867_v29  ;;  %v7119_v43 = vadd.f32 %v7022_v52, %v1569_v37  ;;  %5176 = vmatprep.mubr.bf16.mxu0 %v8871_v51  ;;  %v1919_v52 = vadd.f32 %v7017_v30, %v1565_v3 }
 0x202   : > { %2203 = vmatprep.mubr.bf16.mxu1 %v8872_v40  ;;  %v1571_v31 = vpop.f32.mrf.mxu0 }
 0x203   : > { %v7125_v49 = vpop.f32.mrf.mxu1  ;;  %v1925_v50 = vadd.f32 %v7033_v18, %v1571_v31  ;;  %v8877_v31 = vld [vmem:[#allocation51_spill] sm:$0xff]  ;;  %v8878_v18 = vld [vmem:[#allocation49_spill] sm:$0xff] }
 0x204   : > { %v1573_v32 = vpop.f32.mrf.mxu0 }
 0x205   : > { %v7127_v21 = vpop.f32.mrf.mxu1  ;;  %v7130_v61 = vadd.f32 %v7035_v53, %v1573_v32  ;;  %v8874_v53 = vld [vmem:[#allocation48_spill] sm:$0xff]  ;;  %v8875_v32 = vld [vmem:[#allocation46_spill] sm:$0xff] }
 0x206   : > { %v1575_v29 = vpop.f32.mrf.mxu0  ;;  %v8876_v33 = vpack.c.bf16 %v8874_v53, %v8875_v32  ;;  %v5978_v53 = vld [vmem:[%s6222_s18 + $0x1f8] ss:$12 sps:$4 sm:$0xff]   ;;  %v8880_v32 = vld [vmem:[#allocation53_spill] sm:$0xff] }
 0x207   : > { %v7132_v14 = vpop.f32.mrf.mxu1  ;;  %v1929_v37 = vadd.f32 %v7040_v16, %v1575_v29  ;;  %v8879_v16 = vpack.c.bf16 %v8877_v31, %v8878_v18  ;;  %v1905_v31 = vadd.f32 %v6985_v8, %v7081_v63 }
 0x208   : > { %v1579_v51 = vpop.f32.mrf.mxu0  ;;  %5177 = vmatmul.mubr.bf16.vlgmr.msra.gmra.mxu0 %v8876_v33  ;;  %v2656_v33 = vpack.c.bf16 %v1919_v52, %v1915_v9 }
 0x209   : > { %v7139_v40 = vpop.f32.mrf.mxu1  ;;  %2204 = vmatmul.mubr.bf16.gmra.mxu1 %v8873_v20  ;;  %v2659_v30 = vpack.c.bf16 %v1929_v37, %v1925_v50  ;;  %v7147_v3 = vadd.f32 %v7046_v6, %v1579_v51  ;;  %5193 = vmatpush3.bf16.xpose.msra.mxu0 %v6953_v35  ;;  %v1909_v51 = vadd.f32 %v6993_v54, %v1555_v5  ;;  %v8884_v5 = vld [vmem:[#allocation54_spill] sm:$0xff] }
 0x20a   : > { %5180 = vmatprep.mubr.bf16.mxu0 %v8879_v16  ;;  %5194 = vmatprep.subr.bf16.mxu0 %v6928_v44  ;;  %v1581_v29 = vpop.f32.mrf.mxu0 }
 0x20b   : > { %v7154_v20 = vpop.f32.mrf.mxu1  ;;  %2211 = vmatprep.mubr.bf16.mxu1 %v5977_v22  ;;  %v1935_v48 = vadd.f32 %v7057_v11, %v1581_v29  ;;  %5224 = vmatprep.subr.bf16.mxu1 %v2659_v30  ;;  %v2653_v8 = vpack.c.bf16 %v1909_v51, %v1905_v31 }
 0x20c   : > { %v1583_v6 = vpop.f32.mrf.mxu0  ;;  %5225 = vmatpush3.bf16.xpose.msra.mxu1 %v2659_v30 }
 0x20d   : > { %v7158_v0 = vpop.f32.mrf.mxu1  ;;  %v7161_v35 = vadd.f32 %v7059_v26, %v1583_v6  ;;  %5226 = vmatprep.subr.bf16.mxu1 %v2656_v33  ;;  %v8881_v26 = vld [vmem:[#allocation52_spill] sm:$0xff] }
 0x20e   : > { %v1585_v50 = vpop.f32.mrf.mxu0  ;;  %v8882_v30 = vpack.c.bf16 %v8880_v32, %v8881_v26 }
 0x20f   : > { %v7163_v37 = vpop.f32.mrf.mxu1  ;;  %v2661_v9 = vpack.c.bf16 %v7161_v35, %v7147_v3  ;;  %v1939_v11 = vadd.f32 %v7064_v12, %v1585_v50  ;;  %v8883_v12 = vld [vmem:[#allocation55_spill] sm:$0xff]  ;;  %v5979_v50 = vld [vmem:[%s6222_s18 + $0x214] ss:$12 sps:$4 sm:$0xff]   ;;  %v8913_v3 = vld [vmem:[#allocation13_spill] sm:$0xff] }
 0x210   : > { %v1589_v52 = vpop.f32.mrf.mxu0  ;;  %5181 = vmatmul.mubr.bf16.gmra.mxu0 %v8882_v30  ;;  %v8885_v16 = vpack.c.bf16 %v8883_v12, %v8884_v5  ;;  %v8886_v30 = vld [vmem:[#allocation57_spill] sm:$0xff]  ;;  %v8889_v5 = vld [vmem:[#allocation59_spill] sm:$0xff] }
 0x211   : > { %v7169_v22 = vpop.f32.mrf.mxu1  ;;  %2212 = vmatmul.mubr.bf16.gmra.mxu1 %v5978_v53  ;;  %v7177_v18 = vpack.c.bf16 %v1939_v11, %v1935_v48  ;;  %v7180_v54 = vadd.f32 %v7070_v24, %v1589_v52  ;;  %5195 = vmatpush3.bf16.xpose.msra.mxu0 %v6928_v44 }
 0x212   : > { %5184 = vmatprep.mubr.bf16.mxu0 %v8885_v16  ;;  %5196 = vmatprep.subr.bf16.mxu0 %v6902_v47  ;;  %v1591_v29 = vpop.f32.mrf.mxu0  ;;  %v8890_v16 = vld [vmem:[#allocation58_spill] sm:$0xff] }
 0x213   : > { %v7187_v6 = vpop.f32.mrf.mxu1  ;;  %2219 = vmatprep.mubr.bf16.mxu1 %v5979_v50  ;;  %v1945_v63 = vadd.f32 %v7083_v56, %v1591_v29  ;;  %v5980_v56 = vld [vmem:[%s6222_s18 + $0x210] ss:$12 sps:$4 sm:$0xff]   ;;  %v8891_v29 = vpack.c.bf16 %v8889_v5, %v8890_v16  ;;  %v8893_v16 = vpack.c.bf16 %v6761_v45, %v6751_v36 }
 0x214   : > { %v1593_v48 = vpop.f32.mrf.mxu0  ;;  %5227 = vmatpush3.bf16.xpose.msra.mxu1 %v2656_v33  ;;  %v8887_v33 = vld [vmem:[#allocation56_spill] sm:$0xff] }
 0x215   : > { %v7191_v24 = vpop.f32.mrf.mxu1  ;;  %v7194_v44 = vadd.f32 %v7085_v38, %v1593_v48  ;;  %5228 = vmatprep.subr.bf16.mxu1 %v2653_v8  ;;  %v8888_v31 = vpack.c.bf16 %v8886_v30, %v8887_v33  ;;  %v5981_v48 = vld [vmem:[%s6222_s18 + $0x22c] ss:$12 sps:$4 sm:$0xff]  }
 0x216   : > { %v1595_v11 = vpop.f32.mrf.mxu0 }
 0x217   : > { %v7196_v52 = vpop.f32.mrf.mxu1  ;;  %v2664_v53 = vpack.c.bf16 %v7194_v44, %v7180_v54  ;;  %v1949_v32 = vadd.f32 %v7090_v4, %v1595_v11 }
 0x218   : > { %v1599_v51 = vpop.f32.mrf.mxu0  ;;  %5185 = vmatmul.mubr.bf16.gmra.mxu0 %v8888_v31  ;;  %v5982_v31 = vld [vmem:[%s6222_s18 + $0x228] ss:$12 sps:$4 sm:$0xff]  }
 0x219   : > { %v7201_v26 = vpop.f32.mrf.mxu1  ;;  %2220 = vmatmul.mubr.bf16.gmra.mxu1 %v5980_v56  ;;  %v7207_v38 = vpack.c.bf16 %v1949_v32, %v1945_v63  ;;  %v7210_v12 = vadd.f32 %v7094_v46, %v1599_v51  ;;  %5197 = vmatpush3.bf16.xpose.msra.mxu0 %v6902_v47 }
 0x21a   : > { %5188 = vmatprep.mubr.bf16.mxu0 %v8891_v29  ;;  %5198 = vmatprep.subr.bf16.mxu0 %v6876_v23  ;;  %v1601_v4 = vpop.f32.mrf.mxu0 }
 0x21b   : > { %v7217_v50 = vpop.f32.mrf.mxu1  ;;  %2227 = vmatprep.mubr.bf16.mxu1 %v5981_v48  ;;  %v1955_v63 = vadd.f32 %v7103_v41, %v1601_v4  ;;  %v5983_v4 = vld [vmem:[%s6222_s18 + $0x244] ss:$12 sps:$4 sm:$0xff]  }
 0x21c   : > { %v1603_v11 = vpop.f32.mrf.mxu0  ;;  %5229 = vmatpush3.bf16.xpose.msra.mxu1 %v2653_v8 }
 0x21d   : > { %v7221_v32 = vpop.f32.mrf.mxu1  ;;  %v7224_v47 = vadd.f32 %v7105_v15, %v1603_v11  ;;  %5230 = vmatprep.subr.bf16.mxu1 %v7074_v62  ;;  %v8892_v15 = vpack.c.bf16 %v6736_v10, %v6727_v57 }
 0x21e   : > { %v1605_v46 = vpop.f32.mrf.mxu0 }
 0x21f   : > { %v7227_v51 = vpop.f32.mrf.mxu1  ;;  %v2667_v56 = vpack.c.bf16 %v7224_v47, %v7210_v12  ;;  %v1959_v30 = vadd.f32 %v7110_v2, %v1605_v46 }
 0x220   : > { %v1609_v33 = vpop.f32.mrf.mxu0  ;;  %5189 = vmatmul.mubr.bf16.gmra.mxu0 %v8892_v15 }
 0x221   : > { %v7232_v41 = vpop.f32.mrf.mxu1  ;;  %2228 = vmatmul.mubr.bf16.gmra.mxu1 %v5982_v31  ;;  %v7238_v8 = vpack.c.bf16 %v1959_v30, %v1955_v63  ;;  %v7241_v5 = vadd.f32 %v7114_v60, %v1609_v33  ;;  %5199 = vmatpush3.bf16.xpose.msra.mxu0 %v6876_v23  ;;  %v5984_v30 = vld [vmem:[%s6222_s18 + $0x240] ss:$12 sps:$4 sm:$0xff]   ;;  %v5985_v33 = vld [vmem:[%s6222_s18 + $0x25c] ss:$12 sps:$4 sm:$0xff]  }
 0x222   : > { %5208 = vmatprep.mubr.bf16.mxu0 %v8893_v16  ;;  %5200 = vmatprep.subr.bf16.mxu0 %v6850_v55  ;;  %v1611_v2 = vpop.f32.mrf.mxu0 }
 0x223   : > { %v7248_v29 = vpop.f32.mrf.mxu1  ;;  %2235 = vmatprep.mubr.bf16.mxu1 %v5983_v4  ;;  %v1965_v60 = vadd.f32 %v7125_v49, %v1611_v2 }
 0x224   : > { %v1613_v57 = vpop.f32.mrf.mxu0  ;;  %5231 = vmatpush3.bf16.xpose.msra.mxu1 %v7074_v62 }
 0x225   : > { %v7251_v10 = vpop.f32.mrf.mxu1  ;;  %v7255_v23 = vadd.f32 %v7127_v21, %v1613_v57  ;;  %5232 = vmatprep.subr.bf16.mxu1 %v7050_v28 }
 0x226   : > { %v1615_v36 = vpop.f32.mrf.mxu0 }
 0x227   : > { %v7258_v45 = vpop.f32.mrf.mxu1  ;;  %v2670_v48 = vpack.c.bf16 %v7255_v23, %v7241_v5  ;;  %v1969_v63 = vadd.f32 %v7132_v14, %v1615_v36 }
 0x228   : > { %v1619_v11 = vpop.f32.mrf.mxu0 }
 0x229   : > { %v7264_v46 = vpop.f32.mrf.mxu1  ;;  %2236 = vmatmul.mubr.bf16.gmra.mxu1 %v5984_v30  ;;  %v7267_v62 = vpack.c.bf16 %v1969_v63, %v1965_v60  ;;  %v7270_v21 = vadd.f32 %v7139_v40, %v1619_v11  ;;  %5201 = vmatpush3.bf16.xpose.msra.mxu0 %v6850_v55  ;;  %v5986_v63 = vld [vmem:[%s6222_s18 + $0x258] ss:$12 sps:$4 sm:$0xff]   ;;  %v5987_v11 = vld [vmem:[%s6222_s18 + $0x274] ss:$12 sps:$4 sm:$0xff]  }
 0x22a   : > { %2243 = vmatprep.mubr.bf16.mxu1 %v5985_v33  ;;  %5202 = vmatprep.subr.bf16.mxu0 %v6824_v34  ;;  %v1621_v49 = vpop.f32.mrf.mxu0 }
 0x22b   : > { %v2047_v31 = vpop.f32.mrf.mxu1  ;;  %v1975_v2 = vadd.f32 %v7154_v20, %v1621_v49 }
 0x22c   : > { %v1623_v14 = vpop.f32.mrf.mxu0  ;;  %5233 = vmatpush3.bf16.xpose.msra.mxu1 %v7050_v28  ;;  %v5992_v31 = vld [vmem:[%s6222_s18 + $0x2a0] ss:$12 sps:$4 sm:$0xff]  }
 0x22d   : > { %v7275_v15 = vpop.f32.mrf.mxu1  ;;  %v7279_v16 = vadd.f32 %v7158_v0, %v1623_v14  ;;  %5234 = vmatprep.subr.bf16.mxu1 %v7026_v39 }
 0x22e   : > { %v1625_v40 = vpop.f32.mrf.mxu0 }
 0x22f   : > { %v2050_v55 = vpop.f32.mrf.mxu1  ;;  %v1979_v57 = vadd.f32 %v7163_v37, %v1625_v40 }
 0x230   : > { %v1629_v36 = vpop.f32.mrf.mxu0  ;;  %v5988_v55 = vld [vmem:[%s6222_s18 + $0x270] ss:$12 sps:$4 sm:$0xff]  }
 0x231   : > { %v7286_v60 = vpop.f32.mrf.mxu1  ;;  %2244 = vmatmul.mubr.bf16.gmra.mxu1 %v5986_v63  ;;  %v7289_v28 = vpack.c.bf16 %v1979_v57, %v1975_v2  ;;  %v7292_v0 = vadd.f32 %v7169_v22, %v1629_v36  ;;  %5203 = vmatpush3.bf16.xpose.msra.mxu0 %v6824_v34 }
 0x232   : > { %2251 = vmatprep.mubr.bf16.mxu1 %v5987_v11  ;;  %5204 = vmatprep.subr.bf16.mxu0 %v6799_v17  ;;  %v7297_v20 = vpop.f32.mrf.mxu0 }
 0x233   : > { %v2055_v37 = vpop.f32.mrf.mxu1 }
 0x234   : > { %v1633_v30 = vpop.f32.mrf.mxu0  ;;  %5235 = vmatpush3.bf16.xpose.msra.mxu1 %v7026_v39  ;;  %v5989_v39 = vld [vmem:[%s6222_s18 + $0x28c] ss:$12 sps:$4 sm:$0xff]  }
 0x235   : > { %v7299_v33 = vpop.f32.mrf.mxu1  ;;  %v7303_v49 = vadd.f32 %v7191_v24, %v1633_v30  ;;  %5236 = vmatprep.subr.bf16.mxu1 %v7002_v25 }
 0x236   : > { %v7306_v34 = vpop.f32.mrf.mxu0 }
 0x237   : > { %v2058_v22 = vpop.f32.mrf.mxu1  ;;  %v8932_v5 = vpack.c.bf16 %v7303_v49, %v7292_v0 }
 0x238   : > { %v1639_v14 = vpop.f32.mrf.mxu0 }
 0x239   : > { %v7310_v40 = vpop.f32.mrf.mxu1  ;;  %2252 = vmatmul.mubr.bf16.gmra.mxu1 %v5988_v55  ;;  %v7314_v2 = vadd.f32 %v7201_v26, %v1639_v14  ;;  %5205 = vmatpush3.bf16.xpose.msra.mxu0 %v6799_v17  ;;  %v5990_v14 = vld [vmem:[%s6222_s18 + $0x288] ss:$12 sps:$4 sm:$0xff]  }
 0x23a   : > { %2259 = vmatprep.mubr.bf16.mxu1 %v5989_v39  ;;  %5206 = vmatprep.subr.bf16.mxu0 %v6775_v59  ;;  %v1641_v24 = vpop.f32.mrf.mxu0 }
 0x23b   : > { %v2063_v57 = vpop.f32.mrf.mxu1 }
 0x23c   : > { %v1643_v36 = vpop.f32.mrf.mxu0  ;;  %5237 = vmatpush3.bf16.xpose.msra.mxu1 %v7002_v25  ;;  %v5991_v25 = vld [vmem:[%s6222_s18 + $0x2a4] ss:$12 sps:$4 sm:$0xff]  }
 0x23d   : > { %v7319_v63 = vpop.f32.mrf.mxu1  ;;  %v7323_v11 = vadd.f32 %v7221_v32, %v1643_v36  ;;  %5238 = vmatprep.subr.bf16.mxu1 %v6978_v7 }
 0x23e   : > { %v1645_v26 = vpop.f32.mrf.mxu0 }
 0x23f   : > { %v2066_v17 = vpop.f32.mrf.mxu1 }
 0x240   : > { %v1649_v30 = vpop.f32.mrf.mxu0 }
 0x241   : > { %v7328_v22 = vpop.f32.mrf.mxu1  ;;  %2260 = vmatmul.mubr.bf16.gmra.mxu1 %v5990_v14  ;;  %v7332_v55 = vadd.f32 %v7232_v41, %v1649_v30  ;;  %5207 = vmatpush3.bf16.xpose.msra.mxu0 %v6775_v59  ;;  %v1999_v41 = vadd.f32 %v7227_v51, %v1645_v26  ;;  %v8895_v51 = vpack.c.bf16 %v6812_v13, %v6802_v58  ;;  %v8912_v30 = vld [vmem:[#allocation12_spill] sm:$0xff] }
 0x242   : > { %2267 = vmatprep.mubr.bf16.mxu1 %v5991_v25  ;;  %v1651_v32 = vpop.f32.mrf.mxu0  ;;  %v1989_v13 = vadd.f32 %v7196_v52, %v7306_v34  ;;  %v8898_v34 = vld [vmem:[#allocation60_spill] sm:$0xff]  ;;  %v8914_v35 = vpack.c.bf16 %v8912_v30, %v8913_v3 }
 0x243   : > { %v2071_v39 = vpop.f32.mrf.mxu1  ;;  %v2005_v59 = vadd.f32 %v7248_v29, %v1651_v32  ;;  %v5993_v29 = vld [vmem:[%s6222_s18 + $0x2bc] ss:$12 sps:$4 sm:$0xff]  }
 0x244   : > { %v1653_v57 = vpop.f32.mrf.mxu0  ;;  %5239 = vmatpush3.bf16.xpose.msra.mxu1 %v6978_v7  ;;  %v8894_v39 = vpack.c.bf16 %v6788_v42, %v6778_v1 }
 0x245   : > { %v7336_v36 = vpop.f32.mrf.mxu1  ;;  %v7340_v17 = vadd.f32 %v7251_v10, %v1653_v57 }
 0x246   : > { %v1655_v14 = vpop.f32.mrf.mxu0 }
 0x247   : > { %v2074_v37 = vpop.f32.mrf.mxu1  ;;  %v2009_v25 = vadd.f32 %v7258_v45, %v1655_v14  ;;  %v8934_v0 = vpack.c.bf16 %v7340_v17, %v7332_v55 }
 0x248   : > { %5209 = vmatmul.mubr.bf16.vlgmr.msra.gmra.mxu0 %v8894_v39  ;;  %v5098_v10 = vpop.f32.mrf.mxu0  ;;  %v1995_v37 = vadd.f32 %v7217_v50, %v1641_v24 }
 0x249   : > { %v7350_v7 = vpop.f32.mrf.mxu1  ;;  %2268 = vmatmul.mubr.bf16.gmra.mxu1 %v5992_v31  ;;  %v2683_v57 = vpack.c.bf16 %v2009_v25, %v2005_v59  ;;  %5212 = vmatprep.mubr.bf16.mxu0 %v8895_v51  ;;  %v2343_v31 = vadd.f32 %v5098_v10, %v7286_v60  ;;  %v8896_v25 = vpack.c.bf16 %v6838_v19, %v6827_v27 }
 0x24a   : > { %2275 = vmatprep.mubr.bf16.mxu1 %v5993_v29  ;;  %v2334_v45 = vpop.f32.mrf.mxu0  ;;  %v2680_v32 = vpack.c.bf16 %v1999_v41, %v1995_v37  ;;  %v1985_v10 = vadd.f32 %v7187_v6, %v7297_v20 }
 0x24b   : > { %v2079_v26 = vpop.f32.mrf.mxu1  ;;  %5256 = vmatprep.subr.bf16.mxu0 %v2683_v57  ;;  %v2335_v14 = vadd.f32 %v2334_v45, %v7264_v46  ;;  %v8897_v46 = vld [vmem:[#allocation61_spill] sm:$0xff]  ;;  %v8901_v45 = vld [vmem:[#allocation62_spill] sm:$0xff] }
 0x24c   : > { %v5099_v42 = vpop.f32.mrf.mxu0  ;;  %5257 = vmatpush3.bf16.xpose.msra.mxu0 %v2683_v57  ;;  %v8899_v37 = vpack.c.bf16 %v8897_v46, %v8898_v34  ;;  %v2677_v57 = vpack.c.bf16 %v1989_v13, %v1985_v10  ;;  %v8900_v26 = vld [vmem:[#allocation63_spill] sm:$0xff] }
 0x24d   : > { %v7358_v1 = vpop.f32.mrf.mxu1  ;;  %v2346_v50 = vadd.f32 %v5099_v42, %v7299_v33  ;;  %5258 = vmatprep.subr.bf16.mxu0 %v2680_v32  ;;  %v5994_v33 = vld [vmem:[%s6222_s18 + $0x2b8] ss:$12 sps:$4 sm:$0xff]   ;;  %v8902_v42 = vpack.c.bf16 %v8900_v26, %v8901_v45  ;;  %v5998_v26 = vld [vmem:[%s6222_s18 + $0x2e8] ss:$12 sps:$4 sm:$0xff]  }
 0x24e   : > { %v2337_v58 = vpop.f32.mrf.mxu0 }
 0x24f   : > { %v2082_v24 = vpop.f32.mrf.mxu1  ;;  %v7365_v41 = vpack.c.bf16 %v2346_v50, %v2343_v31  ;;  %v2338_v59 = vadd.f32 %v2337_v58, %v7275_v15  ;;  %v5995_v15 = vld [vmem:[%s6222_s18 + $0x2d4] ss:$12 sps:$4 sm:$0xff]   ;;  %v5996_v50 = vld [vmem:[%s6222_s18 + $0x2d0] ss:$12 sps:$4 sm:$0xff]  }
 0x250   : > { %5213 = vmatmul.mubr.bf16.gmra.mxu0 %v8896_v25  ;;  %v7374_v39 = vpop.f32.mrf.mxu0  ;;  %v8903_v58 = vld [vmem:[#allocation8_spill] sm:$0xff] }
 0x251   : > { %v7371_v60 = vpop.f32.mrf.mxu1  ;;  %2276 = vmatmul.mubr.bf16.gmra.mxu1 %v5994_v33  ;;  %v7378_v52 = vpack.c.bf16 %v2338_v59, %v2335_v14  ;;  %5216 = vmatprep.mubr.bf16.mxu0 %v8899_v37  ;;  %v8904_v14 = vld [vmem:[#allocation64_spill] sm:$0xff]  ;;  %v5997_v59 = vld [vmem:[%s6222_s18 + $0x2ec] ss:$12 sps:$4 sm:$0xff]  }
 0x252   : > { %2283 = vmatprep.mubr.bf16.mxu1 %v5995_v15  ;;  %v7384_v19 = vpop.f32.mrf.mxu0  ;;  %v8905_v13 = vpack.c.bf16 %v8903_v58, %v8904_v14  ;;  %v8906_v37 = vld [vmem:[#allocation9_spill] sm:$0xff] }
 0x253   : > { %v2087_v27 = vpop.f32.mrf.mxu1  ;;  %v8907_v15 = vld [vmem:[#allocation45_spill] sm:$0xff] }
 0x254   : > { %v7386_v29 = vpop.f32.mrf.mxu0  ;;  %5259 = vmatpush3.bf16.xpose.msra.mxu0 %v2680_v32  ;;  %v8908_v27 = vpack.c.bf16 %v8906_v37, %v8907_v15 }
 0x255   : > { %v2088_v51 = vpop.f32.mrf.mxu1  ;;  %5260 = vmatprep.subr.bf16.mxu0 %v2677_v57 }
 0x256   : > { %v7388_v20 = vpop.f32.mrf.mxu0 }
 0x257   : > { %v2090_v6 = vpop.f32.mrf.mxu1 }
 0x258   : > { %5217 = vmatmul.mubr.bf16.gmra.mxu0 %v8902_v42  ;;  %v5106_v24 = vpop.f32.mrf.mxu0  ;;  %v8909_v42 = vld [vmem:[#allocation11_spill] sm:$0xff] }
 0x259   : > { %v2093_v31 = vpop.f32.mrf.mxu1  ;;  %2284 = vmatmul.mubr.bf16.gmra.mxu1 %v5996_v50  ;;  %5220 = vmatprep.mubr.bf16.mxu0 %v8905_v13  ;;  %v8910_v50 = vld [vmem:[#allocation10_spill] sm:$0xff] }
 0x25a   : > { %2291 = vmatprep.mubr.bf16.mxu1 %v5997_v59  ;;  %v2366_v25 = vpop.f32.mrf.mxu0  ;;  %v8911_v58 = vpack.c.bf16 %v8909_v42, %v8910_v50 }
 0x25b   : > { %v2095_v32 = vpop.f32.mrf.mxu1 }
 0x25c   : > { %v5107_v10 = vpop.f32.mrf.mxu0  ;;  %5261 = vmatpush3.bf16.xpose.msra.mxu0 %v2677_v57 }
 0x25d   : > { %v2096_v33 = vpop.f32.mrf.mxu1  ;;  %5262 = vmatprep.subr.bf16.mxu0 %v7289_v28 }
 0x25e   : > { %v2369_v34 = vpop.f32.mrf.mxu0 }
 0x25f   : > { %v2098_v46 = vpop.f32.mrf.mxu1 }
 0x260   : > { %5221 = vmatmul.mubr.bf16.gmra.mxu0 %v8908_v27  ;;  %v5110_v45 = vpop.f32.mrf.mxu0 }
 0x261   : > { %v2101_v6 = vpop.f32.mrf.mxu1  ;;  %2292 = vmatmul.mubr.bf16.gmra.mxu1 %v5998_v26  ;;  %5272 = vmatprep.mubr.bf16.mxu0 %v2661_v9  ;;  %v2378_v9 = vadd.f32 %v5107_v10, %v2088_v51  ;;  %v2370_v51 = vadd.f32 %v2369_v34, %v7358_v1 }
 0x262   : > { %5240 = vmatprep.mubr.bf16.mxu1 %v8911_v58  ;;  %v2382_v14 = vpop.f32.mrf.mxu0  ;;  %v2391_v13 = vadd.f32 %v5110_v45, %v2101_v6  ;;  %v8915_v45 = vld [vmem:[#allocation14_spill] sm:$0xff] }
 0x263   : > { %v2103_v57 = vpop.f32.mrf.mxu1  ;;  %v2383_v27 = vadd.f32 %v2382_v14, %v2093_v31  ;;  %v2375_v31 = vadd.f32 %v5106_v24, %v7371_v60  ;;  %v8918_v24 = vld [vmem:[#allocation15_spill] sm:$0xff] }
 0x264   : > { %v5111_v32 = vpop.f32.mrf.mxu0  ;;  %5263 = vmatpush3.bf16.xpose.msra.mxu0 %v7289_v28  ;;  %v8916_v57 = vld [vmem:[#allocation16_spill] sm:$0xff] }
 0x265   : > { %v2104_v59 = vpop.f32.mrf.mxu1  ;;  %5264 = vmatprep.subr.bf16.mxu0 %v7267_v62  ;;  %v8917_v4 = vpack.c.bf16 %v8915_v45, %v8916_v57  ;;  %v2606_v30 = vpack.c.bf16 %v2378_v9, %v2375_v31  ;;  %v8925_v31 = vld [vmem:[#allocation25_spill] sm:$0xff] }
 0x266   : > { %v2394_v46 = vadd.f32 %v5111_v32, %v2104_v59  ;;  %v2385_v15 = vpop.f32.mrf.mxu0 }
 0x267   : > { %v2106_v37 = vpop.f32.mrf.mxu1  ;;  %v2386_v42 = vadd.f32 %v2385_v15, %v2096_v33  ;;  %v8919_v15 = vld [vmem:[#allocation19_spill] sm:$0xff] }
 0x268   : > { %v2612_v26 = vpack.c.bf16 %v2394_v46, %v2391_v13  ;;  %v5114_v58 = vpop.f32.mrf.mxu0 }
 0x269   : > { %v2109_v50 = vpop.f32.mrf.mxu1  ;;  %5241 = vmatmul.mubr.bf16.vlgmr.msra.gmra.mxu1 %v8914_v35  ;;  %v2609_v6 = vpack.c.bf16 %v2386_v42, %v2383_v27  ;;  %v8920_v27 = vpack.c.bf16 %v8918_v24, %v8919_v15  ;;  %v8921_v42 = vld [vmem:[#allocation17_spill] sm:$0xff]  ;;  %v2359_v35 = vadd.f32 %v7374_v39, %v7328_v22  ;;  %v2351_v22 = vadd.f32 %v7384_v19, %v7310_v40 }
 0x26a   : > { %5244 = vmatprep.mubr.bf16.mxu1 %v8917_v4  ;;  %5288 = vmatprep.subr.bf16.mxu1 %v2612_v26  ;;  %v2398_v59 = vpop.f32.mrf.mxu0  ;;  %v2367_v4 = vadd.f32 %v2366_v25, %v7350_v7 }
 0x26b   : > { %v2111_v28 = vpop.f32.mrf.mxu1  ;;  %5289 = vmatpush3.bf16.msra.mxu1 %v2612_v26  ;;  %v2399_v14 = vadd.f32 %v2398_v59, %v2109_v50  ;;  %v8922_v50 = vld [vmem:[#allocation22_spill] sm:$0xff] }
 0x26c   : > { %5290 = vmatprep.subr.bf16.mxu1 %v2609_v6  ;;  %v5115_v13 = vpop.f32.mrf.mxu0  ;;  %5265 = vmatpush3.bf16.xpose.msra.mxu0 %v7267_v62  ;;  %v2362_v62 = vadd.f32 %v7386_v29, %v7336_v36  ;;  %v2603_v1 = vpack.c.bf16 %v2370_v51, %v2367_v4  ;;  %v8923_v3 = vpack.c.bf16 %v8921_v42, %v8922_v50  ;;  %v8924_v59 = vld [vmem:[#allocation18_spill] sm:$0xff] }
 0x26d   : > { %v2112_v33 = vpop.f32.mrf.mxu1  ;;  %5266 = vmatprep.subr.bf16.mxu0 %v7238_v8  ;;  %v2354_v29 = vadd.f32 %v7388_v20, %v7319_v63  ;;  %v8926_v63 = vpack.c.bf16 %v8924_v59, %v8925_v31 }
 0x26e   : > { %v2401_v32 = vpop.f32.mrf.mxu0  ;;  %v2600_v36 = vpack.c.bf16 %v2362_v62, %v2359_v35 }
 0x26f   : > { %v2114_v10 = vpop.f32.mrf.mxu1  ;;  %5291 = vmatpush3.bf16.msra.mxu1 %v2609_v6  ;;  %v2402_v46 = vadd.f32 %v2401_v32, %v2112_v33  ;;  %v2597_v20 = vpack.c.bf16 %v2354_v29, %v2351_v22  ;;  %v8928_v33 = vld [vmem:[#allocation28_spill] sm:$0xff] }
 0x270   : > { %5292 = vmatprep.subr.bf16.mxu1 %v2606_v30  ;;  %v7422_v60 = vpop.f32.mrf.mxu0 }
 0x271   : > { %v2117_v37 = vpop.f32.mrf.mxu1  ;;  %5245 = vmatmul.mubr.bf16.gmra.mxu1 %v8920_v27  ;;  %v7429_v34 = vpack.c.bf16 %v2402_v46, %v2399_v14  ;;  %v8927_v14 = vld [vmem:[#allocation20_spill] sm:$0xff] }
 0x272   : > { %v2407_v26 = vadd.f32 %v5114_v58, %v2117_v37  ;;  %5248 = vmatprep.mubr.bf16.mxu1 %v8923_v3  ;;  %v7434_v25 = vpop.f32.mrf.mxu0  ;;  %v8930_v37 = vpack.c.bf16 %v7130_v61, %v7119_v43 }
 0x273   : > { %v2119_v7 = vpop.f32.mrf.mxu1  ;;  %5293 = vmatpush3.bf16.msra.mxu1 %v2606_v30 }
 0x274   : > { %5294 = vmatprep.subr.bf16.mxu1 %v2603_v1  ;;  %v7438_v6 = vpop.f32.mrf.mxu0  ;;  %5267 = vmatpush3.bf16.xpose.msra.mxu0 %v7238_v8 }
 0x275   : > { %v2120_v9 = vpop.f32.mrf.mxu1  ;;  %5268 = vmatprep.subr.bf16.mxu0 %v7207_v38 }
 0x276   : > { %v2410_v58 = vadd.f32 %v5115_v13, %v2120_v9  ;;  %v7444_v57 = vpop.f32.mrf.mxu0  ;;  %v8929_v13 = vpack.c.bf16 %v8927_v14, %v8928_v33 }
 0x277   : > { %v2122_v45 = vpop.f32.mrf.mxu1  ;;  %5295 = vmatpush3.bf16.msra.mxu1 %v2603_v1 }
 0x278   : > { %v7448_v39 = vpack.c.bf16 %v2410_v58, %v2407_v26  ;;  %5296 = vmatprep.subr.bf16.mxu1 %v2600_v36  ;;  %v7452_v8 = vpop.f32.mrf.mxu0 }
 0x279   : > { %v7450_v28 = vpop.f32.mrf.mxu1  ;;  %5249 = vmatmul.mubr.bf16.gmra.mxu1 %v8926_v63 }
 0x27a   : > { %5252 = vmatprep.mubr.bf16.mxu1 %v8929_v13  ;;  %v7460_v51 = vpop.f32.mrf.mxu0 }
 0x27b   : > { %v2127_v30 = vpop.f32.mrf.mxu1  ;;  %5297 = vmatpush3.bf16.msra.mxu1 %v2600_v36 }
 0x27c   : > { %5298 = vmatprep.subr.bf16.mxu1 %v2597_v20  ;;  %v7464_v19 = vpop.f32.mrf.mxu0  ;;  %5269 = vmatpush3.bf16.xpose.msra.mxu0 %v7207_v38 }
 0x27d   : > { %v7462_v40 = vpop.f32.mrf.mxu1  ;;  %5270 = vmatprep.subr.bf16.mxu0 %v7177_v18 }
 0x27e   : > { %v7468_v32 = vpop.f32.mrf.mxu0 }
 0x27f   : > { %v2130_v10 = vpop.f32.mrf.mxu1  ;;  %5299 = vmatpush3.bf16.msra.mxu1 %v2597_v20 }
 0x280   : > { %5300 = vmatprep.subr.bf16.mxu1 %v7365_v41  ;;  %v5126_v46 = vpop.f32.mrf.mxu0 }
 0x281   : > { %v7471_v4 = vpop.f32.mrf.mxu1  ;;  %5253 = vmatmul.mubr.bf16.gmra.mxu1 %v8930_v37 }
 0x282   : > { %v2446_v15 = vpop.f32.mrf.mxu0 }
 0x283   : > { %v2135_v24 = vpop.f32.mrf.mxu1  ;;  %5301 = vmatpush3.bf16.msra.mxu1 %v7365_v41 }
 0x284   : > { %5302 = vmatprep.subr.bf16.mxu1 %v7378_v52  ;;  %v5127_v27 = vpop.f32.mrf.mxu0  ;;  %5271 = vmatpush3.bf16.xpose.msra.mxu0 %v7177_v18 }
 0x285   : > { %v7478_v38 = vpop.f32.mrf.mxu1 }
 0x286   : > { %v2449_v1 = vpop.f32.mrf.mxu0 }
 0x287   : > { %v2138_v62 = vpop.f32.mrf.mxu1  ;;  %5303 = vmatpush3.bf16.msra.mxu1 %v7378_v52 }
 0x288   : > { %v7484_v42 = vpop.f32.mrf.mxu0 }
 0x289   : > { %v7482_v26 = vpop.f32.mrf.mxu1 }
 0x28a   : > { %v2462_v61 = vpop.f32.mrf.mxu0 }
 0x28b   : > { %v2143_v43 = vpop.f32.mrf.mxu1  ;;  %5273 = vmatmul.mubr.bf16.vlgmr.msra.gmra.mxu0 %v2664_v53  ;;  %v8931_v53 = vpack.c.bf16 %v7279_v16, %v7270_v21  ;;  %v8933_v21 = vpack.c.bf16 %v7323_v11, %v7314_v2 }
 0x28c   : > { %v7489_v50 = vpop.f32.mrf.mxu0  ;;  %5276 = vmatprep.mubr.bf16.mxu0 %v2667_v56 }
 0x28d   : > { %v2144_v41 = vpop.f32.mrf.mxu1 }
 0x28e   : > { %v2465_v3 = vpop.f32.mrf.mxu0 }
 0x28f   : > { %v2146_v18 = vpop.f32.mrf.mxu1 }
 0x290   : > { %v7494_v7 = vpop.f32.mrf.mxu0 }
 0x291   : > { %v2149_v52 = vpop.f32.mrf.mxu1 }
 0x292   : > { %v7496_v9 = vpop.f32.mrf.mxu0 }
 0x293   : > { %v2151_v35 = vpop.f32.mrf.mxu1  ;;  %5277 = vmatmul.mubr.bf16.gmra.mxu0 %v2670_v48 }
 0x294   : > { %v7501_v44 = vpop.f32.mrf.mxu0  ;;  %5280 = vmatprep.mubr.bf16.mxu0 %v8931_v53 }
 0x295   : > { %v2152_v54 = vpop.f32.mrf.mxu1 }
 0x296   : > { %v7506_v47 = vpop.f32.mrf.mxu0  ;;  %v2442_v62 = vadd.f32 %v7464_v19, %v2152_v54  ;;  %v2431_v19 = vadd.f32 %v7460_v51, %v7482_v26 }
 0x297   : > { %v2154_v12 = vpop.f32.mrf.mxu1 }
 0x298   : > { %v7508_v36 = vpop.f32.mrf.mxu0 }
 0x299   : > { %v2157_v56 = vpop.f32.mrf.mxu1 }
 0x29a   : > { %v7510_v58 = vpop.f32.mrf.mxu0  ;;  %v2447_v30 = vadd.f32 %v2446_v15, %v2157_v56  ;;  %v2434_v15 = vadd.f32 %v7468_v32, %v2144_v41 }
 0x29b   : > { %v2159_v29 = vpop.f32.mrf.mxu1  ;;  %5281 = vmatmul.mubr.bf16.gmra.mxu0 %v8932_v5  ;;  %v2423_v5 = vadd.f32 %v7422_v60, %v7471_v4 }
 0x29c   : > { %v7515_v48 = vpop.f32.mrf.mxu0  ;;  %5284 = vmatprep.mubr.bf16.mxu0 %v8933_v21  ;;  %v2627_v29 = vpack.c.bf16 %v2434_v15, %v2431_v19 }
 0x29d   : > { %v2160_v23 = vpop.f32.mrf.mxu1 }
 0x29e   : > { %v7520_v45 = vpop.f32.mrf.mxu0  ;;  %v2450_v14 = vadd.f32 %v2449_v1, %v2160_v23  ;;  %v2418_v23 = vadd.f32 %v7444_v57, %v7462_v40 }
 0x29f   : > { %v2162_v16 = vpop.f32.mrf.mxu1 }
 0x2a0   : > { %v7522_v59 = vpop.f32.mrf.mxu0  ;;  %v2633_v43 = vpack.c.bf16 %v2450_v14, %v2447_v30 }
 0x2a1   : > { %v2165_v22 = vpop.f32.mrf.mxu1 }
 0x2a2   : > { %v7524_v63 = vpop.f32.mrf.mxu0  ;;  %v2455_v33 = vadd.f32 %v5126_v46, %v2165_v22  ;;  %v2439_v46 = vadd.f32 %v7452_v8, %v2149_v52  ;;  %v2426_v52 = vadd.f32 %v7438_v6, %v7478_v38 }
 0x2a3   : > { %v2167_v31 = vpop.f32.mrf.mxu1  ;;  %5285 = vmatmul.mubr.bf16.gmra.mxu0 %v8934_v0 }
 0x2a4   : > { %v7529_v20 = vpop.f32.mrf.mxu0  ;;  %v2630_v35 = vpack.c.bf16 %v2442_v62, %v2439_v46  ;;  %v2624_v21 = vpack.c.bf16 %v2426_v52, %v2423_v5 }
 0x2a5   : > { %v2168_v49 = vpop.f32.mrf.mxu1 }
 0x2a6   : > { %v2458_v2 = vadd.f32 %v5127_v27, %v2168_v49  ;;  %v7531_v13 = vpop.f32.mrf.mxu0 }
 0x2a7   : > { %v2170_v11 = vpop.f32.mrf.mxu1 }
 0x2a8   : > { %v2636_v10 = vpack.c.bf16 %v2458_v2, %v2455_v33  ;;  %v7533_v24 = vpop.f32.mrf.mxu0 }
 0x2a9   : > { %v2173_v37 = vpop.f32.mrf.mxu1 }
 0x2aa   : > { %v2463_v18 = vadd.f32 %v2462_v61, %v2173_v37  ;;  %5320 = vmatprep.subr.bf16.mxu0 %v2636_v10  ;;  %v7536_v17 = vpop.f32.mrf.mxu0 }
 0x2ab   : > { %v2175_v55 = vpop.f32.mrf.mxu1  ;;  %5321 = vmatpush3.bf16.msra.mxu0 %v2636_v10 }
 0x2ac   : > { %5322 = vmatprep.subr.bf16.mxu0 %v2633_v43  ;;  %v7539_v1 = vpop.f32.mrf.mxu0 }
 0x2ad   : > { %v2176_v27 = vpop.f32.mrf.mxu1 }
 0x2ae   : > { %v2466_v53 = vadd.f32 %v2465_v3, %v2176_v27  ;;  %v7542_v56 = vpop.f32.mrf.mxu0 }
 0x2af   : > { %v2178_v12 = vpop.f32.mrf.mxu1  ;;  %5323 = vmatpush3.bf16.msra.mxu0 %v2633_v43 }
 0x2b0   : > { %v7546_v61 = vpack.c.bf16 %v2466_v53, %v2463_v18  ;;  %5324 = vmatprep.subr.bf16.mxu0 %v2630_v35  ;;  %v7548_v8 = vpop.f32.mrf.mxu0 }
 0x2b1   : > { %v2181_v54 = vpop.f32.mrf.mxu1 }
 0x2b2   : > { %8935 = vst [vmem:[#allocation31_spill] sm:$0xff] %v7546_v61  ;;  %v2471_v32 = vadd.f32 %v7484_v42, %v2181_v54  ;;  %v7553_v3 = vpop.f32.mrf.mxu0  ;;  %v2415_v42 = vadd.f32 %v7434_v25, %v7450_v28 }
 0x2b3   : > { %v2183_v41 = vpop.f32.mrf.mxu1  ;;  %5325 = vmatpush3.bf16.msra.mxu0 %v2630_v35 }
 0x2b4   : > { %5326 = vmatprep.subr.bf16.mxu0 %v2627_v29  ;;  %v7557_v26 = vpop.f32.mrf.mxu0  ;;  %v2621_v31 = vpack.c.bf16 %v2418_v23, %v2415_v42 }
 0x2b5   : > { %v2184_v51 = vpop.f32.mrf.mxu1 }
 0x2b6   : > { %v2474_v6 = vadd.f32 %v7489_v50, %v2184_v51  ;;  %v7562_v16 = vpop.f32.mrf.mxu0  ;;  %v3073_v50 = vlaneseq }
 0x2b7   : > { %v2186_v38 = vpop.f32.mrf.mxu1  ;;  %5327 = vmatpush3.bf16.msra.mxu0 %v2627_v29 }
 0x2b8   : > { %v7566_v22 = vpack.c.bf16 %v2474_v6, %v2471_v32  ;;  %5328 = vmatprep.subr.bf16.mxu0 %v2624_v21  ;;  %v7568_v4 = vpop.f32.mrf.mxu0  ;;  %v7578_v2 = vshrl.u32 %v3073_v50, 7  ;;  %v7591_v43 = vand.u32 127, %v3073_v50 }
 0x2b9   : > { %v2189_v60 = vpop.f32.mrf.mxu1 }
 0x2ba   : > { %8936 = vst [vmem:[#allocation21_spill] sm:$0xff] %v7566_v22  ;;  %v2479_v0 = vadd.f32 %v7496_v9, %v2189_v60  ;;  %v7571_v40 = vpop.f32.mrf.mxu0  ;;  %vm3092_vm1 = vcmp.ge.s32.totalorder %v7578_v2, %v7591_v43  ;;  %v7631_v32 = vadd.s32 48, %v7578_v2  ;;  %v7654_v60 = vadd.s32 32, %v7578_v2 }
 0x2bb   : > { %v2191_v57 = vpop.f32.mrf.mxu1  ;;  %5329 = vmatpush3.bf16.msra.mxu0 %v2624_v21  ;;  %v7641_v21 = vadd.s32 56, %v7578_v2  ;;  %v7660_v50 = vadd.s32 40, %v7578_v2 }
 0x2bc   : > { %5330 = vmatprep.subr.bf16.mxu0 %v2621_v31  ;;  %v7573_v14 = vpop.f32.mrf.mxu0  ;;  %vm3098_vm4 = vcmp.ge.s32.totalorder %v7631_v32, %v7591_v43  ;;  %vm3096_vm6 = vcmp.ge.s32.totalorder %v7654_v60, %v7591_v43 }
 0x2bd   : > { %v2192_v49 = vpop.f32.mrf.mxu1  ;;  %vm3099_vm5 = vcmp.ge.s32.totalorder %v7641_v21, %v7591_v43  ;;  %vm3097_vm7 = vcmp.ge.s32.totalorder %v7660_v50, %v7591_v43 }
 0x2be   : > { %v2482_v25 = vadd.f32 %v7506_v47, %v2192_v49  ;;  %v7576_v33 = vpop.f32.mrf.mxu0  ;;  %v7589_v47 = vadd.s32 16, %v7578_v2 }
 0x2bf   : > { %v2194_v28 = vpop.f32.mrf.mxu1  ;;  %5331 = vmatpush3.bf16.msra.mxu0 %v2621_v31 }
 0x2c0   : > { %v7580_v11 = vpack.c.bf16 %v2482_v25, %v2479_v0  ;;  %5332 = vmatprep.subr.bf16.mxu0 %v7448_v39  ;;  %v7583_v30 = vpop.f32.mrf.mxu0  ;;  %vm3094_vm0 = vcmp.ge.s32.totalorder %v7589_v47, %v7591_v43 }
 0x2c1   : > { %v2197_v9 = vpop.f32.mrf.mxu1 }
 0x2c2   : > { %8937 = vst [vmem:[#allocation34_spill] sm:$0xff] %v7580_v11  ;;  %v2487_v10 = vadd.f32 %v7494_v7, %v2197_v9  ;;  %v7586_v62 = vpop.f32.mrf.mxu0  ;;  %v7603_v7 = vadd.s32 24, %v7578_v2 }
 0x2c3   : > { %v2199_v37 = vpop.f32.mrf.mxu1  ;;  %5333 = vmatpush3.bf16.msra.mxu0 %v7448_v39 }
 0x2c4   : > { %5334 = vmatprep.subr.bf16.mxu0 %v7429_v34  ;;  %v7595_v55 = vpop.f32.mrf.mxu0  ;;  %vm3095_vm2 = vcmp.ge.s32.totalorder %v7603_v7, %v7591_v43 }
 0x2c5   : > { %v2200_v18 = vpop.f32.mrf.mxu1 }
 0x2c6   : > { %v2490_v46 = vadd.f32 %v7501_v44, %v2200_v18  ;;  %v7598_v15 = vpop.f32.mrf.mxu0  ;;  %v7611_v44 = vadd.s32 8, %v7578_v2 }
 0x2c7   : > { %v2202_v27 = vpop.f32.mrf.mxu1  ;;  %5335 = vmatpush3.bf16.msra.mxu0 %v7429_v34 }
 0x2c8   : > { %v7606_v35 = vpack.c.bf16 %v2490_v46, %v2487_v10  ;;  %v5178_v53 = vpop.f32.mrf.mxu0  ;;  %vm3093_vm3 = vcmp.ge.s32.totalorder %v7611_v44, %v7591_v43  ;;  %v7683_v46 = vadd.s32 88, %v7578_v2 }
 0x2c9   : > { %v2205_v39 = vpop.f32.mrf.mxu1  ;;  %v7617_v19 = vsel %vm3094_vm0, %v5178_v53, -1e+30 }
 0x2ca   : > { %8938 = vst [vmem:[#allocation23_spill] sm:$0xff] %v7606_v35  ;;  %v2495_v12 = vadd.f32 %v7510_v58, %v2205_v39  ;;  %3208 = vmax.xlane.f32.xlu1 %v7617_v19  ;;  %v2719_v34 = vpop.f32.mrf.mxu0  ;;  %vm3103_vm9 = vcmp.ge.s32.totalorder %v7683_v46, %v7591_v43 }
 0x2cb   : > { %v2207_v54 = vpop.f32.mrf.mxu1  ;;  %v7625_v52 = vsel %vm3092_vm1, %v2719_v34, -1e+30 }
 0x2cc   : > { %3204 = vmax.xlane.f32.xlu0 %v7625_v52  ;;  %v5179_v58 = vpop.f32.mrf.mxu0 }
 0x2cd   : > { %v2208_v29 = vpop.f32.mrf.mxu1  ;;  %v7637_v5 = vsel %vm3095_vm2, %v5179_v58, -1e+30 }
 0x2ce   : > { %v2498_v41 = vadd.f32 %v7520_v45, %v2208_v29  ;;  %3210 = vmax.xlane.f32.xlu1 %v7637_v5  ;;  %v2722_v23 = vpop.f32.mrf.mxu0 }
 0x2cf   : > { %v2210_v51 = vpop.f32.mrf.mxu1  ;;  %v7648_v38 = vsel %vm3093_vm3, %v2722_v23, -1e+30 }
 0x2d0   : > { %v7643_v6 = vpack.c.bf16 %v2498_v41, %v2495_v12  ;;  %3206 = vmax.xlane.f32.xlu0 %v7648_v38  ;;  %v5182_v42 = vpop.f32.mrf.mxu0  ;;  %v7696_v12 = vadd.s32 64, %v7578_v2  ;;  %v7708_v41 = vadd.s32 72, %v7578_v2 }
 0x2d1   : > { %v2213_v45 = vpop.f32.mrf.mxu1  ;;  %v7665_v49 = vsel %vm3098_vm4, %v5182_v42, -1e+30 }
 0x2d2   : > { %8939 = vst [vmem:[#allocation37_spill] sm:$0xff] %v7643_v6  ;;  %v2503_v31 = vadd.f32 %v7508_v36, %v2213_v45  ;;  %v2735_v57 = vpop.f32.mrf.mxu0  ;;  %v7671_v36 = vadd.s32 80, %v7578_v2  ;;  %vm3100_vm10 = vcmp.ge.s32.totalorder %v7696_v12, %v7591_v43  ;;  %v7719_v45 = vadd.s32 112, %v7578_v2 }
 0x2d3   : > { %v2215_v0 = vpop.f32.mrf.mxu1  ;;  %vm3101_vm11 = vcmp.ge.s32.totalorder %v7708_v41, %v7591_v43 }
 0x2d4   : > { %3216 = vmax.xlane.f32.xlu0 %v7665_v49  ;;  %v5183_v28 = vpop.f32.mrf.mxu0  ;;  %vm3102_vm8 = vcmp.ge.s32.totalorder %v7671_v36, %v7591_v43  ;;  %vm3106_vm12 = vcmp.ge.s32.totalorder %v7719_v45, %v7591_v43 }
 0x2d5   : > { %v2216_v25 = vpop.f32.mrf.mxu1  ;;  %v7677_v10 = vsel %vm3099_vm5, %v5183_v28, -1e+30 }
 0x2d6   : > { %v2506_v9 = vadd.f32 %v7515_v48, %v2216_v25  ;;  %3218 = vmax.xlane.f32.xlu1 %v7677_v10  ;;  %v2738_v18 = vpop.f32.mrf.mxu0  ;;  %v7690_v48 = vsel %vm3096_vm6, %v2735_v57, -1e+30  ;;  %v7731_v25 = vadd.s32 120, %v7578_v2 }
 0x2d7   : > { %v2218_v37 = vpop.f32.mrf.mxu1  ;;  %v7702_v34 = vsel %vm3097_vm7, %v2738_v18, -1e+30  ;;  %v7744_v18 = vadd.s32 96, %v7578_v2 }
 0x2d8   : > { %v7685_v27 = vpack.c.bf16 %v2506_v9, %v2503_v31  ;;  %3212 = vmax.xlane.f32.xlu0 %v7690_v48  ;;  %v5186_v53 = vpop.f32.mrf.mxu0  ;;  %vm3107_vm13 = vcmp.ge.s32.totalorder %v7731_v25, %v7591_v43 }
 0x2d9   : > { %v2221_v39 = vpop.f32.mrf.mxu1  ;;  %v7713_v51 = vsel %vm3102_vm8, %v5186_v53, -1e+30  ;;  %vm3104_vm14 = vcmp.ge.s32.totalorder %v7744_v18, %v7591_v43 }
 0x2da   : > { %8940 = vst [vmem:[#allocation24_spill] sm:$0xff] %v7685_v27  ;;  %v2511_v54 = vadd.f32 %v7524_v63, %v2221_v39  ;;  %3214 = vmax.xlane.f32.xlu1 %v7702_v34  ;;  %v2751_v58 = vpop.f32.mrf.mxu0 }
 0x2db   : > { %v2223_v29 = vpop.f32.mrf.mxu1 }
 0x2dc   : > { %3224 = vmax.xlane.f32.xlu0 %v7713_v51  ;;  %v5187_v23 = vpop.f32.mrf.mxu0  ;;  %v7755_v29 = vadd.s32 104, %v7578_v2 }
 0x2dd   : > { %v2224_v63 = vpop.f32.mrf.mxu1  ;;  %v7725_v31 = vsel %vm3103_vm9, %v5187_v23, -1e+30 }
 0x2de   : > { %v2514_v42 = vadd.f32 %v7531_v13, %v2224_v63  ;;  %3226 = vmax.xlane.f32.xlu1 %v7725_v31  ;;  %v2754_v57 = vpop.f32.mrf.mxu0  ;;  %v7738_v13 = vsel %vm3100_vm10, %v2751_v58, -1e+30  ;;  %vm3105_vm15 = vcmp.ge.s32.totalorder %v7755_v29, %v7591_v43 }
 0x2df   : > { %v2226_v0 = vpop.f32.mrf.mxu1  ;;  %v7749_v39 = vsel %vm3101_vm11, %v2754_v57, -1e+30 }
 0x2e0   : > { %v7733_v28 = vpack.c.bf16 %v2514_v42, %v2511_v54  ;;  %3220 = vmax.xlane.f32.xlu0 %v7738_v13  ;;  %v5190_v37 = vpop.f32.mrf.mxu0 }
 0x2e1   : > { %v2229_v9 = vpop.f32.mrf.mxu1  ;;  %v7760_v58 = vsel %vm3106_vm12, %v5190_v37, -1e+30 }
 0x2e2   : > { %8941 = vst [vmem:[#allocation38_spill] sm:$0xff] %v7733_v28  ;;  %3222 = vmax.xlane.f32.xlu1 %v7749_v39  ;;  %v2767_v54 = vpop.f32.mrf.mxu0  ;;  %v2519_v42 = vadd.f32 %v7522_v59, %v2229_v9 }
 0x2e3   : > { %v2231_v53 = vpop.f32.mrf.mxu1  ;;  %v7780_v59 = vsel %vm3104_vm14, %v2767_v54, -1e+30 }
 0x2e4   : > { %3232 = vmax.xlane.f32.xlu0 %v7760_v58  ;;  %v5191_v23 = vpop.f32.mrf.mxu0 }
 0x2e5   : > { %v2232_v63 = vpop.f32.mrf.mxu1  ;;  %v7770_v57 = vsel %vm3107_vm13, %v5191_v23, -1e+30 }
 0x2e6   : > { %v2522_v0 = vadd.f32 %v7529_v20, %v2232_v63  ;;  %3234 = vmax.xlane.f32.xlu1 %v7770_v57  ;;  %v2770_v37 = vpop.f32.mrf.mxu0 }
 0x2e7   : > { %v2234_v53 = vpop.f32.mrf.mxu1  ;;  %v7787_v63 = vsel %vm3105_vm15, %v2770_v37, -1e+30 }
 0x2e8   : > { %v7775_v61 = vpack.c.bf16 %v2522_v0, %v2519_v42  ;;  %3228 = vmax.xlane.f32.xlu0 %v7780_v59 }
 0x2e9   : > { %v2237_v20 = vpop.f32.mrf.mxu1 }
 0x2ea   : > { %8942 = vst [vmem:[#allocation26_spill] sm:$0xff] %v7775_v61  ;;  %v2527_v9 = vadd.f32 %v7536_v17, %v2237_v20  ;;  %5352 = vmatprep.subr.bf16.mxu1 %v7775_v61  ;;  %3230 = vmax.xlane.f32.xlu1 %v7787_v63 }
 0x2eb   : > { %v2239_v23 = vpop.f32.mrf.mxu1 }
 0x2ed   : > { %v2240_v42 = vpop.f32.mrf.mxu1 }
 0x2ee   : > { %v2530_v0 = vadd.f32 %v7542_v56, %v2240_v42 }
 0x2ef   : > { %v2242_v54 = vpop.f32.mrf.mxu1 }
 0x2f0   : > { %v7792_v53 = vpack.c.bf16 %v2530_v0, %v2527_v9 }
 0x2f1   : > { %v2245_v22 = vpop.f32.mrf.mxu1 }
 0x2f2   : > { %8943 = vst [vmem:[#allocation39_spill] sm:$0xff] %v7792_v53  ;;  %v2535_v17 = vadd.f32 %v7533_v24, %v2245_v22 }
 0x2f3   : > { %v2247_v11 = vpop.f32.mrf.mxu1 }
 0x2f5   : > { %v2248_v35 = vpop.f32.mrf.mxu1 }
 0x2f6   : > { %v2538_v20 = vadd.f32 %v7539_v1, %v2248_v35 }
 0x2f7   : > { %v2250_v37 = vpop.f32.mrf.mxu1 }
 0x2f8   : > { %v7796_v6 = vpack.c.bf16 %v2538_v20, %v2535_v17 }
 0x2f9   : > { %v2253_v27 = vpop.f32.mrf.mxu1 }
 0x2fa   : > { %8944 = vst [vmem:[#allocation27_spill] sm:$0xff] %v7796_v6  ;;  %v2543_v61 = vadd.f32 %v7553_v3, %v2253_v27 }
 0x2fb   : > { %v2255_v23 = vpop.f32.mrf.mxu1 }
 0x2fd   : > { %v2256_v28 = vpop.f32.mrf.mxu1 }
 0x2fe   : > { %v2546_v56 = vadd.f32 %v7562_v16, %v2256_v28 }
 0x2ff   : > { %v2258_v42 = vpop.f32.mrf.mxu1 }
 0x300   : > { %v7800_v9 = vpack.c.bf16 %v2546_v56, %v2543_v61 }
 0x301   : > { %v2261_v0 = vpop.f32.mrf.mxu1 }
 0x302   : > { %8945 = vst [vmem:[#allocation40_spill] sm:$0xff] %v7800_v9  ;;  %v2551_v24 = vadd.f32 %v7548_v8, %v2261_v0 }
 0x303   : > { %v2263_v11 = vpop.f32.mrf.mxu1 }
 0x305   : > { %v2264_v54 = vpop.f32.mrf.mxu1 }
 0x306   : > { %v2554_v1 = vadd.f32 %v7557_v26, %v2264_v54 }
 0x307   : > { %v2266_v22 = vpop.f32.mrf.mxu1 }
 0x308   : > { %v7804_v35 = vpack.c.bf16 %v2554_v1, %v2551_v24  ;;  %v5210_v17 = vpop.f32.mrf.mxu0 }
 0x309   : > { %v2269_v20 = vpop.f32.mrf.mxu1  ;;  %v7809_v3 = vsel %vm3094_vm0, %v5210_v17, -1e+30 }
 0x30a   : > { %8946 = vst [vmem:[#allocation29_spill] sm:$0xff] %v7804_v35  ;;  %3240 = vmax.xlane.f32.xlu0 %v7809_v3  ;;  %v2816_v61 = vpop.f32.mrf.mxu0  ;;  %v2559_v8 = vadd.f32 %v7571_v40, %v2269_v20 }
 0x30b   : > { %v2271_v16 = vpop.f32.mrf.mxu1  ;;  %v7817_v37 = vsel %vm3092_vm1, %v2816_v61, -1e+30 }
 0x30c   : > { %v5211_v27 = vpop.f32.mrf.mxu0 }
 0x30d   : > { %v2272_v28 = vpop.f32.mrf.mxu1  ;;  %v7822_v23 = vsel %vm3095_vm2, %v5211_v27, -1e+30 }
 0x30e   : > { %v2562_v26 = vadd.f32 %v7576_v33, %v2272_v28  ;;  %3236 = vmax.xlane.f32.xlu0 %v7817_v37  ;;  %3242 = vmax.xlane.f32.xlu1 %v7822_v23  ;;  %v2819_v56 = vpop.f32.mrf.mxu0 }
 0x30f   : > { %v2274_v42 = vpop.f32.mrf.mxu1  ;;  %v7831_v11 = vsel %vm3093_vm3, %v2819_v56, -1e+30 }
 0x310   : > { %v7826_v0 = vpack.c.bf16 %v2562_v26, %v2559_v8  ;;  %v5214_v40 = vpop.f32.mrf.mxu0 }
 0x311   : > { %v2277_v33 = vpop.f32.mrf.mxu1  ;;  %v7836_v54 = vsel %vm3098_vm4, %v5214_v40, -1e+30 }
 0x312   : > { %8947 = vst [vmem:[#allocation41_spill] sm:$0xff] %v7826_v0  ;;  %3238 = vmax.xlane.f32.xlu1 %v7831_v11  ;;  %3248 = vmax.xlane.f32.xlu0 %v7836_v54  ;;  %v2832_v24 = vpop.f32.mrf.mxu0  ;;  %v2567_v20 = vadd.f32 %v7568_v4, %v2277_v33 }
 0x313   : > { %v2279_v1 = vpop.f32.mrf.mxu1  ;;  %v7845_v16 = vsel %vm3096_vm6, %v2832_v24, -1e+30 }
 0x314   : > { %v5215_v22 = vpop.f32.mrf.mxu0 }
 0x315   : > { %v2280_v17 = vpop.f32.mrf.mxu1  ;;  %v7850_v27 = vsel %vm3099_vm5, %v5215_v22, -1e+30 }
 0x316   : > { %v2570_v61 = vadd.f32 %v7573_v14, %v2280_v17  ;;  %3244 = vmax.xlane.f32.xlu0 %v7845_v16  ;;  %3250 = vmax.xlane.f32.xlu1 %v7850_v27  ;;  %v2835_v28 = vpop.f32.mrf.mxu0 }
 0x317   : > { %v2282_v8 = vpop.f32.mrf.mxu1  ;;  %v7859_v56 = vsel %vm3097_vm7, %v2835_v28, -1e+30 }
 0x318   : > { %v7854_v26 = vpack.c.bf16 %v2570_v61, %v2567_v20  ;;  %v5218_v4 = vpop.f32.mrf.mxu0 }
 0x319   : > { %v2285_v14 = vpop.f32.mrf.mxu1  ;;  %v7864_v42 = vsel %vm3102_vm8, %v5218_v4, -1e+30 }
 0x31a   : > { %8948 = vst [vmem:[#allocation30_spill] sm:$0xff] %v7854_v26  ;;  %3246 = vmax.xlane.f32.xlu1 %v7859_v56  ;;  %3256 = vmax.xlane.f32.xlu0 %v7864_v42  ;;  %v2848_v40 = vpop.f32.mrf.mxu0  ;;  %v2575_v22 = vadd.f32 %v7586_v62, %v2285_v14 }
 0x31b   : > { %v2287_v33 = vpop.f32.mrf.mxu1  ;;  %v7873_v20 = vsel %vm3100_vm10, %v2848_v40, -1e+30 }
 0x31c   : > { %v5219_v24 = vpop.f32.mrf.mxu0 }
 0x31d   : > { %v2288_v1 = vpop.f32.mrf.mxu1  ;;  %v7878_v61 = vsel %vm3103_vm9, %v5219_v24, -1e+30 }
 0x31e   : > { %v2578_v17 = vadd.f32 %v7598_v15, %v2288_v1  ;;  %3252 = vmax.xlane.f32.xlu0 %v7873_v20  ;;  %3258 = vmax.xlane.f32.xlu1 %v7878_v61  ;;  %v2851_v28 = vpop.f32.mrf.mxu0 }
 0x31f   : > { %v2290_v8 = vpop.f32.mrf.mxu1  ;;  %v7887_v14 = vsel %vm3101_vm11, %v2851_v28, -1e+30 }
 0x320   : > { %v7882_v4 = vpack.c.bf16 %v2578_v17, %v2575_v22  ;;  %v5222_v62 = vpop.f32.mrf.mxu0 }
 0x321   : > { %v2293_v15 = vpop.f32.mrf.mxu1  ;;  %v7892_v40 = vsel %vm3106_vm12, %v5222_v62, -1e+30 }
 0x322   : > { %8949 = vst [vmem:[#allocation43_spill] sm:$0xff] %v7882_v4  ;;  %3254 = vmax.xlane.f32.xlu1 %v7887_v14  ;;  %3264 = vmax.xlane.f32.xlu0 %v7892_v40  ;;  %v2864_v33 = vpop.f32.mrf.mxu0  ;;  %v2583_v17 = vadd.f32 %v7583_v30, %v2293_v15 }
 0x323   : > { %v2295_v24 = vpop.f32.mrf.mxu1  ;;  %v7901_v28 = vsel %vm3104_vm14, %v2864_v33, -1e+30 }
 0x324   : > { %v5223_v1 = vpop.f32.mrf.mxu0 }
 0x325   : > { %v2296_v22 = vpop.f32.mrf.mxu1  ;;  %v7906_v62 = vsel %vm3107_vm13, %v5223_v1, -1e+30 }
 0x326   : > { %v2586_v8 = vadd.f32 %v7595_v55, %v2296_v22  ;;  %3260 = vmax.xlane.f32.xlu0 %v7901_v28  ;;  %3266 = vmax.xlane.f32.xlu1 %v7906_v62  ;;  %v2867_v24 = vpop.f32.mrf.mxu0 }
 0x327   : > { %v2298_v53 = vpop.f32.mrf.mxu1  ;;  %v7915_v55 = vsel %vm3105_vm15, %v2867_v24, -1e+30 }
 0x328   : > { %v7910_v6 = vpack.c.bf16 %v2586_v8, %v2583_v17 }
 0x329   : > { %v5242_v30 = vpop.f32.mrf.mxu1 }
 0x32a   : > { %8950 = vst [vmem:[#allocation32_spill] sm:$0xff] %v7910_v6  ;;  %v7920_v15 = vsel %vm3094_vm0, %v5242_v30, -1e+30  ;;  %5384 = vmatprep.subr.bf16.mxu0 %v7910_v6  ;;  %3262 = vmax.xlane.f32.xlu1 %v7915_v55 }
 0x32b   : > { %v2913_v33 = vpop.f32.mrf.mxu1  ;;  %3272 = vmax.xlane.f32.xlu0 %v7920_v15 }
 0x32c   : > { %v7928_v1 = vsel %vm3092_vm1, %v2913_v33, -1e+30 }
 0x32d   : > { %v5243_v53 = vpop.f32.mrf.mxu1 }
 0x32e   : > { %v7933_v22 = vsel %vm3095_vm2, %v5243_v53, -1e+30 }
 0x32f   : > { %v2916_v17 = vpop.f32.mrf.mxu1  ;;  %3268 = vmax.xlane.f32.xlu0 %v7928_v1  ;;  %3274 = vmax.xlane.f32.xlu1 %v7933_v22 }
 0x330   : > { %v7945_v30 = vsel %vm3093_vm3, %v2916_v17, -1e+30 }
 0x331   : > { %v5246_v8 = vpop.f32.mrf.mxu1 }
 0x332   : > { %v7940_v24 = vsel %vm3098_vm4, %v5246_v8, -1e+30 }
 0x333   : > { %v2929_v33 = vpop.f32.mrf.mxu1  ;;  %3280 = vmax.xlane.f32.xlu0 %v7940_v24  ;;  %3270 = vmax.xlane.f32.xlu1 %v7945_v30 }
 0x334   : > { %v7952_v9 = vsel %vm3096_vm6, %v2929_v33, -1e+30 }
 0x335   : > { %v5247_v53 = vpop.f32.mrf.mxu1 }
 0x336   : > { %v7957_v8 = vsel %vm3099_vm5, %v5247_v53, -1e+30 }
 0x337   : > { %v2932_v35 = vpop.f32.mrf.mxu1  ;;  %3276 = vmax.xlane.f32.xlu0 %v7952_v9  ;;  %3282 = vmax.xlane.f32.xlu1 %v7957_v8 }
 0x338   : > { %v7969_v33 = vsel %vm3097_vm7, %v2932_v35, -1e+30 }
 0x339   : > { %v5250_v17 = vpop.f32.mrf.mxu1  ;;  %8952 = vst [vmem:[#allocation33_spill] sm:$0xff] %v7969_v33 }
 0x33a   : > { %v7964_v0 = vsel %vm3102_vm8, %v5250_v17, -1e+30 }
 0x33b   : > { %8951 = vst [vmem:[#allocation47_spill] sm:$0xff] %v7964_v0  ;;  %v2945_v26 = vpop.f32.mrf.mxu1  ;;  %3288 = vmax.xlane.f32.xlu0 %v7964_v0  ;;  %3278 = vmax.xlane.f32.xlu1 %v7969_v33 }
 0x33c   : > { %v7976_v4 = vsel %vm3100_vm10, %v2945_v26, -1e+30 }
 0x33d   : > { %v5251_v53 = vpop.f32.mrf.mxu1  ;;  %8953 = vst [vmem:[#allocation50_spill] sm:$0xff] %v7976_v4 }
 0x33e   : > { %v7981_v17 = vsel %vm3103_vm9, %v5251_v53, -1e+30 }
 0x33f   : > { %8954 = vst [vmem:[#allocation44_spill] sm:$0xff] %v7981_v17  ;;  %v2948_v6 = vpop.f32.mrf.mxu1  ;;  %3284 = vmax.xlane.f32.xlu0 %v7976_v4  ;;  %3290 = vmax.xlane.f32.xlu1 %v7981_v17 }
 0x340   : > { %v7993_v26 = vsel %vm3101_vm11, %v2948_v6, -1e+30 }
 0x341   : > { %v5254_v35 = vpop.f32.mrf.mxu1  ;;  %8956 = vst [vmem:[#allocation35_spill] sm:$0xff] %v7993_v26 }
 0x342   : > { %v7988_v33 = vsel %vm3106_vm12, %v5254_v35, -1e+30 }
 0x343   : > { %8955 = vst [vmem:[#allocation42_spill] sm:$0xff] %v7988_v33  ;;  %v2961_v0 = vpop.f32.mrf.mxu1  ;;  %3296 = vmax.xlane.f32.xlu0 %v7988_v33  ;;  %3286 = vmax.xlane.f32.xlu1 %v7993_v26 }
 0x344   : > { %v8000_v17 = vsel %vm3104_vm14, %v2961_v0, -1e+30 }
 0x345   : > { %v5255_v53 = vpop.f32.mrf.mxu1  ;;  %8957 = vst [vmem:[#allocation36_spill] sm:$0xff] %v8000_v17 }
 0x346   : > { %v8005_v35 = vsel %vm3107_vm13, %v5255_v53, -1e+30 }
 0x347   : > { %8958 = vst [vmem:[#allocation48_spill] sm:$0xff] %v8005_v35  ;;  %v2964_v4 = vpop.f32.mrf.mxu1  ;;  %3292 = vmax.xlane.f32.xlu0 %v8000_v17  ;;  %3298 = vmax.xlane.f32.xlu1 %v8005_v35 }
 0x348   : > { %v8012_v6 = vsel %vm3105_vm15, %v2964_v4, -1e+30 }
 0x349   : > { %8959 = vst [vmem:[#allocation46_spill] sm:$0xff] %v8012_v6 }
 0x34b   : > { %3294 = vmax.xlane.f32.xlu1 %v8012_v6  ;;  %v5274_v26 = vpop.f32.mrf.mxu0 }
 0x34c   : > { %v8018_v0 = vsel %vm3094_vm0, %v5274_v26, -1e+30  ;;  %vm4456_vm0 = vcmask 519168  }
 0x34d   : > { %8960 = vst [vmem:[#allocation51_spill] sm:$0xff] %v8018_v0  ;;  %3304 = vmax.xlane.f32.xlu0 %v8018_v0  ;;  %v3010_v53 = vpop.f32.mrf.mxu0 }
 0x34e   : > { %v8024_v35 = vsel %vm3092_vm1, %v3010_v53, -1e+30 }
 0x34f   : > { %v5275_v33 = vpop.f32.mrf.mxu0  ;;  %8961 = vst [vmem:[#allocation49_spill] sm:$0xff] %v8024_v35 }
 0x350   : > { %v8029_v4 = vsel %vm3095_vm2, %v5275_v33, -1e+30 }
 0x351   : > { %8962 = vst [vmem:[#allocation53_spill] sm:$0xff] %v8029_v4  ;;  %3300 = vmax.xlane.f32.xlu0 %v8024_v35  ;;  %3306 = vmax.xlane.f32.xlu1 %v8029_v4  ;;  %v3013_v47 = vpop.f32.mrf.mxu0 }
 0x352   : > { %v8037_v2 = vsel %vm3093_vm3, %v3013_v47, -1e+30 }
 0x353   : > { %v3209_v26 = vpop.xlane.xlu1 %3208  ;;  %v5278_v6 = vpop.f32.mrf.mxu0 }
 0x354   : > { %v3334_v0 = vsub.f32 %v7617_v19, %v3209_v26  ;;  %v8042_v7 = vsel %vm3098_vm4, %v5278_v6, -1e+30 }
 0x355   : > { %v3205_v33 = vpop.xlane.xlu0 %3204  ;;  %3302 = vmax.xlane.f32.xlu1 %v8037_v2  ;;  %3312 = vmax.xlane.f32.xlu0 %v8042_v7  ;;  %v3026_v53 = vpop.f32.mrf.mxu0 }
 0x356   : > { %v3400_v4 = vmul.f32 1.442695, %v3334_v0  ;;  %v8050_v44 = vsel %vm3096_vm6, %v3026_v53, -1e+30  ;;  %v3332_v47 = vsub.f32 %v7625_v52, %v3205_v33 }
 0x357   : > { %v3211_v35 = vpop.xlane.xlu1 %3210  ;;  %v5279_v17 = vpop.f32.mrf.mxu0 }
 0x358   : > { %v3335_v19 = vsub.f32 %v7637_v5, %v3211_v35  ;;  %v8055_v32 = vsel %vm3099_vm5, %v5279_v17, -1e+30  ;;  %5712 = vpow2.f32 %v3400_v4  ;;  %v3396_v26 = vmul.f32 1.442695, %v3332_v47 }
 0x359   : > { %v3207_v6 = vpop.xlane.xlu0 %3206  ;;  %3308 = vmax.xlane.f32.xlu0 %v8050_v44  ;;  %3314 = vmax.xlane.f32.xlu1 %v8055_v32  ;;  %v3029_v0 = vpop.f32.mrf.mxu0 }
 0x35a   : > { %v3402_v5 = vmul.f32 1.442695, %v3335_v19  ;;  %v8063_v60 = vsel %vm3097_vm7, %v3029_v0, -1e+30  ;;  %v3333_v52 = vsub.f32 %v7648_v38, %v3207_v6 }
 0x35b   : > { %v5282_v35 = vpop.f32.mrf.mxu0 }
 0x35c   : > { %v8068_v21 = vsel %vm3102_vm8, %v5282_v35, -1e+30  ;;  %5714 = vpow2.f32 %v3402_v5  ;;  %v3398_v6 = vmul.f32 1.442695, %v3333_v52 }
 0x35d   : > { %v3217_v17 = vpop.xlane.xlu0 %3216  ;;  %3310 = vmax.xlane.f32.xlu1 %v8063_v60  ;;  %3320 = vmax.xlane.f32.xlu0 %v8068_v21  ;;  %v3042_v4 = vpop.f32.mrf.mxu0  ;;  %5716 = vpow2.f32 %v3396_v26 }
 0x35e   : > { %v3338_v33 = vsub.f32 %v7665_v49, %v3217_v17  ;;  %v8077_v36 = vsel %vm3100_vm10, %v3042_v4, -1e+30  ;;  %5718 = vpow2.f32 %v3398_v6 }
 0x35f   : > { %v3219_v50 = vpop.xlane.xlu1 %3218  ;;  %v5283_v53 = vpop.f32.mrf.mxu0 }
 0x360   : > { %v8082_v19 = vsel %vm3103_vm9, %v5283_v53, -1e+30  ;;  %v3339_v49 = vsub.f32 %v7677_v10, %v3219_v50  ;;  %v3408_v47 = vmul.f32 1.442695, %v3338_v33 }
 0x361   : > { %v3213_v0 = vpop.xlane.xlu0 %3212  ;;  %3316 = vmax.xlane.f32.xlu0 %v8077_v36  ;;  %3322 = vmax.xlane.f32.xlu1 %v8082_v19  ;;  %v3045_v38 = vpop.f32.mrf.mxu0 }
 0x362   : > { %v3336_v12 = vsub.f32 %v7690_v48, %v3213_v0  ;;  %v8091_v46 = vsel %vm3101_vm11, %v3045_v38, -1e+30  ;;  %v3410_v48 = vmul.f32 1.442695, %v3339_v49  ;;  %5720 = vpow2.f32 %v3408_v47 }
 0x363   : > { %v3215_v5 = vpop.xlane.xlu1 %3214  ;;  %v5286_v35 = vpop.f32.mrf.mxu0 }
 0x364   : > { %v8096_v17 = vsel %vm3106_vm12, %v5286_v35, -1e+30  ;;  %v3337_v52 = vsub.f32 %v7702_v34, %v3215_v5  ;;  %v3404_v26 = vmul.f32 1.442695, %v3336_v12  ;;  %5722 = vpow2.f32 %v3410_v48 }
 0x365   : > { %v3225_v4 = vpop.xlane.xlu0 %3224  ;;  %3318 = vmax.xlane.f32.xlu1 %v8091_v46  ;;  %3328 = vmax.xlane.f32.xlu0 %v8096_v17  ;;  %v3058_v10 = vpop.f32.mrf.mxu0 }
 0x366   : > { %v3342_v41 = vsub.f32 %v7713_v51, %v3225_v4  ;;  %v8102_v53 = vpop.eup %5712  ;;  %v3406_v34 = vmul.f32 1.442695, %v3337_v52  ;;  %5724 = vpow2.f32 %v3404_v26  ;;  %v8118_v25 = vsel %vm3104_vm14, %v3058_v10, -1e+30 }
 0x367   : > { %v3227_v33 = vpop.xlane.xlu1 %3226  ;;  %v5287_v50 = vpop.f32.mrf.mxu0 }
 0x368   : > { %v8107_v45 = vsel %vm3107_vm13, %v5287_v50, -1e+30  ;;  %v3343_v38 = vsub.f32 %v7725_v31, %v3227_v33  ;;  %v3416_v51 = vmul.f32 1.442695, %v3342_v41  ;;  %5726 = vpow2.f32 %v3406_v34 }
 0x369   : > { %v3221_v0 = vpop.xlane.xlu0 %3220  ;;  %3528 = vadd.xlane.f32.xlu0 %v8102_v53  ;;  %3330 = vmax.xlane.f32.xlu1 %v8107_v45  ;;  %v8113_v47 = vpop.eup %5714 }
 0x36a   : > { %v3340_v6 = vsub.f32 %v7738_v13, %v3221_v0  ;;  %v3061_v5 = vpop.f32.mrf.mxu0  ;;  %v3418_v31 = vmul.f32 1.442695, %v3343_v38  ;;  %5728 = vpow2.f32 %v3416_v51  ;;  %v8124_v52 = vpop.eup %5716 }
 0x36b   : > { %v3223_v49 = vpop.xlane.xlu1 %3222  ;;  %v8129_v18 = vsel %vm3105_vm15, %v3061_v5, -1e+30  ;;  %v8134_v41 = vpop.eup %5718 }
 0x36c   : > { %v3341_v35 = vsub.f32 %v7749_v39, %v3223_v49  ;;  %v3412_v13 = vmul.f32 1.442695, %v3340_v6  ;;  %5730 = vpow2.f32 %v3418_v31 }
 0x36d   : > { %v3233_v12 = vpop.xlane.xlu0 %3232  ;;  %3324 = vmax.xlane.f32.xlu0 %v8118_v25  ;;  %3530 = vadd.xlane.f32.xlu1 %v8113_v47 }
 0x36e   : > { %v3346_v4 = vsub.f32 %v7760_v58, %v3233_v12  ;;  %v3414_v26 = vmul.f32 1.442695, %v3341_v35  ;;  %5732 = vpow2.f32 %v3412_v13 }
 0x36f   : > { %v3235_v48 = vpop.xlane.xlu1 %3234  ;;  %v8137_v50 = vpop.eup %5720 }
 0x370   : > { %v3347_v39 = vsub.f32 %v7770_v57, %v3235_v48  ;;  %v3424_v58 = vmul.f32 1.442695, %v3346_v4  ;;  %5734 = vpow2.f32 %v3414_v26 }
 0x371   : > { %v3229_v10 = vpop.xlane.xlu0 %3228  ;;  %3524 = vadd.xlane.f32.xlu0 %v8124_v52  ;;  %3326 = vmax.xlane.f32.xlu1 %v8129_v18  ;;  %v8141_v0 = vpop.eup %5722 }
 0x372   : > { %v3344_v33 = vsub.f32 %v7780_v59, %v3229_v10  ;;  %v3426_v29 = vmul.f32 1.442695, %v3347_v39  ;;  %5736 = vpow2.f32 %v3424_v58 }
 0x373   : > { %v3231_v43 = vpop.xlane.xlu1 %3230  ;;  %v8144_v38 = vpop.eup %5724 }
 0x374   : > { %v3420_v34 = vmul.f32 1.442695, %v3344_v33  ;;  %v3345_v57 = vsub.f32 %v7787_v63, %v3231_v43  ;;  %5738 = vpow2.f32 %v3426_v29 }
 0x375   : > { %3536 = vadd.xlane.f32.xlu0 %v8137_v50  ;;  %3526 = vadd.xlane.f32.xlu1 %v8134_v41  ;;  %v8148_v59 = vpop.eup %5726 }
 0x376   : > { %5740 = vpow2.f32 %v3420_v34  ;;  %v3422_v51 = vmul.f32 1.442695, %v3345_v57 }
 0x377   : > { %v8150_v6 = vpop.eup %5728 }
 0x378   : > { %5742 = vpow2.f32 %v3422_v51 }
 0x379   : > { %3532 = vadd.xlane.f32.xlu0 %v8144_v38  ;;  %3538 = vadd.xlane.f32.xlu1 %v8141_v0  ;;  %v8154_v49 = vpop.eup %5730 }
 0x37b   : > { %v8156_v63 = vpop.eup %5732 }
 0x37d   : > { %3544 = vadd.xlane.f32.xlu0 %v8150_v6  ;;  %3534 = vadd.xlane.f32.xlu1 %v8148_v59  ;;  %v8160_v12 = vpop.eup %5734 }
 0x37f   : > { %v8162_v5 = vpop.eup %5736 }
 0x380   : > { %8963 = vst [vmem:[#allocation52_spill] sm:$0xff] %v8162_v5 }
 0x381   : > { %3540 = vadd.xlane.f32.xlu0 %v8156_v63  ;;  %3546 = vadd.xlane.f32.xlu1 %v8154_v49  ;;  %v8166_v31 = vpop.eup %5738 }
 0x382   : > { %8964 = vst [vmem:[#allocation55_spill] sm:$0xff] %v8166_v31 }
 0x383   : > { %v8168_v35 = vpop.eup %5740 }
 0x385   : > { %3552 = vadd.xlane.f32.xlu0 %v8162_v5  ;;  %3542 = vadd.xlane.f32.xlu1 %v8160_v12  ;;  %v8172_v13 = vpop.eup %5742 }
 0x389   : > { %3548 = vadd.xlane.f32.xlu0 %v8168_v35  ;;  %3554 = vadd.xlane.f32.xlu1 %v8166_v31 }
 0x38d   : > { %3550 = vadd.xlane.f32.xlu1 %v8172_v13 }
 0x393   : > { %v3241_v4 = vpop.xlane.xlu0 %3240 }
 0x394   : > { %v3350_v48 = vsub.f32 %v7809_v3, %v3241_v4 }
 0x396   : > { %v3432_v10 = vmul.f32 1.442695, %v3350_v48 }
 0x397   : > { %v3237_v26 = vpop.xlane.xlu0 %3236  ;;  %v3243_v39 = vpop.xlane.xlu1 %3242 }
 0x398   : > { %5744 = vpow2.f32 %v3432_v10  ;;  %v3348_v58 = vsub.f32 %v7817_v37, %v3237_v26  ;;  %v3351_v33 = vsub.f32 %v7822_v23, %v3243_v39 }
 0x39a   : > { %v3428_v43 = vmul.f32 1.442695, %v3348_v58  ;;  %v3434_v29 = vmul.f32 1.442695, %v3351_v33 }
 0x39b   : > { %v3239_v34 = vpop.xlane.xlu1 %3238  ;;  %v3249_v57 = vpop.xlane.xlu0 %3248 }
 0x39c   : > { %5746 = vpow2.f32 %v3428_v43  ;;  %v3349_v51 = vsub.f32 %v7831_v11, %v3239_v34  ;;  %v3354_v5 = vsub.f32 %v7836_v54, %v3249_v57 }
 0x39d   : > { %5748 = vpow2.f32 %v3434_v29 }
 0x39e   : > { %v3430_v31 = vmul.f32 1.442695, %v3349_v51  ;;  %v3440_v3 = vmul.f32 1.442695, %v3354_v5 }
 0x39f   : > { %v3245_v4 = vpop.xlane.xlu0 %3244  ;;  %v3251_v48 = vpop.xlane.xlu1 %3250 }
 0x3a0   : > { %5750 = vpow2.f32 %v3430_v31  ;;  %v3352_v10 = vsub.f32 %v7845_v16, %v3245_v4  ;;  %v3355_v37 = vsub.f32 %v7850_v27, %v3251_v48 }
 0x3a1   : > { %5752 = vpow2.f32 %v3440_v3 }
 0x3a2   : > { %v3436_v23 = vmul.f32 1.442695, %v3352_v10  ;;  %v3442_v26 = vmul.f32 1.442695, %v3355_v37 }
 0x3a3   : > { %v3247_v39 = vpop.xlane.xlu1 %3246  ;;  %v3257_v58 = vpop.xlane.xlu0 %3256 }
 0x3a4   : > { %5754 = vpow2.f32 %v3436_v23  ;;  %v3353_v11 = vsub.f32 %v7859_v56, %v3247_v39  ;;  %v3358_v54 = vsub.f32 %v7864_v42, %v3257_v58 }
 0x3a5   : > { %v8184_v33 = vpop.eup %5744  ;;  %5756 = vpow2.f32 %v3442_v26 }
 0x3a6   : > { %v3438_v5 = vmul.f32 1.442695, %v3353_v11  ;;  %v3448_v43 = vmul.f32 1.442695, %v3358_v54  ;;  %3560 = vadd.xlane.f32.xlu0 %v8184_v33 }
 0x3a7   : > { %v3253_v16 = vpop.xlane.xlu0 %3252  ;;  %v3259_v31 = vpop.xlane.xlu1 %3258 }
 0x3a8   : > { %5758 = vpow2.f32 %v3438_v5  ;;  %v3356_v27 = vsub.f32 %v7873_v20, %v3253_v16  ;;  %v3359_v29 = vsub.f32 %v7878_v61, %v3259_v31 }
 0x3a9   : > { %v8189_v34 = vpop.eup %5746  ;;  %5760 = vpow2.f32 %v3448_v43 }
 0x3aa   : > { %v8191_v56 = vpop.eup %5748  ;;  %v3444_v42 = vmul.f32 1.442695, %v3356_v27  ;;  %v3450_v57 = vmul.f32 1.442695, %v3359_v29  ;;  %3556 = vadd.xlane.f32.xlu0 %v8189_v34 }
 0x3ab   : > { %3562 = vadd.xlane.f32.xlu1 %v8191_v56  ;;  %v3255_v51 = vpop.xlane.xlu1 %3254  ;;  %v3265_v3 = vpop.xlane.xlu0 %3264 }
 0x3ac   : > { %5762 = vpow2.f32 %v3444_v42  ;;  %v3357_v4 = vsub.f32 %v7887_v14, %v3255_v51  ;;  %v3362_v20 = vsub.f32 %v7892_v40, %v3265_v3 }
 0x3ad   : > { %v8197_v48 = vpop.eup %5750  ;;  %5764 = vpow2.f32 %v3450_v57 }
 0x3ae   : > { %v8199_v61 = vpop.eup %5752  ;;  %v3446_v10 = vmul.f32 1.442695, %v3357_v4  ;;  %v3456_v37 = vmul.f32 1.442695, %v3362_v20 }
 0x3af   : > { %3568 = vadd.xlane.f32.xlu0 %v8199_v61  ;;  %3558 = vadd.xlane.f32.xlu1 %v8197_v48  ;;  %v3261_v23 = vpop.xlane.xlu0 %3260  ;;  %v3267_v26 = vpop.xlane.xlu1 %3266 }
 0x3b0   : > { %5766 = vpow2.f32 %v3446_v10  ;;  %v3360_v39 = vsub.f32 %v7901_v28, %v3261_v23  ;;  %v3363_v14 = vsub.f32 %v7906_v62, %v3267_v26 }
 0x3b1   : > { %v8205_v58 = vpop.eup %5754  ;;  %5768 = vpow2.f32 %v3456_v37 }
 0x3b2   : > { %v8207_v40 = vpop.eup %5756  ;;  %v3452_v11 = vmul.f32 1.442695, %v3360_v39  ;;  %v3458_v54 = vmul.f32 1.442695, %v3363_v14 }
 0x3b3   : > { %3564 = vadd.xlane.f32.xlu0 %v8205_v58  ;;  %3570 = vadd.xlane.f32.xlu1 %v8207_v40  ;;  %v3263_v5 = vpop.xlane.xlu1 %3262 }
 0x3b4   : > { %v3273_v43 = vpop.xlane.xlu0 %3272  ;;  %5770 = vpow2.f32 %v3452_v11  ;;  %v3361_v16 = vsub.f32 %v7915_v55, %v3263_v5 }
 0x3b5   : > { %v3366_v28 = vsub.f32 %v7920_v15, %v3273_v43  ;;  %v8213_v31 = vpop.eup %5758  ;;  %5772 = vpow2.f32 %v3458_v54 }
 0x3b6   : > { %v8215_v62 = vpop.eup %5760  ;;  %v3454_v27 = vmul.f32 1.442695, %v3361_v16 }
 0x3b7   : > { %v3464_v29 = vmul.f32 1.442695, %v3366_v28  ;;  %3576 = vadd.xlane.f32.xlu0 %v8215_v62  ;;  %3566 = vadd.xlane.f32.xlu1 %v8213_v31 }
 0x3b8   : > { %v3269_v42 = vpop.xlane.xlu0 %3268  ;;  %v3275_v57 = vpop.xlane.xlu1 %3274  ;;  %5774 = vpow2.f32 %v3454_v27 }
 0x3b9   : > { %v3364_v51 = vsub.f32 %v7928_v1, %v3269_v42  ;;  %v3367_v55 = vsub.f32 %v7933_v22, %v3275_v57  ;;  %v8221_v3 = vpop.eup %5762  ;;  %5776 = vpow2.f32 %v3464_v29  ;;  %v8965_v42 = vld [vmem:[#allocation47_spill] sm:$0xff] }
 0x3ba   : > { %v8223_v15 = vpop.eup %5764 }
 0x3bb   : > { %v3460_v4 = vmul.f32 1.442695, %v3364_v51  ;;  %v3466_v20 = vmul.f32 1.442695, %v3367_v55  ;;  %3572 = vadd.xlane.f32.xlu0 %v8221_v3  ;;  %3578 = vadd.xlane.f32.xlu1 %v8223_v15  ;;  %v8966_v51 = vld [vmem:[#allocation33_spill] sm:$0xff] }
 0x3bc   : > { %v3281_v10 = vpop.xlane.xlu0 %3280  ;;  %v3271_v37 = vpop.xlane.xlu1 %3270 }
 0x3bd   : > { %5778 = vpow2.f32 %v3460_v4  ;;  %v3370_v23 = vsub.f32 %v7940_v24, %v3281_v10  ;;  %v3365_v1 = vsub.f32 %v7945_v30, %v3271_v37  ;;  %v8229_v26 = vpop.eup %5766 }
 0x3be   : > { %5780 = vpow2.f32 %v3466_v20  ;;  %v8231_v22 = vpop.eup %5768 }
 0x3bf   : > { %v3472_v39 = vmul.f32 1.442695, %v3370_v23  ;;  %v3462_v14 = vmul.f32 1.442695, %v3365_v1  ;;  %3584 = vadd.xlane.f32.xlu0 %v8231_v22  ;;  %3574 = vadd.xlane.f32.xlu1 %v8229_v26  ;;  %v8967_v23 = vld [vmem:[#allocation50_spill] sm:$0xff] }
 0x3c0   : > { %v3277_v11 = vpop.xlane.xlu0 %3276  ;;  %v3283_v54 = vpop.xlane.xlu1 %3282 }
 0x3c1   : > { %5782 = vpow2.f32 %v3472_v39  ;;  %v3368_v5 = vsub.f32 %v7952_v9, %v3277_v11  ;;  %v3371_v24 = vsub.f32 %v7957_v8, %v3283_v54  ;;  %v8237_v43 = vpop.eup %5770  ;;  %v8968_v39 = vld [vmem:[#allocation44_spill] sm:$0xff] }
 0x3c2   : > { %5784 = vpow2.f32 %v3462_v14  ;;  %v8239_v30 = vpop.eup %5772 }
 0x3c3   : > { %v3468_v16 = vmul.f32 1.442695, %v3368_v5  ;;  %v3474_v28 = vmul.f32 1.442695, %v3371_v24  ;;  %3580 = vadd.xlane.f32.xlu0 %v8237_v43  ;;  %3586 = vadd.xlane.f32.xlu1 %v8239_v30 }
 0x3c4   : > { %v3289_v27 = vpop.xlane.xlu0 %3288  ;;  %v3279_v29 = vpop.xlane.xlu1 %3278 }
 0x3c5   : > { %5786 = vpow2.f32 %v3468_v16  ;;  %v3374_v57 = vsub.f32 %v8965_v42, %v3289_v27  ;;  %v3369_v9 = vsub.f32 %v8966_v51, %v3279_v29  ;;  %v8245_v55 = vpop.eup %5774  ;;  %v8969_v27 = vld [vmem:[#allocation42_spill] sm:$0xff]  ;;  %v8970_v42 = vld [vmem:[#allocation35_spill] sm:$0xff] }
 0x3c6   : > { %5788 = vpow2.f32 %v3474_v28  ;;  %v8247_v8 = vpop.eup %5776 }
 0x3c7   : > { %v3480_v4 = vmul.f32 1.442695, %v3374_v57  ;;  %v3470_v20 = vmul.f32 1.442695, %v3369_v9  ;;  %3582 = vadd.xlane.f32.xlu1 %v8245_v55  ;;  %3592 = vadd.xlane.f32.xlu0 %v8247_v8 }
 0x3c8   : > { %v3285_v10 = vpop.xlane.xlu0 %3284  ;;  %v3291_v37 = vpop.xlane.xlu1 %3290 }
 0x3c9   : > { %5790 = vpow2.f32 %v3480_v4  ;;  %v3372_v1 = vsub.f32 %v8967_v23, %v3285_v10  ;;  %v3375_v14 = vsub.f32 %v8968_v39, %v3291_v37  ;;  %v8972_v23 = vld [vmem:[#allocation36_spill] sm:$0xff] }
 0x3ca   : > { %v8253_v11 = vpop.eup %5778  ;;  %5792 = vpow2.f32 %v3470_v20  ;;  %v8973_v39 = vld [vmem:[#allocation48_spill] sm:$0xff] }
 0x3cb   : > { %v8255_v54 = vpop.eup %5780  ;;  %v3476_v5 = vmul.f32 1.442695, %v3372_v1  ;;  %v3482_v24 = vmul.f32 1.442695, %v3375_v14  ;;  %3588 = vadd.xlane.f32.xlu0 %v8253_v11 }
 0x3cc   : > { %3594 = vadd.xlane.f32.xlu1 %v8255_v54  ;;  %v3297_v16 = vpop.xlane.xlu0 %3296  ;;  %v3287_v28 = vpop.xlane.xlu1 %3286 }
 0x3cd   : > { %5794 = vpow2.f32 %v3476_v5  ;;  %v3378_v29 = vsub.f32 %v8969_v27, %v3297_v16  ;;  %v3373_v57 = vsub.f32 %v8970_v42, %v3287_v28 }
 0x3ce   : > { %v8261_v51 = vpop.eup %5782  ;;  %5796 = vpow2.f32 %v3482_v24 }
 0x3cf   : > { %8971 = vst [vmem:[#allocation54_spill] sm:$0xff] %v8261_v51  ;;  %v8263_v9 = vpop.eup %5784  ;;  %v3488_v4 = vmul.f32 1.442695, %v3378_v29  ;;  %v3478_v20 = vmul.f32 1.442695, %v3373_v57  ;;  %3600 = vadd.xlane.f32.xlu0 %v8261_v51  ;;  %v8975_v29 = vld [vmem:[#allocation46_spill] sm:$0xff] }
 0x3d0   : > { %3590 = vadd.xlane.f32.xlu1 %v8263_v9  ;;  %v3293_v10 = vpop.xlane.xlu0 %3292  ;;  %v3299_v37 = vpop.xlane.xlu1 %3298  ;;  %v8980_v51 = vld [vmem:[#allocation53_spill] sm:$0xff] }
 0x3d1   : > { %5798 = vpow2.f32 %v3488_v4  ;;  %v3376_v1 = vsub.f32 %v8972_v23, %v3293_v10  ;;  %v3379_v14 = vsub.f32 %v8973_v39, %v3299_v37 }
 0x3d2   : > { %v8269_v5 = vpop.eup %5786  ;;  %5800 = vpow2.f32 %v3478_v20  ;;  %v8978_v20 = vld [vmem:[#allocation51_spill] sm:$0xff] }
 0x3d3   : > { %8974 = vst [vmem:[#allocation57_spill] sm:$0xff] %v8269_v5  ;;  %v8271_v16 = vpop.eup %5788  ;;  %v3484_v24 = vmul.f32 1.442695, %v3376_v1  ;;  %v3490_v28 = vmul.f32 1.442695, %v3379_v14  ;;  %3596 = vadd.xlane.f32.xlu0 %v8269_v5 }
 0x3d4   : > { %3602 = vadd.xlane.f32.xlu1 %v8271_v16  ;;  %v3295_v27 = vpop.xlane.xlu1 %3294 }
 0x3d5   : > { %5802 = vpow2.f32 %v3484_v24  ;;  %v3377_v42 = vsub.f32 %v8975_v29, %v3295_v27 }
 0x3d6   : > { %v8276_v57 = vpop.eup %5790  ;;  %5804 = vpow2.f32 %v3490_v28  ;;  %v3305_v37 = vpop.xlane.xlu0 %3304  ;;  %v8979_v28 = vld [vmem:[#allocation49_spill] sm:$0xff] }
 0x3d7   : > { %8976 = vst [vmem:[#allocation56_spill] sm:$0xff] %v8276_v57  ;;  %v8278_v4 = vpop.eup %5792  ;;  %v3486_v10 = vmul.f32 1.442695, %v3377_v42  ;;  %v3382_v23 = vsub.f32 %v8978_v20, %v3305_v37  ;;  %3608 = vadd.xlane.f32.xlu0 %v8276_v57 }
 0x3d8   : > { %8977 = vst [vmem:[#allocation59_spill] sm:$0xff] %v8278_v4  ;;  %3598 = vadd.xlane.f32.xlu1 %v8278_v4 }
 0x3d9   : > { %5806 = vpow2.f32 %v3486_v10  ;;  %v3496_v39 = vmul.f32 1.442695, %v3382_v23 }
 0x3da   : > { %v8283_v1 = vpop.eup %5794  ;;  %v3301_v24 = vpop.xlane.xlu0 %3300 }
 0x3db   : > { %v8285_v14 = vpop.eup %5796  ;;  %v3307_v27 = vpop.xlane.xlu1 %3306  ;;  %5808 = vpow2.f32 %v3496_v39  ;;  %v3380_v29 = vsub.f32 %v8979_v28, %v3301_v24  ;;  %3604 = vadd.xlane.f32.xlu0 %v8283_v1 }
 0x3dc   : > { %v3383_v42 = vsub.f32 %v8980_v51, %v3307_v27  ;;  %3610 = vadd.xlane.f32.xlu1 %v8285_v14 }
 0x3dd   : > { %v3492_v20 = vmul.f32 1.442695, %v3380_v29 }
 0x3de   : > { %v8291_v37 = vpop.eup %5798  ;;  %v3498_v10 = vmul.f32 1.442695, %v3383_v42  ;;  %v3313_v4 = vpop.xlane.xlu0 %3312 }
 0x3df   : > { %8981 = vst [vmem:[#allocation58_spill] sm:$0xff] %v8291_v37  ;;  %v8293_v57 = vpop.eup %5800  ;;  %v3303_v23 = vpop.xlane.xlu1 %3302  ;;  %5810 = vpow2.f32 %v3492_v20  ;;  %3616 = vadd.xlane.f32.xlu0 %v8291_v37 }
 0x3e0   : > { %v3381_v5 = vsub.f32 %v8037_v2, %v3303_v23  ;;  %3606 = vadd.xlane.f32.xlu1 %v8293_v57  ;;  %5812 = vpow2.f32 %v3498_v10 }
 0x3e2   : > { %v8298_v51 = vpop.eup %5802  ;;  %v3494_v39 = vmul.f32 1.442695, %v3381_v5  ;;  %v3309_v27 = vpop.xlane.xlu0 %3308 }
 0x3e3   : > { %8982 = vst [vmem:[#allocation61_spill] sm:$0xff] %v8298_v51  ;;  %v8300_v24 = vpop.eup %5804  ;;  %v3315_v28 = vpop.xlane.xlu1 %3314  ;;  %v3384_v29 = vsub.f32 %v8050_v44, %v3309_v27  ;;  %3612 = vadd.xlane.f32.xlu0 %v8298_v51 }
 0x3e4   : > { %8983 = vst [vmem:[#allocation60_spill] sm:$0xff] %v8300_v24  ;;  %5814 = vpow2.f32 %v3494_v39  ;;  %3618 = vadd.xlane.f32.xlu1 %v8300_v24 }
 0x3e5   : > { %v3500_v42 = vmul.f32 1.442695, %v3384_v29 }
 0x3e6   : > { %v8305_v2 = vpop.eup %5806  ;;  %v3321_v23 = vpop.xlane.xlu0 %3320 }
 0x3e7   : > { %v3311_v20 = vpop.xlane.xlu1 %3310  ;;  %5816 = vpow2.f32 %v3500_v42  ;;  %v3390_v5 = vsub.f32 %v8068_v21, %v3321_v23 }
 0x3e8   : > { %v3385_v10 = vsub.f32 %v8063_v60, %v3311_v20  ;;  %3614 = vadd.xlane.f32.xlu1 %v8305_v2  ;;  %v8310_v37 = vpop.eup %5808  ;;  %v3386_v60 = vsub.f32 %v8042_v7, %v3313_v4 }
 0x3e9   : > { %v3512_v44 = vmul.f32 1.442695, %v3390_v5  ;;  %3624 = vadd.xlane.f32.xlu0 %v8310_v37 }
 0x3ea   : > { %v3502_v39 = vmul.f32 1.442695, %v3385_v10  ;;  %v3317_v27 = vpop.xlane.xlu0 %3316 }
 0x3eb   : > { %v3323_v24 = vpop.xlane.xlu1 %3322  ;;  %v3388_v29 = vsub.f32 %v8077_v36, %v3317_v27 }
 0x3ec   : > { %5818 = vpow2.f32 %v3502_v39  ;;  %v3391_v51 = vsub.f32 %v8082_v19, %v3323_v24  ;;  %v8315_v42 = vpop.eup %5810  ;;  %v3504_v19 = vmul.f32 1.442695, %v3386_v60  ;;  %v3387_v24 = vsub.f32 %v8055_v32, %v3315_v28 }
 0x3ed   : > { %5820 = vpow2.f32 %v3512_v44  ;;  %v8318_v21 = vpop.eup %5812  ;;  %v3508_v20 = vmul.f32 1.442695, %v3388_v29  ;;  %3620 = vadd.xlane.f32.xlu0 %v8315_v42 }
 0x3ee   : > { %v3514_v23 = vmul.f32 1.442695, %v3391_v51  ;;  %3626 = vadd.xlane.f32.xlu1 %v8318_v21  ;;  %v3329_v5 = vpop.xlane.xlu0 %3328  ;;  %v3506_v27 = vmul.f32 1.442695, %v3387_v24 }
 0x3ef   : > { %v3319_v10 = vpop.xlane.xlu1 %3318  ;;  %5822 = vpow2.f32 %v3508_v20  ;;  %v3394_v29 = vsub.f32 %v8096_v17, %v3329_v5 }
 0x3f0   : > { %v3389_v36 = vsub.f32 %v8091_v46, %v3319_v10  ;;  %5824 = vpow2.f32 %v3514_v23 }
 0x3f1   : > { %v8323_v39 = vpop.eup %5814  ;;  %v3520_v28 = vmul.f32 1.442695, %v3394_v29 }
 0x3f2   : > { %v3510_v7 = vmul.f32 1.442695, %v3389_v36  ;;  %3622 = vadd.xlane.f32.xlu1 %v8323_v39  ;;  %v3529_v4 = vpop.xlane.xlu0 %3528 }
 0x3f3   : > { %v3331_v51 = vpop.xlane.xlu1 %3330 }
 0x3f4   : > { %5826 = vpow2.f32 %v3510_v7  ;;  %v8327_v44 = vpop.eup %5816  ;;  %v3395_v17 = vsub.f32 %v8107_v45, %v3331_v51 }
 0x3f5   : > { %5828 = vpow2.f32 %v3504_v19  ;;  %3628 = vadd.xlane.f32.xlu0 %v8327_v44 }
 0x3f6   : > { %v3325_v46 = vpop.xlane.xlu0 %3324  ;;  %5830 = vpow2.f32 %v3506_v27 }
 0x3f7   : > { %v3531_v20 = vpop.xlane.xlu1 %3530  ;;  %v3392_v60 = vsub.f32 %v8118_v25, %v3325_v46  ;;  %v3522_v46 = vmul.f32 1.442695, %v3395_v17 }
 0x3f9   : > { %v8332_v32 = vpop.eup %5818  ;;  %v3516_v10 = vmul.f32 1.442695, %v3392_v60 }
 0x3fa   : > { %v8334_v23 = vpop.eup %5820  ;;  %3630 = vadd.xlane.f32.xlu1 %v8332_v32  ;;  %v3525_v36 = vpop.xlane.xlu0 %3524 }
 0x3fb   : > { %8984 = vst [vmem:[#allocation63_spill] sm:$0xff] %v8334_v23  ;;  %3640 = vadd.xlane.f32.xlu0 %v8334_v23  ;;  %v3327_v19 = vpop.xlane.xlu1 %3326  ;;  %5832 = vpow2.f32 %v3516_v10 }
 0x3fc   : > { %v3393_v5 = vsub.f32 %v8129_v18, %v3327_v19  ;;  %v8340_v24 = vpop.eup %5822  ;;  %5834 = vpow2.f32 %v3520_v28 }
 0x3fd   : > { %v8342_v25 = vpop.eup %5824  ;;  %5836 = vrcp.f32 %v3531_v20 }
 0x3fe   : > { %v3518_v7 = vmul.f32 1.442695, %v3393_v5  ;;  %5838 = vrcp.f32 %v3525_v36  ;;  %3642 = vadd.xlane.f32.xlu1 %v8342_v25  ;;  %v3537_v27 = vpop.xlane.xlu0 %3536 }
 0x3ff   : > { %3636 = vadd.xlane.f32.xlu0 %v8340_v24  ;;  %v3527_v29 = vpop.xlane.xlu1 %3526 }
 0x400   : > { %5840 = vpow2.f32 %v3518_v7 }
 0x401   : > { %v8346_v45 = vpop.eup %5826  ;;  %5842 = vrcp.f32 %v3529_v4 }
 0x402   : > { %8985 = vst [vmem:[#allocation62_spill] sm:$0xff] %v8346_v45  ;;  %v8348_v18 = vpop.eup %5828  ;;  %5844 = vrcp.f32 %v3527_v29  ;;  %3638 = vadd.xlane.f32.xlu1 %v8346_v45  ;;  %v3533_v51 = vpop.xlane.xlu0 %3532 }
 0x403   : > { %8986 = vst [vmem:[#allocation8_spill] sm:$0xff] %v8348_v18  ;;  %3632 = vadd.xlane.f32.xlu0 %v8348_v18  ;;  %v3539_v20 = vpop.xlane.xlu1 %3538  ;;  %5846 = vpow2.f32 %v3522_v46  ;;  %v8352_v60 = vpop.eup %5830 }
 0x404   : > { %8987 = vst [vmem:[#allocation64_spill] sm:$0xff] %v8352_v60  ;;  %5848 = vrcp.f32 %v3533_v51 }
 0x405   : > { %5850 = vrcp.f32 %v3539_v20 }
 0x406   : > { %3634 = vadd.xlane.f32.xlu1 %v8352_v60  ;;  %v3545_v28 = vpop.xlane.xlu0 %3544  ;;  %5852 = vrcp.f32 %v3537_v27 }
 0x407   : > { %v3535_v10 = vpop.xlane.xlu1 %3534 }
 0x408   : > { %v8355_v4 = vpop.eup %5832  ;;  %5854 = vrcp.f32 %v3535_v10 }
 0x409   : > { %8988 = vst [vmem:[#allocation9_spill] sm:$0xff] %v8355_v4  ;;  %v8357_v36 = vpop.eup %5834  ;;  %3644 = vadd.xlane.f32.xlu0 %v8355_v4 }
 0x40a   : > { %8989 = vst [vmem:[#allocation45_spill] sm:$0xff] %v8357_v36  ;;  %v5837_v19 = vpop.eup %5836  ;;  %v3541_v17 = vpop.xlane.xlu0 %3540 }
 0x40b   : > { %v3547_v5 = vpop.xlane.xlu1 %3546  ;;  %v5839_v7 = vpop.eup %5838  ;;  %5856 = vrcp.f32 %v3541_v17  ;;  %v3719_v51 = vmul.f32 %v5837_v19, %v8113_v47 }
 0x40c   : > { %5858 = vrcp.f32 %v3547_v5  ;;  %v3716_v4 = vmul.f32 %v5839_v7, %v8124_v52  ;;  %v8991_v52 = vld [vmem:[#allocation26_spill] sm:$0xff] }
 0x40d   : > { %v8360_v29 = vpop.eup %5840  ;;  %3648 = vadd.xlane.f32.xlu0 %v8357_v36  ;;  %5860 = vrcp.f32 %v3545_v28 }
 0x40e   : > { %8990 = vst [vmem:[#allocation11_spill] sm:$0xff] %v8360_v29  ;;  %v5843_v46 = vpop.eup %5842  ;;  %3646 = vadd.xlane.f32.xlu1 %v8360_v29  ;;  %v3553_v20 = vpop.xlane.xlu0 %3552 }
 0x40f   : > { %v5845_v27 = vpop.eup %5844  ;;  %v3543_v10 = vpop.xlane.xlu1 %3542  ;;  %v3718_v23 = vmul.f32 %v5843_v46, %v8102_v53 }
 0x410   : > { %v3717_v60 = vmul.f32 %v5845_v27, %v8134_v41  ;;  %v8367_v18 = vpop.eup %5846  ;;  %5862 = vrcp.f32 %v3543_v10  ;;  %v8992_v41 = vld [vmem:[#allocation38_spill] sm:$0xff] }
 0x411   : > { %v5849_v36 = vpop.eup %5848  ;;  %v3781_v29 = vpack.c.bf16 %v3719_v51, %v3718_v23 }
 0x412   : > { %3650 = vadd.xlane.f32.xlu1 %v8367_v18  ;;  %v3780_v17 = vpack.c.bf16 %v3717_v60, %v3716_v4  ;;  %v3549_v45 = vpop.xlane.xlu0 %3548  ;;  %v5851_v19 = vpop.eup %5850  ;;  %v3720_v7 = vmul.f32 %v5849_v36, %v8144_v38 }
 0x413   : > { %v3555_v47 = vpop.xlane.xlu1 %3554  ;;  %v5853_v5 = vpop.eup %5852  ;;  %5864 = vrcp.f32 %v3549_v45  ;;  %v3723_v23 = vmul.f32 %v5851_v19, %v8141_v0  ;;  %v8995_v19 = vld [vmem:[#allocation23_spill] sm:$0xff] }
 0x414   : > { %5304 = vmatprep.mubr.bf16.mxu1 %v3780_v17  ;;  %5866 = vrcp.f32 %v3555_v47  ;;  %v3722_v46 = vmul.f32 %v5853_v5, %v8137_v50 }
 0x415   : > { %5305 = vmatmul.mubr.bf16.vlgmr.msra.gmra.mxu1 %v3781_v29  ;;  %v5855_v28 = vpop.eup %5854  ;;  %v8993_v29 = vld [vmem:[#allocation24_spill] sm:$0xff] }
 0x416   : > { %5353 = vmatpush3.bf16.msra.mxu1 %v8991_v52  ;;  %v3721_v60 = vmul.f32 %v5855_v28, %v8148_v59  ;;  %v3783_v27 = vpack.c.bf16 %v3723_v23, %v3722_v46  ;;  %v8994_v59 = vld [vmem:[#allocation37_spill] sm:$0xff] }
 0x417   : > { %5354 = vmatprep.subr.bf16.mxu1 %v8992_v41  ;;  %v3551_v53 = vpop.xlane.xlu1 %3550 }
 0x418   : > { %5868 = vrcp.f32 %v3551_v53  ;;  %v3782_v4 = vpack.c.bf16 %v3721_v60, %v3720_v7  ;;  %v5857_v45 = vpop.eup %5856  ;;  %v8998_v60 = vld [vmem:[#allocation52_spill] sm:$0xff] }
 0x419   : > { %5870 = vrcp.f32 %v3553_v20  ;;  %v5859_v51 = vpop.eup %5858  ;;  %v3724_v0 = vmul.f32 %v5857_v45, %v8156_v63  ;;  %v9000_v45 = vld [vmem:[#allocation31_spill] sm:$0xff] }
 0x41a   : > { %5355 = vmatpush3.bf16.msra.mxu1 %v8992_v41  ;;  %5308 = vmatprep.mubr.bf16.mxu1 %v3782_v4  ;;  %v5861_v10 = vpop.eup %5860  ;;  %v3727_v50 = vmul.f32 %v5859_v51, %v8154_v49  ;;  %v8999_v4 = vld [vmem:[#allocation21_spill] sm:$0xff] }
 0x41b   : > { %5356 = vmatprep.subr.bf16.mxu1 %v8993_v29  ;;  %v3726_v17 = vmul.f32 %v5861_v10, %v8150_v6  ;;  %v8997_v6 = vld [vmem:[#allocation55_spill] sm:$0xff] }
 0x41d   : > { %5309 = vmatmul.mubr.bf16.gmra.mxu1 %v3783_v27  ;;  %v5863_v38 = vpop.eup %5862  ;;  %v3785_v5 = vpack.c.bf16 %v3727_v50, %v3726_v17 }
 0x41e   : > { %5357 = vmatpush3.bf16.msra.mxu1 %v8993_v29  ;;  %v3725_v36 = vmul.f32 %v5863_v38, %v8160_v12  ;;  %v8996_v12 = vld [vmem:[#allocation34_spill] sm:$0xff] }
 0x41f   : > { %5358 = vmatprep.subr.bf16.mxu1 %v8994_v59 }
 0x420   : > { %v3784_v20 = vpack.c.bf16 %v3725_v36, %v3724_v0  ;;  %v5865_v47 = vpop.eup %5864 }
 0x421   : > { %v5867_v28 = vpop.eup %5866  ;;  %v3728_v63 = vmul.f32 %v5865_v47, %v8168_v35 }
 0x422   : > { %5359 = vmatpush3.bf16.msra.mxu1 %v8994_v59  ;;  %5312 = vmatprep.mubr.bf16.mxu1 %v3784_v20  ;;  %v3731_v53 = vmul.f32 %v5867_v28, %v8997_v6 }
 0x423   : > { %5360 = vmatprep.subr.bf16.mxu1 %v8995_v19 }
 0x425   : > { %v5869_v52 = vpop.eup %5868  ;;  %5313 = vmatmul.mubr.bf16.gmra.mxu1 %v3785_v5 }
 0x426   : > { %v5871_v41 = vpop.eup %5870  ;;  %5361 = vmatpush3.bf16.msra.mxu1 %v8995_v19  ;;  %v3729_v49 = vmul.f32 %v5869_v52, %v8172_v13  ;;  %v9001_v13 = vld [vmem:[#allocation32_spill] sm:$0xff] }
 0x427   : > { %5362 = vmatprep.subr.bf16.mxu1 %v8996_v12  ;;  %v3730_v23 = vmul.f32 %v5871_v41, %v8998_v60 }
 0x428   : > { %v3786_v7 = vpack.c.bf16 %v3729_v49, %v3728_v63 }
 0x429   : > { %v3787_v46 = vpack.c.bf16 %v3731_v53, %v3730_v23 }
 0x42a   : > { %5363 = vmatpush3.bf16.msra.mxu1 %v8996_v12  ;;  %5316 = vmatprep.mubr.bf16.mxu1 %v3786_v7 }
 0x42b   : > { %5364 = vmatprep.subr.bf16.mxu1 %v8999_v4 }
 0x42d   : > { %5317 = vmatmul.mubr.bf16.gmra.mxu1 %v3787_v46 }
 0x42e   : > { %5365 = vmatpush3.bf16.msra.mxu1 %v8999_v4 }
 0x42f   : > { %5366 = vmatprep.subr.bf16.mxu1 %v9000_v45  ;;  %v3561_v35 = vpop.xlane.xlu0 %3560 }
 0x432   : > { %5367 = vmatpush3.bf16.msra.mxu1 %v9000_v45 }
 0x433   : > { %5416 = vmatprep.subr.bf16.mxu1 %v9001_v13  ;;  %v3557_v29 = vpop.xlane.xlu0 %3556 }
 0x434   : > { %v3563_v27 = vpop.xlane.xlu1 %3562 }
 0x435   : > { %5872 = vrcp.f32 %v3563_v27 }
 0x436   : > { %5874 = vrcp.f32 %v3557_v29 }
 0x437   : > { %5876 = vrcp.f32 %v3561_v35 }
 0x438   : > { %v3569_v51 = vpop.xlane.xlu0 %3568  ;;  %v3559_v10 = vpop.xlane.xlu1 %3558 }
 0x439   : > { %5878 = vrcp.f32 %v3559_v10  ;;  %v9003_v10 = vld [vmem:[#allocation30_spill] sm:$0xff] }
 0x43c   : > { %v3565_v38 = vpop.xlane.xlu0 %3564  ;;  %v3571_v59 = vpop.xlane.xlu1 %3570 }
 0x43d   : > { %5880 = vrcp.f32 %v3571_v59 }
 0x43e   : > { %5882 = vrcp.f32 %v3565_v38 }
 0x43f   : > { %5884 = vrcp.f32 %v3569_v51 }
 0x440   : > { %v3577_v0 = vpop.xlane.xlu0 %3576  ;;  %v3567_v36 = vpop.xlane.xlu1 %3566 }
 0x441   : > { %5886 = vrcp.f32 %v3567_v36 }
 0x442   : > { %v5873_v50 = vpop.eup %5872 }
 0x443   : > { %v5875_v47 = vpop.eup %5874  ;;  %v3735_v28 = vmul.f32 %v5873_v50, %v8191_v56 }
 0x444   : > { %v3573_v20 = vpop.xlane.xlu0 %3572  ;;  %v3579_v17 = vpop.xlane.xlu1 %3578  ;;  %v3732_v63 = vmul.f32 %v5875_v47, %v8189_v34  ;;  %v9002_v34 = vld [vmem:[#allocation43_spill] sm:$0xff] }
 0x445   : > { %v5877_v19 = vpop.eup %5876  ;;  %5888 = vrcp.f32 %v3579_v17 }
 0x446   : > { %v5879_v5 = vpop.eup %5878  ;;  %5890 = vrcp.f32 %v3573_v20  ;;  %v3734_v12 = vmul.f32 %v5877_v19, %v8184_v33 }
 0x447   : > { %v3733_v49 = vmul.f32 %v5879_v5, %v8197_v48  ;;  %5892 = vrcp.f32 %v3577_v0 }
 0x448   : > { %v3585_v52 = vpop.xlane.xlu0 %3584  ;;  %v3575_v41 = vpop.xlane.xlu1 %3574  ;;  %v3789_v53 = vpack.c.bf16 %v3735_v28, %v3734_v12 }
 0x449   : > { %5894 = vrcp.f32 %v3575_v41  ;;  %v3788_v6 = vpack.c.bf16 %v3733_v49, %v3732_v63  ;;  %v9005_v41 = vld [vmem:[#allocation29_spill] sm:$0xff] }
 0x44a   : > { %v5881_v7 = vpop.eup %5880 }
 0x44b   : > { %5336 = vmatprep.mubr.bf16.mxu0 %v3788_v6  ;;  %v5883_v4 = vpop.eup %5882  ;;  %v3739_v33 = vmul.f32 %v5881_v7, %v8207_v40 }
 0x44c   : > { %v3581_v60 = vpop.xlane.xlu0 %3580  ;;  %v3587_v23 = vpop.xlane.xlu1 %3586  ;;  %5337 = vmatmul.mubr.bf16.vlgmr.msra.gmra.mxu0 %v3789_v53  ;;  %v3736_v35 = vmul.f32 %v5883_v4, %v8205_v58 }
 0x44d   : > { %v5885_v56 = vpop.eup %5884  ;;  %5896 = vrcp.f32 %v3581_v60  ;;  %5385 = vmatpush3.bf16.msra.mxu0 %v9001_v13 }
 0x44e   : > { %v5887_v46 = vpop.eup %5886  ;;  %5898 = vrcp.f32 %v3587_v23  ;;  %5386 = vmatprep.subr.bf16.mxu0 %v9002_v34  ;;  %v3738_v27 = vmul.f32 %v5885_v56, %v8199_v61 }
 0x44f   : > { %5900 = vrcp.f32 %v3585_v52  ;;  %v3737_v29 = vmul.f32 %v5887_v46, %v8213_v31  ;;  %v9004_v31 = vld [vmem:[#allocation41_spill] sm:$0xff]  ;;  %v9007_v46 = vld [vmem:[#allocation27_spill] sm:$0xff] }
 0x450   : > { %v3583_v48 = vpop.xlane.xlu1 %3582  ;;  %v3593_v45 = vpop.xlane.xlu0 %3592  ;;  %v3791_v38 = vpack.c.bf16 %v3739_v33, %v3738_v27  ;;  %v9008_v27 = vld [vmem:[#allocation39_spill] sm:$0xff] }
 0x451   : > { %5902 = vrcp.f32 %v3583_v48  ;;  %5387 = vmatpush3.bf16.msra.mxu0 %v9002_v34  ;;  %v3790_v51 = vpack.c.bf16 %v3737_v29, %v3736_v35 }
 0x452   : > { %5388 = vmatprep.subr.bf16.mxu0 %v9003_v10  ;;  %v5889_v59 = vpop.eup %5888 }
 0x453   : > { %5340 = vmatprep.mubr.bf16.mxu0 %v3790_v51  ;;  %v5891_v36 = vpop.eup %5890  ;;  %v3743_v61 = vmul.f32 %v5889_v59, %v8223_v15 }
 0x454   : > { %v3589_v0 = vpop.xlane.xlu0 %3588  ;;  %5341 = vmatmul.mubr.bf16.gmra.mxu0 %v3791_v38  ;;  %v5893_v50 = vpop.eup %5892  ;;  %v3740_v47 = vmul.f32 %v5891_v36, %v8221_v3 }
 0x455   : > { %v3595_v40 = vpop.xlane.xlu1 %3594  ;;  %5389 = vmatpush3.bf16.msra.mxu0 %v9003_v10  ;;  %v3742_v5 = vmul.f32 %v5893_v50, %v8215_v62 }
 0x456   : > { %v5895_v58 = vpop.eup %5894  ;;  %5390 = vmatprep.subr.bf16.mxu0 %v9004_v31  ;;  %5904 = vrcp.f32 %v3595_v40 }
 0x457   : > { %5906 = vrcp.f32 %v3589_v0  ;;  %v3741_v19 = vmul.f32 %v5895_v58, %v8229_v26  ;;  %v3793_v63 = vpack.c.bf16 %v3743_v61, %v3742_v5  ;;  %v9006_v26 = vld [vmem:[#allocation40_spill] sm:$0xff] }
 0x458   : > { %v3601_v20 = vpop.xlane.xlu0 %3600  ;;  %5908 = vrcp.f32 %v3593_v45 }
 0x459   : > { %v3591_v17 = vpop.xlane.xlu1 %3590  ;;  %5391 = vmatpush3.bf16.msra.mxu0 %v9004_v31  ;;  %v3792_v28 = vpack.c.bf16 %v3741_v19, %v3740_v47  ;;  %v9010_v19 = vld [vmem:[#allocation59_spill] sm:$0xff] }
 0x45a   : > { %5910 = vrcp.f32 %v3591_v17  ;;  %v5897_v52 = vpop.eup %5896  ;;  %5392 = vmatprep.subr.bf16.mxu0 %v9005_v41  ;;  %v9009_v17 = vld [vmem:[#allocation57_spill] sm:$0xff] }
 0x45b   : > { %v5899_v49 = vpop.eup %5898  ;;  %5344 = vmatprep.mubr.bf16.mxu0 %v3792_v28  ;;  %v3744_v62 = vmul.f32 %v5897_v52, %v8237_v43  ;;  %v9011_v28 = vld [vmem:[#allocation54_spill] sm:$0xff] }
 0x45c   : > { %v3597_v15 = vpop.xlane.xlu0 %3596  ;;  %v5901_v6 = vpop.eup %5900  ;;  %5345 = vmatmul.mubr.bf16.gmra.mxu0 %v3793_v63  ;;  %v3747_v7 = vmul.f32 %v5899_v49, %v8239_v30 }
 0x45d   : > { %v3603_v12 = vpop.xlane.xlu1 %3602  ;;  %5393 = vmatpush3.bf16.msra.mxu0 %v9005_v41  ;;  %v3746_v56 = vmul.f32 %v5901_v6, %v8231_v22 }
 0x45e   : > { %v5903_v3 = vpop.eup %5902  ;;  %5394 = vmatprep.subr.bf16.mxu0 %v9006_v26  ;;  %5912 = vrcp.f32 %v3603_v12 }
 0x45f   : > { %v3745_v53 = vmul.f32 %v5903_v3, %v8245_v55  ;;  %5914 = vrcp.f32 %v3597_v15  ;;  %v3795_v33 = vpack.c.bf16 %v3747_v7, %v3746_v56 }
 0x460   : > { %v3609_v60 = vpop.xlane.xlu0 %3608  ;;  %5916 = vrcp.f32 %v3601_v20 }
 0x461   : > { %v3599_v23 = vpop.xlane.xlu1 %3598  ;;  %v3794_v4 = vpack.c.bf16 %v3745_v53, %v3744_v62  ;;  %5395 = vmatpush3.bf16.msra.mxu0 %v9006_v26 }
 0x462   : > { %5918 = vrcp.f32 %v3599_v23  ;;  %5396 = vmatprep.subr.bf16.mxu0 %v9007_v46 }
 0x463   : > { %5348 = vmatprep.mubr.bf16.mxu0 %v3794_v4  ;;  %v5905_v48 = vpop.eup %5904 }
 0x464   : > { %v3605_v43 = vpop.xlane.xlu0 %3604  ;;  %v5907_v55 = vpop.eup %5906  ;;  %5349 = vmatmul.mubr.bf16.gmra.mxu0 %v3795_v33  ;;  %v3751_v29 = vmul.f32 %v5905_v48, %v8255_v54 }
 0x465   : > { %v3611_v45 = vpop.xlane.xlu1 %3610  ;;  %v5909_v30 = vpop.eup %5908  ;;  %5397 = vmatpush3.bf16.msra.mxu0 %v9007_v46  ;;  %v3748_v38 = vmul.f32 %v5907_v55, %v8253_v11  ;;  %v9014_v55 = vld [vmem:[#allocation60_spill] sm:$0xff] }
 0x466   : > { %5398 = vmatprep.subr.bf16.mxu0 %v9008_v27  ;;  %5920 = vrcp.f32 %v3611_v45  ;;  %v3750_v0 = vmul.f32 %v5909_v30, %v8247_v8 }
 0x467   : > { %v5911_v35 = vpop.eup %5910  ;;  %5922 = vrcp.f32 %v3605_v43  ;;  %v9013_v43 = vld [vmem:[#allocation61_spill] sm:$0xff] }
 0x468   : > { %v3617_v22 = vpop.xlane.xlu0 %3616  ;;  %v3749_v59 = vmul.f32 %v5911_v35, %v8263_v9  ;;  %5924 = vrcp.f32 %v3609_v60  ;;  %v3797_v36 = vpack.c.bf16 %v3751_v29, %v3750_v0  ;;  %v9012_v60 = vld [vmem:[#allocation56_spill] sm:$0xff]  ;;  %v9015_v29 = vld [vmem:[#allocation58_spill] sm:$0xff] }
 0x469   : > { %v3607_v51 = vpop.xlane.xlu1 %3606  ;;  %5399 = vmatpush3.bf16.msra.mxu0 %v9008_v27 }
 0x46a   : > { %5926 = vrcp.f32 %v3607_v51  ;;  %v3796_v40 = vpack.c.bf16 %v3749_v59, %v3748_v38 }
 0x46b   : > { %v5913_v50 = vpop.eup %5912 }
 0x46c   : > { %5368 = vmatprep.mubr.bf16.mxu1 %v3796_v40  ;;  %v3613_v54 = vpop.xlane.xlu0 %3612  ;;  %v5915_v61 = vpop.eup %5914  ;;  %v3755_v8 = vmul.f32 %v5913_v50, %v8271_v16 }
 0x46d   : > { %v3619_v58 = vpop.xlane.xlu1 %3618  ;;  %5369 = vmatmul.mubr.bf16.vlgmr.msra.gmra.mxu1 %v3797_v36  ;;  %v5917_v20 = vpop.eup %5916  ;;  %5928 = vrcp.f32 %v3613_v54  ;;  %v3752_v47 = vmul.f32 %v5915_v61, %v9009_v17 }
 0x46e   : > { %5424 = vmatpush3.bf16.msra.mxu1 %v9001_v13  ;;  %5930 = vrcp.f32 %v3619_v58  ;;  %v3754_v52 = vmul.f32 %v5917_v20, %v9011_v28 }
 0x46f   : > { %v5919_v11 = vpop.eup %5918  ;;  %5417 = vmatprep.subr.bf16.mxu1 %v9002_v34  ;;  %5932 = vrcp.f32 %v3617_v22 }
 0x470   : > { %v3753_v5 = vmul.f32 %v5919_v11, %v9010_v19  ;;  %v3799_v13 = vpack.c.bf16 %v3755_v8, %v3754_v52 }
 0x471   : > { %v3615_v9 = vpop.xlane.xlu1 %3614 }
 0x472   : > { %5934 = vrcp.f32 %v3615_v9  ;;  %5425 = vmatpush3.bf16.msra.mxu1 %v9002_v34  ;;  %v3625_v63 = vpop.xlane.xlu0 %3624  ;;  %v3798_v49 = vpack.c.bf16 %v3753_v5, %v3752_v47 }
 0x473   : > { %5418 = vmatprep.subr.bf16.mxu1 %v9003_v10  ;;  %v5921_v15 = vpop.eup %5920 }
 0x474   : > { %5372 = vmatprep.mubr.bf16.mxu1 %v3798_v49  ;;  %v5923_v12 = vpop.eup %5922  ;;  %v3759_v53 = vmul.f32 %v5921_v15, %v8285_v14 }
 0x475   : > { %5373 = vmatmul.mubr.bf16.gmra.mxu1 %v3799_v13  ;;  %v5925_v16 = vpop.eup %5924  ;;  %v3756_v34 = vmul.f32 %v5923_v12, %v8283_v1 }
 0x476   : > { %5426 = vmatpush3.bf16.msra.mxu1 %v9003_v10  ;;  %v3621_v3 = vpop.xlane.xlu0 %3620  ;;  %v3758_v23 = vmul.f32 %v5925_v16, %v9012_v60  ;;  %v9017_v16 = vld [vmem:[#allocation63_spill] sm:$0xff]  ;;  %v9019_v60 = vld [vmem:[#allocation64_spill] sm:$0xff] }
 0x477   : > { %v5927_v6 = vpop.eup %5926  ;;  %5419 = vmatprep.subr.bf16.mxu1 %v9004_v31  ;;  %v3627_v62 = vpop.xlane.xlu1 %3626 }
 0x478   : > { %v3757_v7 = vmul.f32 %v5927_v6, %v8293_v57  ;;  %5936 = vrcp.f32 %v3627_v62  ;;  %v3801_v33 = vpack.c.bf16 %v3759_v53, %v3758_v23 }
 0x479   : > { %5938 = vrcp.f32 %v3621_v3 }
 0x47a   : > { %5427 = vmatpush3.bf16.msra.mxu1 %v9004_v31  ;;  %v3800_v4 = vpack.c.bf16 %v3757_v7, %v3756_v34  ;;  %v5929_v56 = vpop.eup %5928  ;;  %5940 = vrcp.f32 %v3625_v63  ;;  %v9018_v34 = vld [vmem:[#allocation8_spill] sm:$0xff] }
 0x47b   : > { %5420 = vmatprep.subr.bf16.mxu1 %v9005_v41  ;;  %v3623_v10 = vpop.xlane.xlu1 %3622  ;;  %v5931_v48 = vpop.eup %5930  ;;  %v3760_v31 = vmul.f32 %v5929_v56, %v9013_v43  ;;  %v9022_v43 = vld [vmem:[#allocation45_spill] sm:$0xff] }
 0x47c   : > { %5376 = vmatprep.mubr.bf16.mxu1 %v3800_v4  ;;  %5942 = vrcp.f32 %v3623_v10  ;;  %v5933_v14 = vpop.eup %5932  ;;  %v3763_v30 = vmul.f32 %v5931_v48, %v9014_v55  ;;  %v9021_v48 = vld [vmem:[#allocation11_spill] sm:$0xff] }
 0x47d   : > { %5377 = vmatmul.mubr.bf16.gmra.mxu1 %v3801_v33  ;;  %v3762_v22 = vmul.f32 %v5933_v14, %v9015_v29 }
 0x47e   : > { %5428 = vmatpush3.bf16.msra.mxu1 %v9005_v41  ;;  %v3629_v57 = vpop.xlane.xlu0 %3628 }
 0x47f   : > { %v5935_v1 = vpop.eup %5934  ;;  %5421 = vmatprep.subr.bf16.mxu1 %v9006_v26  ;;  %5944 = vrcp.f32 %v3629_v57  ;;  %v3803_v41 = vpack.c.bf16 %v3763_v30, %v3762_v22 }
 0x480   : > { %v3761_v45 = vmul.f32 %v5935_v1, %v8305_v2 }
 0x482   : > { %v3802_v35 = vpack.c.bf16 %v3761_v45, %v3760_v31  ;;  %5429 = vmatpush3.bf16.msra.mxu1 %v9006_v26 }
 0x483   : > { %v3631_v51 = vpop.xlane.xlu1 %3630  ;;  %5422 = vmatprep.subr.bf16.mxu1 %v9007_v46 }
 0x484   : > { %v3641_v38 = vpop.xlane.xlu0 %3640  ;;  %5380 = vmatprep.mubr.bf16.mxu1 %v3802_v35  ;;  %5946 = vrcp.f32 %v3631_v51 }
 0x485   : > { %5381 = vmatmul.mubr.bf16.gmra.mxu1 %v3803_v41  ;;  %v5937_v59 = vpop.eup %5936 }
 0x486   : > { %5430 = vmatpush3.bf16.msra.mxu1 %v9007_v46  ;;  %v5939_v2 = vpop.eup %5938  ;;  %v3767_v26 = vmul.f32 %v5937_v59, %v8318_v21 }
 0x487   : > { %5423 = vmatprep.subr.bf16.mxu1 %v9008_v27  ;;  %v3643_v40 = vpop.xlane.xlu1 %3642  ;;  %v5941_v36 = vpop.eup %5940  ;;  %v3764_v54 = vmul.f32 %v5939_v2, %v8315_v42 }
 0x488   : > { %v3637_v0 = vpop.xlane.xlu0 %3636  ;;  %5948 = vrcp.f32 %v3643_v40  ;;  %v3766_v61 = vmul.f32 %v5941_v36, %v8310_v37 }
 0x489   : > { %v5943_v50 = vpop.eup %5942  ;;  %5950 = vrcp.f32 %v3637_v0 }
 0x48a   : > { %5431 = vmatpush3.bf16.msra.mxu1 %v9008_v27  ;;  %v3765_v58 = vmul.f32 %v5943_v50, %v8323_v39  ;;  %5952 = vrcp.f32 %v3641_v38  ;;  %v3805_v8 = vpack.c.bf16 %v3767_v26, %v3766_v61 }
 0x48b   : > { %v3639_v20 = vpop.xlane.xlu1 %3638 }
 0x48c   : > { %v3633_v46 = vpop.xlane.xlu0 %3632  ;;  %v3804_v11 = vpack.c.bf16 %v3765_v58, %v3764_v54  ;;  %5954 = vrcp.f32 %v3639_v20  ;;  %v5945_v9 = vpop.eup %5944 }
 0x48d   : > { %5956 = vrcp.f32 %v3633_v46  ;;  %v3768_v42 = vmul.f32 %v5945_v9, %v8327_v44 }
 0x48e   : > { %5400 = vmatprep.mubr.bf16.mxu0 %v3804_v11 }
 0x48f   : > { %5401 = vmatmul.mubr.bf16.vlgmr.msra.gmra.mxu0 %v3805_v8  ;;  %v3635_v21 = vpop.xlane.xlu1 %3634 }
 0x490   : > { %5958 = vrcp.f32 %v3635_v21 }
 0x491   : > { %v5947_v17 = vpop.eup %5946 }
 0x492   : > { %v3769_v39 = vmul.f32 %v5947_v17, %v8332_v32  ;;  %v3645_v27 = vpop.xlane.xlu0 %3644  ;;  %v9016_v32 = vld [vmem:[#allocation62_spill] sm:$0xff] }
 0x493   : > { %5960 = vrcp.f32 %v3645_v27 }
 0x494   : > { %v3806_v37 = vpack.c.bf16 %v3769_v39, %v3768_v42 }
 0x495   : > { %v5949_v5 = vpop.eup %5948 }
 0x496   : > { %5404 = vmatprep.mubr.bf16.mxu0 %v3806_v37  ;;  %v3649_v47 = vpop.xlane.xlu0 %3648  ;;  %v5951_v28 = vpop.eup %5950  ;;  %v3775_v49 = vmul.f32 %v5949_v5, %v8342_v25 }
 0x497   : > { %v3647_v19 = vpop.xlane.xlu1 %3646  ;;  %v5953_v52 = vpop.eup %5952  ;;  %v3772_v44 = vmul.f32 %v5951_v28, %v8340_v24  ;;  %v9020_v24 = vld [vmem:[#allocation9_spill] sm:$0xff] }
 0x498   : > { %5962 = vrcp.f32 %v3647_v19  ;;  %v3774_v6 = vmul.f32 %v5953_v52, %v9017_v16 }
 0x499   : > { %5964 = vrcp.f32 %v3649_v47  ;;  %v5955_v63 = vpop.eup %5954 }
 0x49a   : > { %v5957_v15 = vpop.eup %5956  ;;  %v3773_v12 = vmul.f32 %v5955_v63, %v9016_v32  ;;  %v3809_v53 = vpack.c.bf16 %v3775_v49, %v3774_v6 }
 0x49b   : > { %v3651_v13 = vpop.xlane.xlu1 %3650  ;;  %v3770_v7 = vmul.f32 %v5957_v15, %v9018_v34 }
 0x49c   : > { %5966 = vrcp.f32 %v3651_v13  ;;  %v3808_v62 = vpack.c.bf16 %v3773_v12, %v3772_v44 }
 0x49d   : > { %v5959_v3 = vpop.eup %5958 }
 0x49e   : > { %v3771_v23 = vmul.f32 %v5959_v3, %v9019_v60  ;;  %5408 = vmatprep.mubr.bf16.mxu1 %v3808_v62 }
 0x49f   : > { %5409 = vmatmul.mubr.bf16.vlgmr.msra.gmra.mxu1 %v3809_v53 }
 0x4a0   : > { %v3807_v25 = vpack.c.bf16 %v3771_v23, %v3770_v7  ;;  %v5961_v4 = vpop.eup %5960 }
 0x4a1   : > { %v3776_v33 = vmul.f32 %v5961_v4, %v9020_v24 }
 0x4a2   : > { %5405 = vmatmul.mubr.bf16.gmra.mxu0 %v3807_v25 }
 0x4a5   : > { %v5963_v56 = vpop.eup %5962 }
 0x4a6   : > { %v5965_v10 = vpop.eup %5964  ;;  %v3777_v14 = vmul.f32 %v5963_v56, %v9021_v48 }
 0x4a7   : > { %v3778_v31 = vmul.f32 %v5965_v10, %v9022_v43 }
 0x4a8   : > { %v3810_v57 = vpack.c.bf16 %v3777_v14, %v3776_v33 }
 0x4a9   : > { %v5967_v1 = vpop.eup %5966 }
 0x4aa   : > { %v3779_v45 = vmul.f32 %v5967_v1, %v8367_v18  ;;  %5412 = vmatprep.mubr.bf16.mxu1 %v3810_v57 }
 0x4ac   : > { %v3811_v55 = vpack.c.bf16 %v3779_v45, %v3778_v31 }
 0x4ae   : > { %5413 = vmatmul.mubr.bf16.gmra.mxu1 %v3811_v55 }
 0x4d5   : > { %v5306_v30 = vpop.f32.mrf.mxu1 }
 0x4d6   : > { %v4850_v18 = vpack.c.bf16 %v5306_v30, %v5306_v30 }
 0x4d7   : > { %v3846_v35 = vpop.f32.mrf.mxu1 }
 0x4d8   : > { %4459 = vst.msk [vmem:[%s8482_s25 + $0x8] sm:$0xf] %vm4456_vm0, %v4850_v18  ;;  %v4848_v29 = vpack.c.bf16 %v3846_v35, %v3846_v35 }
 0x4d9   : > { %v5307_v22 = vpop.f32.mrf.mxu1 }
 0x4da   : > { %4457 = vst.msk [vmem:[%s8482_s25] sm:$0xf] %vm4456_vm0, %v4848_v29  ;;  %v4851_v51 = vpack.c.bf16 %v5307_v22, %v5307_v22 }
 0x4db   : > { %v3849_v38 = vpop.f32.mrf.mxu1 }
 0x4dc   : > { %4460 = vst.msk [vmem:[%s8482_s25 + $0xc] sm:$0xf] %vm4456_vm0, %v4851_v51  ;;  %v4849_v41 = vpack.c.bf16 %v3849_v38, %v3849_v38 }
 0x4dd   : > { %v5310_v59 = vpop.f32.mrf.mxu1 }
 0x4de   : > { %4458 = vst.msk [vmem:[%s8482_s25 + $0x4] sm:$0xf] %vm4456_vm0, %v4849_v41  ;;  %v4854_v2 = vpack.c.bf16 %v5310_v59, %v5310_v59 }
 0x4df   : > { %v3862_v0 = vpop.f32.mrf.mxu1 }
 0x4e0   : > { %4463 = vst.msk [vmem:[%s8482_s25 + $0x18] sm:$0xf] %vm4456_vm0, %v4854_v2  ;;  %v4852_v40 = vpack.c.bf16 %v3862_v0, %v3862_v0 }
 0x4e1   : > { %v5311_v36 = vpop.f32.mrf.mxu1 }
 0x4e2   : > { %4461 = vst.msk [vmem:[%s8482_s25 + $0x10] sm:$0xf] %vm4456_vm0, %v4852_v40  ;;  %v4855_v50 = vpack.c.bf16 %v5311_v36, %v5311_v36 }
 0x4e3   : > { %v3865_v26 = vpop.f32.mrf.mxu1 }
 0x4e4   : > { %4464 = vst.msk [vmem:[%s8482_s25 + $0x1c] sm:$0xf] %vm4456_vm0, %v4855_v50  ;;  %v4853_v54 = vpack.c.bf16 %v3865_v26, %v3865_v26 }
 0x4e5   : > { %v5314_v58 = vpop.f32.mrf.mxu1 }
 0x4e6   : > { %4462 = vst.msk [vmem:[%s8482_s25 + $0x14] sm:$0xf] %vm4456_vm0, %v4853_v54  ;;  %v4858_v61 = vpack.c.bf16 %v5314_v58, %v5314_v58 }
 0x4e7   : > { %v3878_v46 = vpop.f32.mrf.mxu1 }
 0x4e8   : > { %4467 = vst.msk [vmem:[%s8482_s25 + $0x28] sm:$0xf] %vm4456_vm0, %v4858_v61  ;;  %v4856_v20 = vpack.c.bf16 %v3878_v46, %v3878_v46 }
 0x4e9   : > { %v5315_v11 = vpop.f32.mrf.mxu1 }
 0x4ea   : > { %4465 = vst.msk [vmem:[%s8482_s25 + $0x20] sm:$0xf] %vm4456_vm0, %v4856_v20  ;;  %v4859_v8 = vpack.c.bf16 %v5315_v11, %v5315_v11 }
 0x4eb   : > { %v3881_v9 = vpop.f32.mrf.mxu1 }
 0x4ec   : > { %4468 = vst.msk [vmem:[%s8482_s25 + $0x2c] sm:$0xf] %vm4456_vm0, %v4859_v8  ;;  %v4857_v21 = vpack.c.bf16 %v3881_v9, %v3881_v9 }
 0x4ed   : > { %v5318_v17 = vpop.f32.mrf.mxu1 }
 0x4ee   : > { %4466 = vst.msk [vmem:[%s8482_s25 + $0x24] sm:$0xf] %vm4456_vm0, %v4857_v21  ;;  %v4862_v42 = vpack.c.bf16 %v5318_v17, %v5318_v17 }
 0x4ef   : > { %v3894_v39 = vpop.f32.mrf.mxu1 }
 0x4f0   : > { %4471 = vst.msk [vmem:[%s8482_s25 + $0x38] sm:$0xf] %vm4456_vm0, %v4862_v42  ;;  %v4860_v27 = vpack.c.bf16 %v3894_v39, %v3894_v39 }
 0x4f1   : > { %v5319_v37 = vpop.f32.mrf.mxu1 }
 0x4f2   : > { %4469 = vst.msk [vmem:[%s8482_s25 + $0x30] sm:$0xf] %vm4456_vm0, %v4860_v27  ;;  %v4863_v47 = vpack.c.bf16 %v5319_v37, %v5319_v37 }
 0x4f3   : > { %v3897_v19 = vpop.f32.mrf.mxu1 }
 0x4f4   : > { %4472 = vst.msk [vmem:[%s8482_s25 + $0x3c] sm:$0xf] %vm4456_vm0, %v4863_v47  ;;  %v4861_v5 = vpack.c.bf16 %v3897_v19, %v3897_v19 }
 0x4f6   : > { %4470 = vst.msk [vmem:[%s8482_s25 + $0x34] sm:$0xf] %vm4456_vm0, %v4861_v5 }
 0x50c   : > { %v5338_v28 = vpop.f32.mrf.mxu0 }
 0x50d   : > { %v4866_v52 = vpack.c.bf16 %v5338_v28, %v5338_v28 }
 0x50e   : > { %v3943_v63 = vpop.f32.mrf.mxu0 }
 0x50f   : > { %4475 = vst.msk [vmem:[%s8482_s25 + $0x48] sm:$0xf] %vm4456_vm0, %v4866_v52  ;;  %v4864_v49 = vpack.c.bf16 %v3943_v63, %v3943_v63 }
 0x510   : > { %v5339_v13 = vpop.f32.mrf.mxu0 }
 0x511   : > { %4473 = vst.msk [vmem:[%s8482_s25 + $0x40] sm:$0xf] %vm4456_vm0, %v4864_v49  ;;  %v4867_v15 = vpack.c.bf16 %v5339_v13, %v5339_v13 }
 0x512   : > { %v3946_v44 = vpop.f32.mrf.mxu0 }
 0x513   : > { %4476 = vst.msk [vmem:[%s8482_s25 + $0x4c] sm:$0xf] %vm4456_vm0, %v4867_v15  ;;  %v4865_v32 = vpack.c.bf16 %v3946_v44, %v3946_v44 }
 0x514   : > { %v5342_v12 = vpop.f32.mrf.mxu0 }
 0x515   : > { %4474 = vst.msk [vmem:[%s8482_s25 + $0x44] sm:$0xf] %vm4456_vm0, %v4865_v32  ;;  %v4870_v16 = vpack.c.bf16 %v5342_v12, %v5342_v12 }
 0x516   : > { %v3959_v6 = vpop.f32.mrf.mxu0 }
 0x517   : > { %4479 = vst.msk [vmem:[%s8482_s25 + $0x58] sm:$0xf] %vm4456_vm0, %v4870_v16  ;;  %v4868_v3 = vpack.c.bf16 %v3959_v6, %v3959_v6 }
 0x518   : > { %v5343_v62 = vpop.f32.mrf.mxu0 }
 0x519   : > { %4477 = vst.msk [vmem:[%s8482_s25 + $0x50] sm:$0xf] %vm4456_vm0, %v4868_v3  ;;  %v4871_v53 = vpack.c.bf16 %v5343_v62, %v5343_v62 }
 0x51a   : > { %v3962_v34 = vpop.f32.mrf.mxu0 }
 0x51b   : > { %4480 = vst.msk [vmem:[%s8482_s25 + $0x5c] sm:$0xf] %vm4456_vm0, %v4871_v53  ;;  %v4869_v7 = vpack.c.bf16 %v3962_v34, %v3962_v34 }
 0x51c   : > { %v5346_v60 = vpop.f32.mrf.mxu0 }
 0x51d   : > { %4478 = vst.msk [vmem:[%s8482_s25 + $0x54] sm:$0xf] %vm4456_vm0, %v4869_v7  ;;  %v4874_v23 = vpack.c.bf16 %v5346_v60, %v5346_v60 }
 0x51e   : > { %v3975_v25 = vpop.f32.mrf.mxu0 }
 0x51f   : > { %4483 = vst.msk [vmem:[%s8482_s25 + $0x68] sm:$0xf] %vm4456_vm0, %v4874_v23  ;;  %v4872_v4 = vpack.c.bf16 %v3975_v25, %v3975_v25 }
 0x520   : > { %v5347_v56 = vpop.f32.mrf.mxu0 }
 0x521   : > { %4481 = vst.msk [vmem:[%s8482_s25 + $0x60] sm:$0xf] %vm4456_vm0, %v4872_v4  ;;  %v4875_v10 = vpack.c.bf16 %v5347_v56, %v5347_v56 }
 0x522   : > { %v3978_v24 = vpop.f32.mrf.mxu0 }
 0x523   : > { %4484 = vst.msk [vmem:[%s8482_s25 + $0x6c] sm:$0xf] %vm4456_vm0, %v4875_v10  ;;  %v4873_v33 = vpack.c.bf16 %v3978_v24, %v3978_v24 }
 0x524   : > { %v5350_v48 = vpop.f32.mrf.mxu0 }
 0x525   : > { %4482 = vst.msk [vmem:[%s8482_s25 + $0x64] sm:$0xf] %vm4456_vm0, %v4873_v33  ;;  %v4878_v14 = vpack.c.bf16 %v5350_v48, %v5350_v48 }
 0x526   : > { %v3991_v1 = vpop.f32.mrf.mxu0 }
 0x527   : > { %4487 = vst.msk [vmem:[%s8482_s25 + $0x78] sm:$0xf] %vm4456_vm0, %v4878_v14  ;;  %v4876_v57 = vpack.c.bf16 %v3991_v1, %v3991_v1 }
 0x528   : > { %v5351_v43 = vpop.f32.mrf.mxu0 }
 0x529   : > { %4485 = vst.msk [vmem:[%s8482_s25 + $0x70] sm:$0xf] %vm4456_vm0, %v4876_v57  ;;  %v4879_v31 = vpack.c.bf16 %v5351_v43, %v5351_v43 }
 0x52a   : > { %v3994_v45 = vpop.f32.mrf.mxu0 }
 0x52b   : > { %4488 = vst.msk [vmem:[%s8482_s25 + $0x7c] sm:$0xf] %vm4456_vm0, %v4879_v31  ;;  %v4877_v55 = vpack.c.bf16 %v3994_v45, %v3994_v45 }
 0x52d   : > { %v5370_v30 = vpop.f32.mrf.mxu1  ;;  %4486 = vst.msk [vmem:[%s8482_s25 + $0x74] sm:$0xf] %vm4456_vm0, %v4877_v55 }
 0x52e   : > { %v4882_v18 = vpack.c.bf16 %v5370_v30, %v5370_v30 }
 0x52f   : > { %v4040_v35 = vpop.f32.mrf.mxu1 }
 0x530   : > { %4491 = vst.msk [vmem:[%s8482_s25 + $0x88] sm:$0xf] %vm4456_vm0, %v4882_v18  ;;  %v4880_v29 = vpack.c.bf16 %v4040_v35, %v4040_v35 }
 0x531   : > { %v5371_v22 = vpop.f32.mrf.mxu1 }
 0x532   : > { %4489 = vst.msk [vmem:[%s8482_s25 + $0x80] sm:$0xf] %vm4456_vm0, %v4880_v29  ;;  %v4883_v51 = vpack.c.bf16 %v5371_v22, %v5371_v22 }
 0x533   : > { %v4043_v38 = vpop.f32.mrf.mxu1 }
 0x534   : > { %4492 = vst.msk [vmem:[%s8482_s25 + $0x8c] sm:$0xf] %vm4456_vm0, %v4883_v51  ;;  %v4881_v41 = vpack.c.bf16 %v4043_v38, %v4043_v38 }
 0x535   : > { %v5374_v59 = vpop.f32.mrf.mxu1 }
 0x536   : > { %4490 = vst.msk [vmem:[%s8482_s25 + $0x84] sm:$0xf] %vm4456_vm0, %v4881_v41  ;;  %v4886_v2 = vpack.c.bf16 %v5374_v59, %v5374_v59 }
 0x537   : > { %v4056_v0 = vpop.f32.mrf.mxu1 }
 0x538   : > { %4495 = vst.msk [vmem:[%s8482_s25 + $0x98] sm:$0xf] %vm4456_vm0, %v4886_v2  ;;  %v4884_v40 = vpack.c.bf16 %v4056_v0, %v4056_v0 }
 0x539   : > { %v5375_v36 = vpop.f32.mrf.mxu1 }
 0x53a   : > { %4493 = vst.msk [vmem:[%s8482_s25 + $0x90] sm:$0xf] %vm4456_vm0, %v4884_v40  ;;  %v4887_v50 = vpack.c.bf16 %v5375_v36, %v5375_v36 }
 0x53b   : > { %v4059_v26 = vpop.f32.mrf.mxu1 }
 0x53c   : > { %4496 = vst.msk [vmem:[%s8482_s25 + $0x9c] sm:$0xf] %vm4456_vm0, %v4887_v50  ;;  %v4885_v54 = vpack.c.bf16 %v4059_v26, %v4059_v26 }
 0x53d   : > { %v5378_v58 = vpop.f32.mrf.mxu1 }
 0x53e   : > { %4494 = vst.msk [vmem:[%s8482_s25 + $0x94] sm:$0xf] %vm4456_vm0, %v4885_v54  ;;  %v4890_v61 = vpack.c.bf16 %v5378_v58, %v5378_v58 }
 0x53f   : > { %v4072_v46 = vpop.f32.mrf.mxu1 }
 0x540   : > { %4499 = vst.msk [vmem:[%s8482_s25 + $0xa8] sm:$0xf] %vm4456_vm0, %v4890_v61  ;;  %v4888_v20 = vpack.c.bf16 %v4072_v46, %v4072_v46 }
 0x541   : > { %v5379_v11 = vpop.f32.mrf.mxu1 }
 0x542   : > { %4497 = vst.msk [vmem:[%s8482_s25 + $0xa0] sm:$0xf] %vm4456_vm0, %v4888_v20  ;;  %v4891_v8 = vpack.c.bf16 %v5379_v11, %v5379_v11 }
 0x543   : > { %v4075_v9 = vpop.f32.mrf.mxu1 }
 0x544   : > { %4500 = vst.msk [vmem:[%s8482_s25 + $0xac] sm:$0xf] %vm4456_vm0, %v4891_v8  ;;  %v4889_v21 = vpack.c.bf16 %v4075_v9, %v4075_v9 }
 0x545   : > { %v5382_v17 = vpop.f32.mrf.mxu1 }
 0x546   : > { %4498 = vst.msk [vmem:[%s8482_s25 + $0xa4] sm:$0xf] %vm4456_vm0, %v4889_v21  ;;  %v4894_v42 = vpack.c.bf16 %v5382_v17, %v5382_v17 }
 0x547   : > { %v4088_v39 = vpop.f32.mrf.mxu1 }
 0x548   : > { %4503 = vst.msk [vmem:[%s8482_s25 + $0xb8] sm:$0xf] %vm4456_vm0, %v4894_v42  ;;  %v4892_v27 = vpack.c.bf16 %v4088_v39, %v4088_v39 }
 0x549   : > { %v5383_v37 = vpop.f32.mrf.mxu1 }
 0x54a   : > { %4501 = vst.msk [vmem:[%s8482_s25 + $0xb0] sm:$0xf] %vm4456_vm0, %v4892_v27  ;;  %v4895_v47 = vpack.c.bf16 %v5383_v37, %v5383_v37 }
 0x54b   : > { %v4091_v19 = vpop.f32.mrf.mxu1 }
 0x54c   : > { %4504 = vst.msk [vmem:[%s8482_s25 + $0xbc] sm:$0xf] %vm4456_vm0, %v4895_v47  ;;  %v4893_v5 = vpack.c.bf16 %v4091_v19, %v4091_v19 }
 0x54e   : > { %4502 = vst.msk [vmem:[%s8482_s25 + $0xb4] sm:$0xf] %vm4456_vm0, %v4893_v5 }
 0x54f   : > { %v5402_v28 = vpop.f32.mrf.mxu0 }
 0x550   : > { %v4898_v52 = vpack.c.bf16 %v5402_v28, %v5402_v28 }
 0x551   : > { %v4137_v63 = vpop.f32.mrf.mxu0 }
 0x552   : > { %4507 = vst.msk [vmem:[%s8482_s25 + $0xc8] sm:$0xf] %vm4456_vm0, %v4898_v52  ;;  %v4896_v49 = vpack.c.bf16 %v4137_v63, %v4137_v63 }
 0x553   : > { %v5403_v13 = vpop.f32.mrf.mxu0 }
 0x554   : > { %4505 = vst.msk [vmem:[%s8482_s25 + $0xc0] sm:$0xf] %vm4456_vm0, %v4896_v49  ;;  %v4899_v15 = vpack.c.bf16 %v5403_v13, %v5403_v13 }
 0x555   : > { %v4140_v44 = vpop.f32.mrf.mxu0 }
 0x556   : > { %4508 = vst.msk [vmem:[%s8482_s25 + $0xcc] sm:$0xf] %vm4456_vm0, %v4899_v15  ;;  %v4897_v32 = vpack.c.bf16 %v4140_v44, %v4140_v44 }
 0x558   : > { %4506 = vst.msk [vmem:[%s8482_s25 + $0xc4] sm:$0xf] %vm4456_vm0, %v4897_v32 }
 0x55f   : > { %v5410_v12 = vpop.f32.mrf.mxu1 }
 0x560   : > { %v4906_v16 = vpack.c.bf16 %v5410_v12, %v5410_v12 }
 0x561   : > { %v4169_v6 = vpop.f32.mrf.mxu1 }
 0x562   : > { %v5406_v3 = vpop.f32.mrf.mxu0  ;;  %4515 = vst.msk [vmem:[%s8482_s25 + $0xe8] sm:$0xf] %vm4456_vm0, %v4906_v16  ;;  %v4904_v62 = vpack.c.bf16 %v4169_v6, %v4169_v6 }
 0x563   : > { %v4902_v53 = vpack.c.bf16 %v5406_v3, %v5406_v3  ;;  %v5411_v34 = vpop.f32.mrf.mxu1 }
 0x564   : > { %v4153_v7 = vpop.f32.mrf.mxu0  ;;  %4513 = vst.msk [vmem:[%s8482_s25 + $0xe0] sm:$0xf] %vm4456_vm0, %v4904_v62  ;;  %v4907_v60 = vpack.c.bf16 %v5411_v34, %v5411_v34 }
 0x565   : > { %4511 = vst.msk [vmem:[%s8482_s25 + $0xd8] sm:$0xf] %vm4456_vm0, %v4902_v53  ;;  %v4900_v23 = vpack.c.bf16 %v4153_v7, %v4153_v7  ;;  %v4172_v25 = vpop.f32.mrf.mxu1 }
 0x566   : > { %v5407_v4 = vpop.f32.mrf.mxu0  ;;  %4516 = vst.msk [vmem:[%s8482_s25 + $0xec] sm:$0xf] %vm4456_vm0, %v4907_v60  ;;  %v4905_v56 = vpack.c.bf16 %v4172_v25, %v4172_v25 }
 0x567   : > { %4509 = vst.msk [vmem:[%s8482_s25 + $0xd0] sm:$0xf] %vm4456_vm0, %v4900_v23  ;;  %v4903_v10 = vpack.c.bf16 %v5407_v4, %v5407_v4 }
 0x568   : > { %v4156_v24 = vpop.f32.mrf.mxu0  ;;  %4514 = vst.msk [vmem:[%s8482_s25 + $0xe4] sm:$0xf] %vm4456_vm0, %v4905_v56 }
 0x569   : > { %4512 = vst.msk [vmem:[%s8482_s25 + $0xdc] sm:$0xf] %vm4456_vm0, %v4903_v10  ;;  %v4901_v33 = vpack.c.bf16 %v4156_v24, %v4156_v24 }
 0x56b   : > { %4510 = vst.msk [vmem:[%s8482_s25 + $0xd4] sm:$0xf] %vm4456_vm0, %v4901_v33 }
 0x56e   : > { %v5414_v48 = vpop.f32.mrf.mxu1 }
 0x56f   : > { %v4910_v14 = vpack.c.bf16 %v5414_v48, %v5414_v48 }
 0x570   : > { %v4185_v1 = vpop.f32.mrf.mxu1 }
 0x571   : > { %4519 = vst.msk [vmem:[%s8482_s25 + $0xf8] sm:$0xf] %vm4456_vm0, %v4910_v14  ;;  %v4908_v57 = vpack.c.bf16 %v4185_v1, %v4185_v1 }
 0x572   : > { %v5415_v43 = vpop.f32.mrf.mxu1 }
 0x573   : > { %4517 = vst.msk [vmem:[%s8482_s25 + $0xf0] sm:$0xf] %vm4456_vm0, %v4908_v57  ;;  %v4911_v31 = vpack.c.bf16 %v5415_v43, %v5415_v43 }
 0x574   : > { %v4188_v45 = vpop.f32.mrf.mxu1 }
 0x575   : > { %4520 = vst.msk [vmem:[%s8482_s25 + $0xfc] sm:$0xf] %vm4456_vm0, %v4911_v31  ;;  %v4909_v55 = vpack.c.bf16 %v4188_v45, %v4188_v45 }
 0x577   : > { %4518 = vst.msk [vmem:[%s8482_s25 + $0xf4] sm:$0xf] %vm4456_vm0, %v4909_v55 }
 0x578 PF: > { %p13_p11 = scmp.ge.s32.totalorder %s6160_s20, 6   ;;  %s9023_s9 = smov %s6083_s10 }
 0x579   : > { %s9024_s10 = smov %s6087_s11  ;;  %s9025_s11 = smov %s6180_s28 }
 0x57a   : > { %s9026_s12 = smov %s6160_s20  ;;  %15 = sbr.rel (!%p13_p11) target bundleno = 4 (0x4), region = 72 }
 0x57f   :  { %4545 = vsyncpa [#allocation3], 1 }
 0x580   :  { %4547 = vsyncpa [#allocation3 + $0x1], 1 }
 0x581   :  { %4548 = vsyncpa [#allocation5], 1 }

</bundles_post_ra>
